<compile_context>
chip_gen: v5e
topology: v5e:2x2
jax: 0.10.0
libtpu: 0.0.40
codegen_flags: <defaults>
</compile_context>

<pallas_src>
import jax
import jax.numpy as jnp
from jax import lax
from jax.experimental import pallas as pl
from jax.experimental.pallas import tpu as pltpu

C_BASE = 64              # `c` in the PyTorch module
NEG_SLOPE = 0.2
ACC_ELEMS_BUDGET = 16 * 8 * 128   # f32 accumulator elements (= 16 vregs)


# ----------------------------------------------------------------------------
# Pallas kernel: one conv layer (4x4, stride 2, pad 1) expressed as a 2x2
# window over a space-to-depth input.  Bias + leaky_relu fused, register
# accumulator.  Grid = (batch, output-row tiles), both parallel.
# ----------------------------------------------------------------------------
def _conv_kernel(xs_ref, w_ref, b_ref, o_ref):
    # xs_ref: (1, Hp, Wp, Kin) bf16   s2d input (Hp = Ho + 1, Wp = Wo + 1)
    # w_ref : (4, Kin, Cout) bf16     packed weights, tap index = 2*dh + dw
    # b_ref : (1, Cout) f32
    # o_ref : (1, ho_t, Wo, Cout) bf16
    ho_t, wo, cout = o_ref.shape[1], o_ref.shape[2], o_ref.shape[3]
    kin = w_ref.shape[1]

    row0 = pl.multiple_of(pl.program_id(1) * ho_t, ho_t)

    # Hoist the W-shifted slabs out of the tap loop: the dw=1 crop is the only
    # sublane-unaligned (relayout-forcing) slice -- do it once per grid step.
    x_w0 = xs_ref[0, pl.ds(row0, ho_t + 1), pl.ds(0, wo), :]
    x_w1 = xs_ref[0, pl.ds(row0, ho_t + 1), pl.ds(1, wo), :]

    # Register (SSA) accumulator, bias-initialised; no VMEM scratch RMW.
    acc = jnp.broadcast_to(b_ref[...], (ho_t * wo, cout))
    for dh in range(2):
        for dw in range(2):
            slab = x_w0 if dw == 0 else x_w1
            a = slab[dh:dh + ho_t].reshape(ho_t * wo, kin)
            acc = acc + jnp.dot(a, w_ref[2 * dh + dw],
                                preferred_element_type=jnp.float32)

    y = jnp.maximum(acc, NEG_SLOPE * acc)            # leaky_relu (slope < 1)
    o_ref[0] = y.reshape(ho_t, wo, cout).astype(o_ref.dtype)


def _conv_layer(xs, wp, bias):
    """xs: (B, Ho+1, Wo+1, 4*Cin) bf16, wp: (4, 4*Cin, Cout) bf16,
    bias: (1, Cout) f32  ->  (B, Ho, Wo, Cout) bf16 (leaky_relu applied)."""
    B, Hp, Wp, kin = xs.shape
    Ho, Wo = Hp - 1, Wp - 1
    cout = wp.shape[-1]

    # Row-tile so the f32 accumulator stays within ~16 vregs.
    ho_t = max(1, min(Ho, ACC_ELEMS_BUDGET // (Wo * cout)))
    while Ho % ho_t:
        ho_t -= 1

    return pl.pallas_call(
        _conv_kernel,
        out_shape=jax.ShapeDtypeStruct((B, Ho, Wo, cout), jnp.bfloat16),
        grid_spec=pltpu.PrefetchScalarGridSpec(
            num_scalar_prefetch=0,
            grid=(B, Ho // ho_t),
            in_specs=[
                pl.BlockSpec((1, Hp, Wp, kin), lambda b, r: (b, 0, 0, 0)),
                pl.BlockSpec((4, kin, cout), lambda b, r: (0, 0, 0)),
                pl.BlockSpec((1, cout), lambda b, r: (0, 0)),
            ],
            out_specs=pl.BlockSpec((1, ho_t, Wo, cout),
                                   lambda b, r: (b, r, 0, 0)),
        ),
        compiler_params=pltpu.CompilerParams(
            dimension_semantics=("parallel", "parallel")),
    )(xs, wp, bias)


# ----------------------------------------------------------------------------
# Pallas kernel: final Linear.  K-pipelined; accumulates directly into the
# (resident) f32 output block, bias-initialised at k == 0.  No padding of N.
# ----------------------------------------------------------------------------
def _fc_kernel(a_ref, w_ref, b_ref, o_ref):
    @pl.when(pl.program_id(0) == 0)
    def _():
        o_ref[...] = jnp.broadcast_to(b_ref[...], o_ref.shape)

    o_ref[...] += jnp.dot(a_ref[...], w_ref[...],
                          preferred_element_type=jnp.float32)


def _fc_layer(x_flat, wp, bias, *, tk=2048):
    """x_flat: (B, K) bf16, wp: (K, N) bf16, bias: (1, N) f32 -> (B, N) f32."""
    B, K = x_flat.shape
    N = wp.shape[1]
    tk = min(tk, K)
    while K % tk:            # adaptive: don't require K to be a multiple of 2048
        tk //= 2

    return pl.pallas_call(
        _fc_kernel,
        out_shape=jax.ShapeDtypeStruct((B, N), jnp.float32),
        grid_spec=pltpu.PrefetchScalarGridSpec(
            num_scalar_prefetch=0,
            grid=(K // tk,),
            in_specs=[
                pl.BlockSpec((B, tk), lambda k: (0, k)),
                pl.BlockSpec((tk, N), lambda k: (k, 0)),
                pl.BlockSpec((1, N), lambda k: (0, 0)),
            ],
            out_specs=pl.BlockSpec((B, N), lambda k: (0, 0)),
        ),
        compiler_params=pltpu.CompilerParams(
            dimension_semantics=("arbitrary",)),
    )(x_flat, wp, bias)


# ----------------------------------------------------------------------------
# Layer 1: plain XLA conv (per perf review -- the s2d layout for Cin=1 is
# 4/128 lane-occupancy for ~2 MFLOP and does not deserve a Pallas kernel).
# ----------------------------------------------------------------------------
def _conv1_xla(x_nhwc, w_hwio, bias):
    # TODO(synk): conv1 intentionally stays an XLA conv; the Pallas path
    # starts at conv2 (see perf-review item on the lane-sparse layer 1).
    y = lax.conv_general_dilated(
        x_nhwc, w_hwio, window_strides=(2, 2), padding=((1, 1), (1, 1)),
        dimension_numbers=("NHWC", "HWIO", "NHWC"),
        preferred_element_type=jnp.float32)
    y = y + bias
    y = jnp.maximum(y, NEG_SLOPE * y)
    return y.astype(jnp.bfloat16)


# ----------------------------------------------------------------------------
# JAX glue: pad + space-to-depth(2) (NHWC, bf16) -- ~1x-sized relayout
# ----------------------------------------------------------------------------
def _pad_s2d(y):
    """(B, H, W, C) -> (B, (H+2)//2, (W+2)//2, 4C); depth order (a, b, c)."""
    B, H, W, C = y.shape
    y = jnp.pad(y, ((0, 0), (1, 1), (1, 1), (0, 0)))
    y = y.reshape(B, (H + 2) // 2, 2, (W + 2) // 2, 2, C)
    y = y.transpose(0, 1, 3, 2, 4, 5)
    return y.reshape(B, (H + 2) // 2, (W + 2) // 2, 4 * C)


# ----------------------------------------------------------------------------
# One-time weight packing (call OUTSIDE jit) -- no per-forward transposes,
# no channel padding anywhere.
# ----------------------------------------------------------------------------
def _pack_conv(w, b):
    """torch w (Cout, Cin, 4, 4), b (Cout,) -> wp (4, 4*Cin, Cout) bf16,
    bp (1, Cout) f32, matching the s2d tap/channel order used in-kernel."""
    cout, cin = w.shape[0], w.shape[1]
    # w[o, c, 2dh+a, 2dw+b] -> (dh, dw, a, b, c, o)
    w_r = w.reshape(cout, cin, 2, 2, 2, 2).transpose(2, 4, 3, 5, 1, 0)
    wp = w_r.reshape(4, 4 * cin, cout).astype(jnp.bfloat16)
    bp = b.reshape(1, cout).astype(jnp.float32)
    return wp, bp


def _pack_fc(wfc, bfc):
    """torch wfc (p_f, 256*8*8) in (c,h,w) column order -> (16384, p_f) bf16
    with columns reordered to the NHWC (h,w,c) flatten; bias (1, p_f) f32."""
    p_f = wfc.shape[0]
    c4 = 4 * C_BASE
    w = wfc.reshape(p_f, c4, 8, 8).transpose(2, 3, 1, 0).reshape(8 * 8 * c4, p_f)
    return w.astype(jnp.bfloat16), bfc.reshape(1, p_f).astype(jnp.float32)


def pack_params(params):
    w1 = jnp.transpose(params["w1"], (2, 3, 1, 0)).astype(jnp.bfloat16)  # OIHW->HWIO
    b1 = params["b1"].astype(jnp.float32)
    w2, b2 = _pack_conv(params["w2"], params["b2"])
    w3, b3 = _pack_conv(params["w3"], params["b3"])
    wf, bf = _pack_fc(params["wfc"], params["bfc"])
    return {"w1": w1, "b1": b1, "w2": w2, "b2": b2, "w3": w3, "b3": b3,
            "wfc": wf, "bfc": bf}


# ----------------------------------------------------------------------------
# Full FeatMap forward
# ----------------------------------------------------------------------------
def feat_map_forward(x, pp):
    if x.ndim == 3:                          # matches `if x.dim() == 3`
        x = x[None, :, :, :]
    B = x.shape[0]
    # NCHW with Cin=1 -> NHWC is a free reshape; cast operands to bf16 once.
    x = x.astype(jnp.bfloat16).reshape(B, 64, 64, 1)

    y = _conv1_xla(x, pp["w1"], pp["b1"])               # (B, 32, 32,  64)
    y = _conv_layer(_pad_s2d(y), pp["w2"], pp["b2"])    # (B, 16, 16, 128)
    y = _conv_layer(_pad_s2d(y), pp["w3"], pp["b3"])    # (B,  8,  8, 256)

    y = y.reshape(B, 8 * 8 * 4 * C_BASE)                # NHWC flatten (free)
    return _fc_layer(y, pp["wfc"], pp["bfc"])           # (B, p_f) f32


# ----------------------------------------------------------------------------
# Pure-JAX f32 reference (correctness sanity check)
# ----------------------------------------------------------------------------
def _ref_forward(x, params):
    def conv(x, w, b):
        y = lax.conv_general_dilated(
            x, w, window_strides=(2, 2), padding=((1, 1), (1, 1)),
            dimension_numbers=("NCHW", "OIHW", "NCHW"))
        y = y + b[None, :, None, None]
        return jnp.where(y >= 0, y, NEG_SLOPE * y)

    if x.ndim == 3:
        x = x[None]
    x = conv(x, params["w1"], params["b1"])
    x = conv(x, params["w2"], params["b2"])
    x = conv(x, params["w3"], params["b3"])
    x = x.reshape(x.shape[0], C_BASE * 4 * 8 * 8)
    return x @ params["wfc"].T + params["bfc"]


# ----------------------------------------------------------------------------
def init_params(key, p_f):
    ks = jax.random.split(key, 8)
    c = C_BASE

    def u(k, shape, fan_in):
        bound = 1.0 / jnp.sqrt(fan_in)
        return jax.random.uniform(k, shape, jnp.float32, -bound, bound)

    return {
        "w1": u(ks[0], (c, 1, 4, 4), 1 * 16),
        "b1": u(ks[1], (c,), 1 * 16),
        "w2": u(ks[2], (c * 2, c, 4, 4), c * 16),
        "b2": u(ks[3], (c * 2,), c * 16),
        "w3": u(ks[4], (c * 4, c * 2, 4, 4), c * 2 * 16),
        "b3": u(ks[5], (c * 4,), c * 2 * 16),
        "wfc": u(ks[6], (p_f, c * 4 * 8 * 8), c * 4 * 8 * 8),
        "bfc": u(ks[7], (p_f,), c * 4 * 8 * 8),
    }


if __name__ == "__main__":
    p_f = 32
    batch = 2

    key = jax.random.PRNGKey(0)
    kx, kp = jax.random.split(key)
    x = jax.random.normal(kx, (batch, 1, 64, 64), jnp.float32)
    params = init_params(kp, p_f)

    packed = pack_params(params)             # one-time packing, outside jit
    fwd = jax.jit(feat_map_forward)

    out = jax.block_until_ready(fwd(x, packed))
    assert out.shape == (batch, p_f), out.shape

    ref = jax.block_until_ready(_ref_forward(x, params))
    # bf16 operands with f32 accumulation -> compare against the f32 reference
    # with a bf16-appropriate tolerance.
    assert jnp.allclose(out, ref, rtol=2e-2, atol=2e-2), \
        float(jnp.max(jnp.abs(out - ref)))

    print("KERNEL_OK")
</pallas_src>

<mosaic_0001>
module attributes {stable_mosaic.version = 11 : i64} {
  func.func @_conv_kernel(%arg0: i32, %arg1: i32, %arg2: memref<1x17x17x256xbf16, #tpu.memory_space<vmem>>, %arg3: memref<4x256x128xbf16, #tpu.memory_space<vmem>>, %arg4: memref<1x128xf32, #tpu.memory_space<vmem>>, %arg5: memref<1x8x16x128xbf16, #tpu.memory_space<vmem>>) attributes {dimension_semantics = [#tpu.dimension_semantics<parallel>, #tpu.dimension_semantics<parallel>], iteration_bounds = array<i64: 2, 2>, scalar_prefetch = 0 : i64, scratch_operands = 0 : i64, tpu.core_type = #tpu.core_type<tc>, window_params = [{transform_indices = @transform_0, window_bounds = array<i64: 1, 17, 17, 256>}, {pipeline_mode = #tpu.pipeline_mode<synchronous>, transform_indices = @transform_1, window_bounds = array<i64: 4, 256, 128>}, {pipeline_mode = #tpu.pipeline_mode<synchronous>, transform_indices = @transform_2, window_bounds = array<i64: 1, 128>}, {transform_indices = @transform_3, window_bounds = array<i64: 1, 8, 16, 128>}]} {
    %c8_i32 = arith.constant 8 : i32
    %0 = arith.muli %arg1, %c8_i32 : i32
    %1 = tpu.assume_multiple %0, 8 : i32
    %c0 = arith.constant 0 : index
    %2 = arith.index_cast %1 : i32 to index
    %c0_0 = arith.constant 0 : index
    %c0_1 = arith.constant 0 : index
    %3 = vector.load %arg2[%c0, %2, %c0_0, %c0_1] : memref<1x17x17x256xbf16, #tpu.memory_space<vmem>>, vector<1x9x16x256xbf16>
    %4 = vector.shape_cast %3 : vector<1x9x16x256xbf16> to vector<9x16x256xbf16>
    %c0_2 = arith.constant 0 : index
    %5 = arith.index_cast %1 : i32 to index
    %c1 = arith.constant 1 : index
    %c0_3 = arith.constant 0 : index
    %6 = vector.load %arg2[%c0_2, %5, %c1, %c0_3] : memref<1x17x17x256xbf16, #tpu.memory_space<vmem>>, vector<1x9x16x256xbf16>
    %7 = vector.shape_cast %6 : vector<1x9x16x256xbf16> to vector<9x16x256xbf16>
    %c0_4 = arith.constant 0 : index
    %c0_5 = arith.constant 0 : index
    %8 = vector.load %arg4[%c0_4, %c0_5] : memref<1x128xf32, #tpu.memory_space<vmem>>, vector<1x128xf32>
    %9 = vector.shape_cast %8 : vector<1x128xf32> to vector<1x128xf32>
    %10 = vector.broadcast %9 : vector<1x128xf32> to vector<128x128xf32>
    %11 = vector.extract_strided_slice %4 {offsets = [0, 0, 0], sizes = [8, 16, 256], strides = [1, 1, 1]} : vector<9x16x256xbf16> to vector<8x16x256xbf16>
    %12 = vector.shape_cast %11 : vector<8x16x256xbf16> to vector<128x256xbf16>
    %c0_6 = arith.constant 0 : index
    %c0_7 = arith.constant 0 : index
    %c0_8 = arith.constant 0 : index
    %13 = vector.load %arg3[%c0_6, %c0_7, %c0_8] : memref<4x256x128xbf16, #tpu.memory_space<vmem>>, vector<1x256x128xbf16>
    %14 = vector.shape_cast %13 : vector<1x256x128xbf16> to vector<256x128xbf16>
    %cst = arith.constant dense<0.000000e+00> : vector<128x128xf32>
    %15 = tpu.matmul %12, %14, %cst {dimension_numbers = #tpu.dot_dimension_numbers<[1], [0], [0], [1], [0, 0, 1, 1], [], []>} : vector<128x256xbf16>, vector<256x128xbf16>, vector<128x128xf32> -> vector<128x128xf32>
    %16 = arith.addf %10, %15 : vector<128x128xf32>
    %17 = vector.extract_strided_slice %7 {offsets = [0, 0, 0], sizes = [8, 16, 256], strides = [1, 1, 1]} : vector<9x16x256xbf16> to vector<8x16x256xbf16>
    %18 = vector.shape_cast %17 : vector<8x16x256xbf16> to vector<128x256xbf16>
    %c1_9 = arith.constant 1 : index
    %c0_10 = arith.constant 0 : index
    %c0_11 = arith.constant 0 : index
    %19 = vector.load %arg3[%c1_9, %c0_10, %c0_11] : memref<4x256x128xbf16, #tpu.memory_space<vmem>>, vector<1x256x128xbf16>
    %20 = vector.shape_cast %19 : vector<1x256x128xbf16> to vector<256x128xbf16>
    %cst_12 = arith.constant dense<0.000000e+00> : vector<128x128xf32>
    %21 = tpu.matmul %18, %20, %cst_12 {dimension_numbers = #tpu.dot_dimension_numbers<[1], [0], [0], [1], [0, 0, 1, 1], [], []>} : vector<128x256xbf16>, vector<256x128xbf16>, vector<128x128xf32> -> vector<128x128xf32>
    %22 = arith.addf %16, %21 : vector<128x128xf32>
    %23 = vector.extract_strided_slice %4 {offsets = [1, 0, 0], sizes = [8, 16, 256], strides = [1, 1, 1]} : vector<9x16x256xbf16> to vector<8x16x256xbf16>
    %24 = vector.shape_cast %23 : vector<8x16x256xbf16> to vector<128x256xbf16>
    %c2 = arith.constant 2 : index
    %c0_13 = arith.constant 0 : index
    %c0_14 = arith.constant 0 : index
    %25 = vector.load %arg3[%c2, %c0_13, %c0_14] : memref<4x256x128xbf16, #tpu.memory_space<vmem>>, vector<1x256x128xbf16>
    %26 = vector.shape_cast %25 : vector<1x256x128xbf16> to vector<256x128xbf16>
    %cst_15 = arith.constant dense<0.000000e+00> : vector<128x128xf32>
    %27 = tpu.matmul %24, %26, %cst_15 {dimension_numbers = #tpu.dot_dimension_numbers<[1], [0], [0], [1], [0, 0, 1, 1], [], []>} : vector<128x256xbf16>, vector<256x128xbf16>, vector<128x128xf32> -> vector<128x128xf32>
    %28 = arith.addf %22, %27 : vector<128x128xf32>
    %29 = vector.extract_strided_slice %7 {offsets = [1, 0, 0], sizes = [8, 16, 256], strides = [1, 1, 1]} : vector<9x16x256xbf16> to vector<8x16x256xbf16>
    %30 = vector.shape_cast %29 : vector<8x16x256xbf16> to vector<128x256xbf16>
    %c3 = arith.constant 3 : index
    %c0_16 = arith.constant 0 : index
    %c0_17 = arith.constant 0 : index
    %31 = vector.load %arg3[%c3, %c0_16, %c0_17] : memref<4x256x128xbf16, #tpu.memory_space<vmem>>, vector<1x256x128xbf16>
    %32 = vector.shape_cast %31 : vector<1x256x128xbf16> to vector<256x128xbf16>
    %cst_18 = arith.constant dense<0.000000e+00> : vector<128x128xf32>
    %33 = tpu.matmul %30, %32, %cst_18 {dimension_numbers = #tpu.dot_dimension_numbers<[1], [0], [0], [1], [0, 0, 1, 1], [], []>} : vector<128x256xbf16>, vector<256x128xbf16>, vector<128x128xf32> -> vector<128x128xf32>
    %34 = arith.addf %28, %33 : vector<128x128xf32>
    %cst_19 = arith.constant 2.000000e-01 : f32
    %35 = vector.broadcast %cst_19 : f32 to vector<128x128xf32>
    %36 = arith.mulf %35, %34 : vector<128x128xf32>
    %37 = arith.maximumf %34, %36 : vector<128x128xf32>
    %38 = vector.shape_cast %37 : vector<128x128xf32> to vector<8x16x128xf32>
    %39 = arith.truncf %38 : vector<8x16x128xf32> to vector<8x16x128xbf16>
    %c0_20 = arith.constant 0 : index
    %c0_21 = arith.constant 0 : index
    %c0_22 = arith.constant 0 : index
    %c0_23 = arith.constant 0 : index
    %40 = vector.load %arg5[%c0_20, %c0_21, %c0_22, %c0_23] : memref<1x8x16x128xbf16, #tpu.memory_space<vmem>>, vector<1x8x16x128xbf16>
    %41 = vector.shape_cast %40 : vector<1x8x16x128xbf16> to vector<8x16x128xbf16>
    %42 = vector.shape_cast %39 : vector<8x16x128xbf16> to vector<1x8x16x128xbf16>
    tpu.vector_store %arg5[%c0_20, %c0_21, %c0_22, %c0_23], %42 {strides = array<i32>} : memref<1x8x16x128xbf16, #tpu.memory_space<vmem>>, vector<1x8x16x128xbf16>,
    return
  }
  func.func @transform_0(%arg0: i32, %arg1: i32) -> (i32, i32, i32, i32) {
    %c0_i32 = arith.constant 0 : i32
    %c0_i32_0 = arith.constant 0 : i32
    %c0_i32_1 = arith.constant 0 : i32
    %c0_i32_2 = arith.constant 0 : i32
    return %arg0, %c0_i32, %c0_i32_0, %c0_i32_1 : i32, i32, i32, i32
  }
  func.func @transform_1(%arg0: i32, %arg1: i32) -> (i32, i32, i32) {
    %c0_i32 = arith.constant 0 : i32
    %c0_i32_0 = arith.constant 0 : i32
    %c0_i32_1 = arith.constant 0 : i32
    %c0_i32_2 = arith.constant 0 : i32
    return %c0_i32, %c0_i32_0, %c0_i32_1 : i32, i32, i32
  }
  func.func @transform_2(%arg0: i32, %arg1: i32) -> (i32, i32) {
    %c0_i32 = arith.constant 0 : i32
    %c0_i32_0 = arith.constant 0 : i32
    %c0_i32_1 = arith.constant 0 : i32
    return %c0_i32, %c0_i32_0 : i32, i32
  }
  func.func @transform_3(%arg0: i32, %arg1: i32) -> (i32, i32, i32, i32) {
    %c0_i32 = arith.constant 0 : i32
    %c0_i32_0 = arith.constant 0 : i32
    %c0_i32_1 = arith.constant 0 : i32
    return %arg0, %arg1, %c0_i32, %c0_i32_0 : i32, i32, i32, i32
  }
}

module attributes {stable_mosaic.version = 11 : i64} {
  func.func @_conv_kernel(%arg0: i32, %arg1: i32, %arg2: memref<1x9x9x512xbf16, #tpu.memory_space<vmem>>, %arg3: memref<4x512x256xbf16, #tpu.memory_space<vmem>>, %arg4: memref<1x256xf32, #tpu.memory_space<vmem>>, %arg5: memref<1x8x8x256xbf16, #tpu.memory_space<vmem>>) attributes {dimension_semantics = [#tpu.dimension_semantics<parallel>, #tpu.dimension_semantics<parallel>], iteration_bounds = array<i64: 2, 1>, scalar_prefetch = 0 : i64, scratch_operands = 0 : i64, tpu.core_type = #tpu.core_type<tc>, window_params = [{transform_indices = @transform_0, window_bounds = array<i64: 1, 9, 9, 512>}, {pipeline_mode = #tpu.pipeline_mode<synchronous>, transform_indices = @transform_1, window_bounds = array<i64: 4, 512, 256>}, {pipeline_mode = #tpu.pipeline_mode<synchronous>, transform_indices = @transform_2, window_bounds = array<i64: 1, 256>}, {transform_indices = @transform_3, window_bounds = array<i64: 1, 8, 8, 256>}]} {
    %c8_i32 = arith.constant 8 : i32
    %0 = arith.muli %arg1, %c8_i32 : i32
    %1 = tpu.assume_multiple %0, 8 : i32
    %c0 = arith.constant 0 : index
    %2 = arith.index_cast %1 : i32 to index
    %c0_0 = arith.constant 0 : index
    %c0_1 = arith.constant 0 : index
    %3 = vector.load %arg2[%c0, %2, %c0_0, %c0_1] : memref<1x9x9x512xbf16, #tpu.memory_space<vmem>>, vector<1x9x8x512xbf16>
    %4 = vector.shape_cast %3 : vector<1x9x8x512xbf16> to vector<9x8x512xbf16>
    %c0_2 = arith.constant 0 : index
    %5 = arith.index_cast %1 : i32 to index
    %c1 = arith.constant 1 : index
    %c0_3 = arith.constant 0 : index
    %6 = vector.load %arg2[%c0_2, %5, %c1, %c0_3] : memref<1x9x9x512xbf16, #tpu.memory_space<vmem>>, vector<1x9x8x512xbf16>
    %7 = vector.shape_cast %6 : vector<1x9x8x512xbf16> to vector<9x8x512xbf16>
    %c0_4 = arith.constant 0 : index
    %c0_5 = arith.constant 0 : index
    %8 = vector.load %arg4[%c0_4, %c0_5] : memref<1x256xf32, #tpu.memory_space<vmem>>, vector<1x256xf32>
    %9 = vector.shape_cast %8 : vector<1x256xf32> to vector<1x256xf32>
    %10 = vector.broadcast %9 : vector<1x256xf32> to vector<64x256xf32>
    %11 = vector.extract_strided_slice %4 {offsets = [0, 0, 0], sizes = [8, 8, 512], strides = [1, 1, 1]} : vector<9x8x512xbf16> to vector<8x8x512xbf16>
    %12 = vector.shape_cast %11 : vector<8x8x512xbf16> to vector<64x512xbf16>
    %c0_6 = arith.constant 0 : index
    %c0_7 = arith.constant 0 : index
    %c0_8 = arith.constant 0 : index
    %13 = vector.load %arg3[%c0_6, %c0_7, %c0_8] : memref<4x512x256xbf16, #tpu.memory_space<vmem>>, vector<1x512x256xbf16>
    %14 = vector.shape_cast %13 : vector<1x512x256xbf16> to vector<512x256xbf16>
    %cst = arith.constant dense<0.000000e+00> : vector<64x256xf32>
    %15 = tpu.matmul %12, %14, %cst {dimension_numbers = #tpu.dot_dimension_numbers<[1], [0], [0], [1], [0, 0, 1, 1], [], []>} : vector<64x512xbf16>, vector<512x256xbf16>, vector<64x256xf32> -> vector<64x256xf32>
    %16 = arith.addf %10, %15 : vector<64x256xf32>
    %17 = vector.extract_strided_slice %7 {offsets = [0, 0, 0], sizes = [8, 8, 512], strides = [1, 1, 1]} : vector<9x8x512xbf16> to vector<8x8x512xbf16>
    %18 = vector.shape_cast %17 : vector<8x8x512xbf16> to vector<64x512xbf16>
    %c1_9 = arith.constant 1 : index
    %c0_10 = arith.constant 0 : index
    %c0_11 = arith.constant 0 : index
    %19 = vector.load %arg3[%c1_9, %c0_10, %c0_11] : memref<4x512x256xbf16, #tpu.memory_space<vmem>>, vector<1x512x256xbf16>
    %20 = vector.shape_cast %19 : vector<1x512x256xbf16> to vector<512x256xbf16>
    %cst_12 = arith.constant dense<0.000000e+00> : vector<64x256xf32>
    %21 = tpu.matmul %18, %20, %cst_12 {dimension_numbers = #tpu.dot_dimension_numbers<[1], [0], [0], [1], [0, 0, 1, 1], [], []>} : vector<64x512xbf16>, vector<512x256xbf16>, vector<64x256xf32> -> vector<64x256xf32>
    %22 = arith.addf %16, %21 : vector<64x256xf32>
    %23 = vector.extract_strided_slice %4 {offsets = [1, 0, 0], sizes = [8, 8, 512], strides = [1, 1, 1]} : vector<9x8x512xbf16> to vector<8x8x512xbf16>
    %24 = vector.shape_cast %23 : vector<8x8x512xbf16> to vector<64x512xbf16>
    %c2 = arith.constant 2 : index
    %c0_13 = arith.constant 0 : index
    %c0_14 = arith.constant 0 : index
    %25 = vector.load %arg3[%c2, %c0_13, %c0_14] : memref<4x512x256xbf16, #tpu.memory_space<vmem>>, vector<1x512x256xbf16>
    %26 = vector.shape_cast %25 : vector<1x512x256xbf16> to vector<512x256xbf16>
    %cst_15 = arith.constant dense<0.000000e+00> : vector<64x256xf32>
    %27 = tpu.matmul %24, %26, %cst_15 {dimension_numbers = #tpu.dot_dimension_numbers<[1], [0], [0], [1], [0, 0, 1, 1], [], []>} : vector<64x512xbf16>, vector<512x256xbf16>, vector<64x256xf32> -> vector<64x256xf32>
    %28 = arith.addf %22, %27 : vector<64x256xf32>
    %29 = vector.extract_strided_slice %7 {offsets = [1, 0, 0], sizes = [8, 8, 512], strides = [1, 1, 1]} : vector<9x8x512xbf16> to vector<8x8x512xbf16>
    %30 = vector.shape_cast %29 : vector<8x8x512xbf16> to vector<64x512xbf16>
    %c3 = arith.constant 3 : index
    %c0_16 = arith.constant 0 : index
    %c0_17 = arith.constant 0 : index
    %31 = vector.load %arg3[%c3, %c0_16, %c0_17] : memref<4x512x256xbf16, #tpu.memory_space<vmem>>, vector<1x512x256xbf16>
    %32 = vector.shape_cast %31 : vector<1x512x256xbf16> to vector<512x256xbf16>
    %cst_18 = arith.constant dense<0.000000e+00> : vector<64x256xf32>
    %33 = tpu.matmul %30, %32, %cst_18 {dimension_numbers = #tpu.dot_dimension_numbers<[1], [0], [0], [1], [0, 0, 1, 1], [], []>} : vector<64x512xbf16>, vector<512x256xbf16>, vector<64x256xf32> -> vector<64x256xf32>
    %34 = arith.addf %28, %33 : vector<64x256xf32>
    %cst_19 = arith.constant 2.000000e-01 : f32
    %35 = vector.broadcast %cst_19 : f32 to vector<64x256xf32>
    %36 = arith.mulf %35, %34 : vector<64x256xf32>
    %37 = arith.maximumf %34, %36 : vector<64x256xf32>
    %38 = vector.shape_cast %37 : vector<64x256xf32> to vector<8x8x256xf32>
    %39 = arith.truncf %38 : vector<8x8x256xf32> to vector<8x8x256xbf16>
    %c0_20 = arith.constant 0 : index
    %c0_21 = arith.constant 0 : index
    %c0_22 = arith.constant 0 : index
    %c0_23 = arith.constant 0 : index
    %40 = vector.load %arg5[%c0_20, %c0_21, %c0_22, %c0_23] : memref<1x8x8x256xbf16, #tpu.memory_space<vmem>>, vector<1x8x8x256xbf16>
    %41 = vector.shape_cast %40 : vector<1x8x8x256xbf16> to vector<8x8x256xbf16>
    %42 = vector.shape_cast %39 : vector<8x8x256xbf16> to vector<1x8x8x256xbf16>
    tpu.vector_store %arg5[%c0_20, %c0_21, %c0_22, %c0_23], %42 {strides = array<i32>} : memref<1x8x8x256xbf16, #tpu.memory_space<vmem>>, vector<1x8x8x256xbf16>,
    return
  }
  func.func @transform_0(%arg0: i32, %arg1: i32) -> (i32, i32, i32, i32) {
    %c0_i32 = arith.constant 0 : i32
    %c0_i32_0 = arith.constant 0 : i32
    %c0_i32_1 = arith.constant 0 : i32
    %c0_i32_2 = arith.constant 0 : i32
    return %arg0, %c0_i32, %c0_i32_0, %c0_i32_1 : i32, i32, i32, i32
  }
  func.func @transform_1(%arg0: i32, %arg1: i32) -> (i32, i32, i32) {
    %c0_i32 = arith.constant 0 : i32
    %c0_i32_0 = arith.constant 0 : i32
    %c0_i32_1 = arith.constant 0 : i32
    %c0_i32_2 = arith.constant 0 : i32
    return %c0_i32, %c0_i32_0, %c0_i32_1 : i32, i32, i32
  }
  func.func @transform_2(%arg0: i32, %arg1: i32) -> (i32, i32) {
    %c0_i32 = arith.constant 0 : i32
    %c0_i32_0 = arith.constant 0 : i32
    %c0_i32_1 = arith.constant 0 : i32
    return %c0_i32, %c0_i32_0 : i32, i32
  }
  func.func @transform_3(%arg0: i32, %arg1: i32) -> (i32, i32, i32, i32) {
    %c0_i32 = arith.constant 0 : i32
    %c0_i32_0 = arith.constant 0 : i32
    %c0_i32_1 = arith.constant 0 : i32
    return %arg0, %arg1, %c0_i32, %c0_i32_0 : i32, i32, i32, i32
  }
}

module attributes {stable_mosaic.version = 11 : i64} {
  func.func @_fc_kernel(%arg0: i32, %arg1: memref<2x2048xbf16, #tpu.memory_space<vmem>>, %arg2: memref<2048x32xbf16, #tpu.memory_space<vmem>>, %arg3: memref<1x32xf32, #tpu.memory_space<vmem>>, %arg4: memref<2x32xf32, #tpu.memory_space<vmem>>) attributes {dimension_semantics = [#tpu.dimension_semantics<arbitrary>], iteration_bounds = array<i64: 8>, scalar_prefetch = 0 : i64, scratch_operands = 0 : i64, tpu.core_type = #tpu.core_type<tc>, window_params = [{transform_indices = @transform_0, window_bounds = array<i64: 2, 2048>}, {transform_indices = @transform_1, window_bounds = array<i64: 2048, 32>}, {pipeline_mode = #tpu.pipeline_mode<synchronous>, transform_indices = @transform_2, window_bounds = array<i64: 1, 32>}, {pipeline_mode = #tpu.pipeline_mode<synchronous>, transform_indices = @transform_3, window_bounds = array<i64: 2, 32>}]} {
    %c0_i32 = arith.constant 0 : i32
    %0 = arith.cmpi eq, %arg0, %c0_i32 : i32
    %1 = arith.extui %0 : i1 to i32
    %c0_i32_0 = arith.constant 0 : i32
    %2 = arith.cmpi ne, %1, %c0_i32_0 : i32
    scf.if %2 {
      %c0_8 = arith.constant 0 : index
      %c0_9 = arith.constant 0 : index
      %9 = vector.load %arg3[%c0_8, %c0_9] : memref<1x32xf32, #tpu.memory_space<vmem>>, vector<1x32xf32>
      %10 = vector.shape_cast %9 : vector<1x32xf32> to vector<1x32xf32>
      %11 = vector.broadcast %10 : vector<1x32xf32> to vector<2x32xf32>
      %c0_10 = arith.constant 0 : index
      %c0_11 = arith.constant 0 : index
      %12 = vector.load %arg4[%c0_10, %c0_11] : memref<2x32xf32, #tpu.memory_space<vmem>>, vector<2x32xf32>
      tpu.vector_store %arg4[%c0_10, %c0_11], %11 {strides = array<i32>} : memref<2x32xf32, #tpu.memory_space<vmem>>, vector<2x32xf32>,
    } else {
    }
    %c0 = arith.constant 0 : index
    %c0_1 = arith.constant 0 : index
    %3 = vector.load %arg4[%c0, %c0_1] : memref<2x32xf32, #tpu.memory_space<vmem>>, vector<2x32xf32>
    %c0_2 = arith.constant 0 : index
    %c0_3 = arith.constant 0 : index
    %4 = vector.load %arg1[%c0_2, %c0_3] : memref<2x2048xbf16, #tpu.memory_space<vmem>>, vector<2x2048xbf16>
    %c0_4 = arith.constant 0 : index
    %c0_5 = arith.constant 0 : index
    %5 = vector.load %arg2[%c0_4, %c0_5] : memref<2048x32xbf16, #tpu.memory_space<vmem>>, vector<2048x32xbf16>
    %cst = arith.constant dense<0.000000e+00> : vector<2x32xf32>
    %6 = tpu.matmul %4, %5, %cst {dimension_numbers = #tpu.dot_dimension_numbers<[1], [0], [0], [1], [0, 0, 1, 1], [], []>} : vector<2x2048xbf16>, vector<2048x32xbf16>, vector<2x32xf32> -> vector<2x32xf32>
    %7 = arith.addf %3, %6 : vector<2x32xf32>
    %c0_6 = arith.constant 0 : index
    %c0_7 = arith.constant 0 : index
    %8 = vector.load %arg4[%c0_6, %c0_7] : memref<2x32xf32, #tpu.memory_space<vmem>>, vector<2x32xf32>
    tpu.vector_store %arg4[%c0_6, %c0_7], %7 {strides = array<i32>} : memref<2x32xf32, #tpu.memory_space<vmem>>, vector<2x32xf32>,
    return
  }
  func.func @transform_0(%arg0: i32) -> (i32, i32) {
    %c0_i32 = arith.constant 0 : i32
    %c0_i32_0 = arith.constant 0 : i32
    return %c0_i32, %arg0 : i32, i32
  }
  func.func @transform_1(%arg0: i32) -> (i32, i32) {
    %c0_i32 = arith.constant 0 : i32
    %c0_i32_0 = arith.constant 0 : i32
    return %arg0, %c0_i32 : i32, i32
  }
  func.func @transform_2(%arg0: i32) -> (i32, i32) {
    %c0_i32 = arith.constant 0 : i32
    %c0_i32_0 = arith.constant 0 : i32
    %c0_i32_1 = arith.constant 0 : i32
    return %c0_i32, %c0_i32_0 : i32, i32
  }
  func.func @transform_3(%arg0: i32) -> (i32, i32) {
    %c0_i32 = arith.constant 0 : i32
    %c0_i32_0 = arith.constant 0 : i32
    %c0_i32_1 = arith.constant 0 : i32
    return %c0_i32, %c0_i32_0 : i32, i32
  }
}

</mosaic_0001>

<bundles_post_ra>
// kernel: feat_map_forward.3
= control target key start
LH: loop header
LB: loop body
LE: loop exit
PB: predicated region body
PF: predicated region fallthrough
CT: control target
= control target key end

     0   :  { %s2410_s12 = smov 0   ;;  %s2412_s13 = smov 0   ;;  %s2959_s0 = inlined_call_operand.vmem [shape: bf16[2,17,17,256], index: 0, kind: input, shape index: {}]   ;;  %s2960_s1 = inlined_call_operand.vmem [shape: bf16[4,256,128], index: 1, kind: input, shape index: {}]   ;;  %s2961_s2 = inlined_call_operand.vmem [shape: f32[1,128], index: 2, kind: input, shape index: {}]   ;;  %s2962_s3 = inlined_call_operand.vmem [shape: bf16[2,16,16,128], index: 3, kind: output, shape index: {}]  }
   0x1   :  { %s2414_s14 = smov 0   ;;  %s2416_s15 = smov 0  }
   0x2   :  { %s2418_s16 = smov 0  }
   0x3 LB: > { %s22_s17 = sadd.s32 1, %s2380_s14  ;;  %s25_s18 = sadd.s32 1, %s2384_s15  ;;  %s2388_s16 = sphi %s2418_s16, %s13_s16   ;;  %s2384_s15 = sphi %s2416_s15, %s2968_s15   ;;  %s2380_s14 = sphi %s2414_s14, %s2967_s14   ;;  %s2376_s13 = sphi %s2412_s13, %s2966_s13   ;;  %s2372_s12 = sphi %s2410_s12, %s2965_s12  }
   0x4   : > { %p23_p0 = scmp.ge.s32.totalorder %s22_s17, 2  ;;  %p1743_p1 = scmp.ge.s32.totalorder %s2388_s16, 1 }
   0x5   : > { %p151_p2 = scmp.lt.s32.totalorder %s2388_s16, 5 }
   0x6   : > { %s2970_s17 = smov (%p23_p0, %s22_s17), 0  ;;  %s2972_s18 = smov (!%p23_p0, %s25_s18), %s2384_s15 }
   0x7   : > { %p152_p3 = pnand %p1743_p1, %p151_p2  ;;  %p27_p4 = scmp.ge.s32.totalorder %s2972_s18, 2 }
   0x8   : > { %p180_p5 = scmp.lt.s32.totalorder (!%p152_p3), %s2376_s13, 1  ;;  %s2178_s9 = smul.u32 (!%p152_p3), 192, %s2372_s12 }
   0x9   : > { %s2974_s18 = smov (%p27_p4, %s2972_s18), 0  ;;  %155 = sbr.rel (%p152_p3) target bundleno = 440 (0x1b8), region = 32 }
   0xe   : > { %v2204_v0 = vld [vmem:[%s2960_s1 + $0x38] sm:$0xff]  ;;  %v2203_v4 = vld [vmem:[%s2960_s1 + $0x30] sm:$0xff]  ;;  %s2976_s13 = smov (!%p180_p5, %s2376_s13), 1  ;;  %v2202_v8 = vld [vmem:[%s2960_s1 + $0x28] sm:$0xff]  ;;  %vm553_vm0 = vsmask.f32 3328 }
   0xf   : > { %v2212_v1 = vld [vmem:[%s2960_s1 + $0x78] sm:$0xff]  ;;  %439 = vmatpush.bf16.msra.mxu0 %v2204_v0  ;;  %v2211_v5 = vld [vmem:[%s2960_s1 + $0x70] sm:$0xff]  ;;  %s2308_s8 = smul.u32 408, %s2976_s13  ;;  %v2210_v9 = vld [vmem:[%s2960_s1 + $0x68] sm:$0xff]  ;;  %vm554_vm1 = vsmask.f32 7440 }
  0x10   : > { %v2220_v2 = vld [vmem:[%s2960_s1 + $0xb8] sm:$0xff]  ;;  %488 = vmatpush.bf16.msra.mxu1 %v2212_v1  ;;  %v2219_v6 = vld [vmem:[%s2960_s1 + $0xb0] sm:$0xff]  ;;  %v2218_v10 = vld [vmem:[%s2960_s1 + $0xa8] sm:$0xff]  ;;  %s1747_s21 = sshll.u32 %s2976_s13, 5 }
  0x11   : > { %v2228_v3 = vld [vmem:[%s2960_s1 + $0xf8] sm:$0xff]  ;;  %941 = vmatpush.bf16.msra.mxu2 %v2220_v2  ;;  %v2227_v7 = vld [vmem:[%s2960_s1 + $0xf0] sm:$0xff]  ;;  %s184_s23 = scalar_lea.vmem %s2959_s0, %s2308_s8  ;;  %v2226_v11 = vld [vmem:[%s2960_s1 + $0xe8] sm:$0xff] }
  0x12   : > { %990 = vmatpush.bf16.msra.mxu3 %v2228_v3  ;;  %s2485_s28 = scalar_lea.vmem %s184_s23, %s2178_s9  ;;  %v2201_v12 = vld [vmem:[%s2960_s1 + $0x20] sm:$0xff]  ;;  %v2200_v23 = vld [vmem:[%s2960_s1 + $0x18] sm:$0xff]  ;;  %v2199_v34 = vld [vmem:[%s2960_s1 + $0x10] sm:$0xff] }
  0x13   : > { %440 = vmatpush.bf16.msra.mxu0 %v2203_v4  ;;  %v2209_v13 = vld [vmem:[%s2960_s1 + $0x60] sm:$0xff]  ;;  %v201_v17 = vld [vmem:[%s2485_s28 + $0x8] sm:$0xff]  ;;  %v218_v18 = vld [vmem:[%s2485_s28 + $0x10] sm:$0x11] }
  0x14   : > { %489 = vmatpush.bf16.msra.mxu1 %v2211_v5  ;;  %v2217_v14 = vld [vmem:[%s2960_s1 + $0xa0] sm:$0xff]  ;;  %v566_v21 = vshll.u32 %v201_v17, 16  ;;  %v570_v22 = vshrl.u32 %v201_v17, 16  ;;  %v2208_v24 = vld [vmem:[%s2960_s1 + $0x58] sm:$0xff]  ;;  %v576_v25 = vshll.u32 %v218_v18, 16  ;;  %v2207_v35 = vld [vmem:[%s2960_s1 + $0x50] sm:$0xff] }
  0x15   : > { %942 = vmatpush.bf16.msra.mxu2 %v2219_v6  ;;  %v2225_v15 = vld [vmem:[%s2960_s1 + $0xe0] sm:$0xff]  ;;  %v2216_v26 = vld [vmem:[%s2960_s1 + $0x98] sm:$0xff]  ;;  %v2215_v36 = vld [vmem:[%s2960_s1 + $0x90] sm:$0xff] }
  0x16   : > { %991 = vmatpush.bf16.msra.mxu3 %v2227_v7  ;;  %v200_v16 = vld [vmem:[%s2485_s28] sm:$0xff]  ;;  %v2224_v27 = vld [vmem:[%s2960_s1 + $0xd8] sm:$0xff]  ;;  %v568_v30 = vrot.slane %v566_v21, 5  ;;  %v572_v31 = vrot.slane %v570_v22, 4  ;;  %v2223_v37 = vld [vmem:[%s2960_s1 + $0xd0] sm:$0xff]  ;;  %v578_v40 = vrot.slane %v576_v25, 5 }
  0x17   : > { %441 = vmatpush.bf16.msra.mxu0 %v2202_v8  ;;  %v557_v19 = vshrl.u32 %v200_v16, 16  ;;  %v560_v20 = vshll.u32 %v200_v16, 16  ;;  %v202_v41 = vld [vmem:[%s2485_s28 + $0x18] sm:$0xff]  ;;  %vm2529_vm2 = vmor %vm553_vm0, %vm554_vm1  ;;  %v203_v43 = vld [vmem:[%s2485_s28 + $0x20] sm:$0xff] }
  0x18   : > { %490 = vmatpush.bf16.msra.mxu1 %v2210_v9  ;;  %v573_v33 = vor.u32 %v572_v31, %v568_v30  ;;  %v2198_v44 = vld [vmem:[%s2960_s1 + $0x8] sm:$0xff]  ;;  %v581_v46 = vshrl.u32 %v202_v41, 16  ;;  %v584_v47 = vshll.u32 %v202_v41, 16  ;;  %v590_v52 = vshll.u32 %v203_v43, 16  ;;  %v2197_v54 = vld [vmem:[%s2960_s1] sm:$0xff]  ;;  %v2252_v6 = vld [vmem:[%s2960_s1 + $0x1b8] sm:$0xff] }
  0x19   : > { %943 = vmatpush.bf16.msra.mxu2 %v2218_v10  ;;  %v559_v28 = vrot.slane %v557_v19, 4  ;;  %v562_v29 = vrot.slane %v560_v20, 5  ;;  %v2206_v45 = vld [vmem:[%s2960_s1 + $0x48] sm:$0xff]  ;;  %v594_v53 = vshrl.u32 %v203_v43, 16  ;;  %v2205_v55 = vld [vmem:[%s2960_s1 + $0x40] sm:$0xff]  ;;  %v2260_v7 = vld [vmem:[%s2960_s1 + $0x1f8] sm:$0xff] }
  0x1a   : > { %992 = vmatpush.bf16.msra.mxu3 %v2226_v11  ;;  %v574_v39 = vrot.slane %v573_v33, 4  ;;  %v2214_v48 = vld [vmem:[%s2960_s1 + $0x88] sm:$0xff]  ;;  %v1754_v56 = vld [vmem:[%s2485_s28] sm:$0xf]  ;;  %v2179_v58 = vld [vmem:[%s2485_s28 + $0x4] sm:$0xf] }
  0x1b   : > { %442 = vmatpush.bf16.msra.mxu0 %v2201_v12  ;;  %v563_v32 = vor.u32 %v562_v29, %v559_v28  ;;  %v2222_v49 = vld [vmem:[%s2960_s1 + $0xc8] sm:$0xff]  ;;  %v2213_v0 = vld [vmem:[%s2960_s1 + $0x80] sm:$0xff]  ;;  %v583_v2 = vrot.slane %v581_v46, 4  ;;  %v586_v3 = vrot.slane %v584_v47, 5  ;;  %v592_v4 = vrot.slane %v590_v52, 5  ;;  %v2251_v18 = vld [vmem:[%s2960_s1 + $0x1b0] sm:$0xff] }
  0x1c   : > { %491 = vmatpush.bf16.msra.mxu1 %v2209_v13  ;;  %v579_v51 = vsel %vm2529_vm2, %v574_v39, %v578_v40  ;;  %v2180_v57 = vld [vmem:[%s2485_s28 + $0x4] sm:$0xf0]  ;;  %v1756_v59 = vld [vmem:[%s2485_s28 + $0x8] sm:$0xf0]  ;;  %v2221_v1 = vld [vmem:[%s2960_s1 + $0xc0] sm:$0xff]  ;;  %v596_v5 = vrot.slane %v594_v53, 4 }
  0x1d   : > { %944 = vmatpush.bf16.msra.mxu2 %v2217_v14  ;;  %v564_v38 = vrot.slane %v563_v32, 4  ;;  %v783_v61 = vunpack.c.l.b16 %v579_v51  ;;  %v784_v63 = vunpack.c.h.b16 %v579_v51  ;;  %v219_v8 = vld [vmem:[%s2485_s28 + $0x28] sm:$0x11]  ;;  %v1755_v9 = vor.u32 %v2180_v57, %v1754_v56  ;;  %v2236_v13 = vld [vmem:[%s2960_s1 + $0x138] sm:$0xff]  ;;  %v2259_v19 = vld [vmem:[%s2960_s1 + $0x1f0] sm:$0xff] }
  0x1e   : > { %993 = vmatpush.bf16.msra.mxu3 %v2225_v15  ;;  %v1759_v10 = vor.u32 %v2179_v58, %v1756_v59  ;;  %v2244_v14 = vld [vmem:[%s2960_s1 + $0x178] sm:$0xff]  ;;  %v587_v15 = vor.u32 %v586_v3, %v583_v2  ;;  %v597_v16 = vor.u32 %v596_v5, %v592_v4  ;;  %v600_v17 = vshll.u32 %v219_v8, 16  ;;  %v204_v20 = vld [vmem:[%s2485_s28 + $0x30] sm:$0xff]  ;;  %v2258_v28 = vld [vmem:[%s2960_s1 + $0x1e8] sm:$0xff] }
  0x1f   : > { %443 = vmatpush.bf16.msra.mxu0 %v2200_v23  ;;  %v569_v50 = vsel %vm2529_vm2, %v564_v38, %v568_v30  ;;  %v205_v21 = vld [vmem:[%s2485_s28 + $0x38] sm:$0xff]  ;;  %v2235_v25 = vld [vmem:[%s2960_s1 + $0x130] sm:$0xff]  ;;  %v605_v29 = vshrl.u32 %v204_v20, 16  ;;  %v608_v30 = vshll.u32 %v204_v20, 16  ;;  %v2182_v38 = vld [vmem:[%s2485_s28 + $0x1c] sm:$0xf0] }
  0x20   : > { %492 = vmatpush.bf16.msra.mxu1 %v2208_v24  ;;  %v781_v60 = vunpack.c.l.b16 %v569_v50  ;;  %v782_v62 = vunpack.c.h.b16 %v569_v50  ;;  %v588_v22 = vrot.slane %v587_v15, 4  ;;  %v598_v23 = vrot.slane %v597_v16, 4  ;;  %v220_v50 = vld [vmem:[%s2485_s28 + $0x40] sm:$0x11]  ;;  %v1772_v16 = vld [vmem:[%s2485_s28 + $0x38] sm:$0xf0] }
  0x21   : > { %945 = vmatpush.bf16.msra.mxu2 %v2216_v26  ;;  %v602_v24 = vrot.slane %v600_v17, 5  ;;  %v2243_v26 = vld [vmem:[%s2960_s1 + $0x170] sm:$0xff]  ;;  %v614_v31 = vshll.u32 %v205_v21, 16  ;;  %v618_v32 = vshrl.u32 %v205_v21, 16  ;;  %v607_v39 = vrot.slane %v605_v29, 4  ;;  %v2241_v2 = vld [vmem:[%s2960_s1 + $0x160] sm:$0xff] }
  0x22   : > { %994 = vmatpush.bf16.msra.mxu3 %v2224_v27  ;;  %v813_v11 = vpack.c.b16 %v783_v61, %v781_v60  ;;  %v814_v12 = vpack.c.b16 %v784_v63, %v782_v62  ;;  %v2250_v27 = vld [vmem:[%s2960_s1 + $0x1a8] sm:$0xff]  ;;  %v593_v33 = vsel %vm2529_vm2, %v588_v22, %v592_v4  ;;  %v610_v40 = vrot.slane %v608_v30, 5  ;;  %v2249_v61 = vld [vmem:[%s2960_s1 + $0x1a0] sm:$0xff]  ;;  %v221_v21 = vld [vmem:[%s2485_s28 + $0x58] sm:$0x11] }
  0x23   : > { %444 = vmatpush.bf16.msra.mxu0 %v2199_v34  ;;  %v603_v34 = vsel %vm2529_vm2, %v598_v23, %v602_v24  ;;  %v616_v41 = vrot.slane %v614_v31, 5  ;;  %v620_v43 = vrot.slane %v618_v32, 4  ;;  %v785_v46 = vunpack.c.l.b16 %v593_v33  ;;  %v2257_v62 = vld [vmem:[%s2960_s1 + $0x1e0] sm:$0xff]  ;;  %v2248_v32 = vld [vmem:[%s2960_s1 + $0x198] sm:$0xff] }
  0x24   : > { %493 = vmatpush.bf16.msra.mxu1 %v2207_v35  ;;  %v2234_v35 = vld [vmem:[%s2960_s1 + $0x128] sm:$0xff]  ;;  %v787_v47 = vunpack.c.l.b16 %v603_v34  ;;  %v611_v53 = vor.u32 %v610_v40, %v607_v39  ;;  %v2233_v63 = vld [vmem:[%s2960_s1 + $0x120] sm:$0xff] }
  0x25   : > { %946 = vmatpush.bf16.msra.mxu2 %v2215_v36  ;;  %v2242_v36 = vld [vmem:[%s2960_s1 + $0x168] sm:$0xff] }
  0x26   : > { %995 = vmatpush.bf16.msra.mxu3 %v2223_v37  ;;  %v1762_v37 = vld [vmem:[%s2485_s28 + $0x18] sm:$0xf]  ;;  %v2618_v56 = vpack.c.b16 %v787_v47, %v785_v46  ;;  %v612_v58 = vrot.slane %v611_v53, 4  ;;  %v2186_v46 = vld [vmem:[%s2485_s28 + $0x4c] sm:$0xf0] }
  0x27   : > { %445 = vmatpush.bf16.msra.mxu0 %v2198_v44  ;;  %v2181_v44 = vld [vmem:[%s2485_s28 + $0x1c] sm:$0xf]  ;;  %v2614_v51 = vor.u32 %v2182_v38, %v1762_v37  ;;  %v209_v37 = vld [vmem:[%s2485_s28 + $0x68] sm:$0xff] }
  0x28   : > { %494 = vmatpush.bf16.msra.mxu1 %v2206_v45  ;;  %v1764_v45 = vld [vmem:[%s2485_s28 + $0x20] sm:$0xf0]  ;;  %v617_v3 = vsel %vm2529_vm2, %v612_v58, %v616_v41  ;;  %v2185_v47 = vld [vmem:[%s2485_s28 + $0x4c] sm:$0xf] }
  0x29   : > { %947 = vmatpush.bf16.msra.mxu2 %v2214_v48  ;;  %v786_v48 = vunpack.c.h.b16 %v593_v33  ;;  %v2616_v52 = vor.u32 %v2181_v44, %v1764_v45  ;;  %v2256_v33 = vld [vmem:[%s2960_s1 + $0x1d8] sm:$0xff]  ;;  %v666_v44 = vshrl.u32 %v209_v37, 16  ;;  %v1778_v45 = vld [vmem:[%s2485_s28 + $0x48] sm:$0xf] }
  0x2a   : > { %996 = vmatpush.bf16.msra.mxu3 %v2222_v49  ;;  %v788_v49 = vunpack.c.h.b16 %v603_v34  ;;  %v2232_v34 = vld [vmem:[%s2960_s1 + $0x118] sm:$0xff] }
  0x2b   : > { %446 = vmatpush.bf16.msra.mxu0 %v2197_v54  ;;  %v621_v54 = vor.u32 %v620_v43, %v616_v41  ;;  %v662_v43 = vshll.u32 %v209_v37, 16 }
  0x2c   : > { %495 = vmatpush.bf16.msra.mxu1 %v2205_v55  ;;  %v624_v55 = vshll.u32 %v220_v50, 16  ;;  %v2620_v57 = vpack.c.b16 %v788_v49, %v786_v48  ;;  %v1780_v48 = vld [vmem:[%s2485_s28 + $0x50] sm:$0xf0] }
  0x2d   : > { %948 = vmatpush.bf16.msra.mxu2 %v2213_v0  ;;  %v622_v59 = vrot.slane %v621_v54, 4  ;;  %v206_v0 = vld [vmem:[%s2485_s28 + $0x48] sm:$0xff] }
  0x2e   : > { %997 = vmatpush.bf16.msra.mxu3 %v2221_v1  ;;  %447 = vmatmul.bf16.vlgmr.msra.gmra.mxu0 %v1755_v9  ;;  %v626_v60 = vrot.slane %v624_v55, 5  ;;  %v207_v1 = vld [vmem:[%s2485_s28 + $0x50] sm:$0xff]  ;;  %v629_v5 = vshrl.u32 %v206_v0, 16 }
  0x2f   : > { %496 = vmatmul.bf16.vlgmr.msra.gmra.mxu1 %v1759_v10  ;;  %1194 = vmatpush.bf16.msrb.mxu0 %v2236_v13  ;;  %v642_v8 = vshrl.u32 %v207_v1, 16  ;;  %v1770_v9 = vld [vmem:[%s2485_s28 + $0x30] sm:$0xf]  ;;  %v2184_v10 = vld [vmem:[%s2485_s28 + $0x34] sm:$0xf0] }
  0x30   : > { %949 = vmatmul.bf16.vlgmr.msra.gmra.mxu2 %v813_v11  ;;  %1243 = vmatpush.bf16.msrb.mxu1 %v2244_v14  ;;  %v627_v4 = vsel %vm2529_vm2, %v622_v59, %v626_v60  ;;  %v2183_v11 = vld [vmem:[%s2485_s28 + $0x34] sm:$0xf]  ;;  %v790_v14 = vunpack.c.h.b16 %v617_v3  ;;  %v631_v17 = vrot.slane %v629_v5, 4  ;;  %v2649_v22 = vor.u32 %v2184_v10, %v1770_v9  ;;  %v210_v5 = vld [vmem:[%s2485_s28 + $0x78] sm:$0xff] }
  0x31   : > { %1469 = vmatpush.bf16.msrb.mxu2 %v2252_v6  ;;  %998 = vmatmul.bf16.vlgmr.msra.gmra.mxu3 %v814_v12  ;;  %v632_v6 = vshll.u32 %v206_v0, 16  ;;  %v789_v12 = vunpack.c.l.b16 %v617_v3  ;;  %v791_v13 = vunpack.c.l.b16 %v627_v4  ;;  %v792_v15 = vunpack.c.h.b16 %v627_v4  ;;  %v2231_v9 = vld [vmem:[%s2960_s1 + $0x110] sm:$0xff] }
  0x32   : > { %1518 = vmatpush.bf16.msrb.mxu3 %v2260_v7  ;;  %v638_v7 = vshll.u32 %v207_v1, 16  ;;  %v644_v20 = vrot.slane %v642_v8, 4  ;;  %v2651_v23 = vor.u32 %v2183_v11, %v1772_v16  ;;  %v664_v59 = vrot.slane %v662_v43, 5  ;;  %v2255_v8 = vld [vmem:[%s2960_s1 + $0x1d0] sm:$0xff] }
  0x33   : > { %1195 = vmatpush.bf16.msrb.mxu0 %v2235_v25  ;;  %v2653_v24 = vpack.c.b16 %v791_v13, %v789_v12  ;;  %v2655_v25 = vpack.c.b16 %v792_v15, %v790_v14  ;;  %v668_v60 = vrot.slane %v666_v44, 4  ;;  %v2239_v13 = vld [vmem:[%s2960_s1 + $0x150] sm:$0xff]  ;;  %v677_v14 = vshrl.u32 %v210_v5, 16 }
  0x34   : > { %1244 = vmatpush.bf16.msrb.mxu1 %v2243_v26  ;;  %v680_v15 = vshll.u32 %v210_v5, 16  ;;  %v2190_v5 = vld [vmem:[%s2485_s28 + $0x7c] sm:$0xf0] }
  0x35   : > { %1470 = vmatpush.bf16.msrb.mxu2 %v2251_v18  ;;  %v634_v18 = vrot.slane %v632_v6, 5  ;;  %v669_v3 = vor.u32 %v668_v60, %v664_v59  ;;  %v211_v6 = vld [vmem:[%s2485_s28 + $0x80] sm:$0xff] }
  0x36   : > { %1519 = vmatpush.bf16.msrb.mxu3 %v2259_v19  ;;  %v640_v19 = vrot.slane %v638_v7, 5  ;;  %v2247_v7 = vld [vmem:[%s2960_s1 + $0x190] sm:$0xff]  ;;  %v686_v16 = vshll.u32 %v211_v6, 16 }
  0x37   : > { %1196 = vmatpush.bf16.msrb.mxu0 %v2234_v35  ;;  %v635_v26 = vor.u32 %v634_v18, %v631_v17  ;;  %v2240_v35 = vld [vmem:[%s2960_s1 + $0x158] sm:$0xff]  ;;  %v670_v11 = vrot.slane %v669_v3, 4  ;;  %v690_v17 = vshrl.u32 %v211_v6, 16 }
  0x38   : > { %1245 = vmatpush.bf16.msrb.mxu1 %v2242_v36  ;;  %v208_v36 = vld [vmem:[%s2485_s28 + $0x60] sm:$0xff]  ;;  %v2189_v6 = vld [vmem:[%s2485_s28 + $0x7c] sm:$0xf] }
  0x39   : > { %1471 = vmatpush.bf16.msrb.mxu2 %v2250_v27  ;;  %v645_v27 = vor.u32 %v644_v20, %v640_v19  ;;  %v636_v29 = vrot.slane %v635_v26, 4  ;;  %v653_v40 = vshrl.u32 %v208_v36, 16  ;;  %v656_v41 = vshll.u32 %v208_v36, 16  ;;  %v1786_v20 = vld [vmem:[%s2485_s28 + $0x60] sm:$0xf] }
  0x3a   : > { %1520 = vmatpush.bf16.msrb.mxu3 %v2258_v28  ;;  %v648_v28 = vshll.u32 %v221_v21, 16  ;;  %v2188_v21 = vld [vmem:[%s2485_s28 + $0x64] sm:$0xf0]  ;;  %v679_v26 = vrot.slane %v677_v14, 4 }
  0x3b   : > { %1197 = vmatpush.bf16.msrb.mxu0 %v2233_v63  ;;  %v646_v30 = vrot.slane %v645_v27, 4  ;;  %v641_v38 = vsel %vm2529_vm2, %v636_v29, %v640_v19  ;;  %v655_v55 = vrot.slane %v653_v40, 4  ;;  %v658_v58 = vrot.slane %v656_v41, 5  ;;  %v223_v36 = vld [vmem:[%s2485_s28 + $0x88] sm:$0x11] }
  0x3c   : > { %1246 = vmatpush.bf16.msrb.mxu1 %v2241_v2  ;;  %v650_v31 = vrot.slane %v648_v28, 5  ;;  %v793_v49 = vunpack.c.l.b16 %v641_v38  ;;  %v794_v53 = vunpack.c.h.b16 %v641_v38  ;;  %v2686_v63 = vor.u32 %v2185_v47, %v1780_v48  ;;  %v2246_v48 = vld [vmem:[%s2960_s1 + $0x188] sm:$0xff] }
  0x3d   : > { %1472 = vmatpush.bf16.msrb.mxu2 %v2249_v61  ;;  %v222_v61 = vld [vmem:[%s2485_s28 + $0x70] sm:$0x11]  ;;  %v659_v2 = vor.u32 %v658_v58, %v655_v55  ;;  %v682_v27 = vrot.slane %v680_v15, 5  ;;  %v688_v28 = vrot.slane %v686_v16, 5  ;;  %v692_v29 = vrot.slane %v690_v17, 4  ;;  %v2238_v55 = vld [vmem:[%s2960_s1 + $0x148] sm:$0xff] }
  0x3e   : > { %452 = vmatmul.bf16.gmra.mxu0 %v2614_v51  ;;  %1521 = vmatpush.bf16.msrb.mxu3 %v2257_v62  ;;  %v651_v39 = vsel %vm2529_vm2, %v646_v30, %v650_v31  ;;  %v2684_v62 = vor.u32 %v2186_v46, %v1778_v45  ;;  %v672_v4 = vshll.u32 %v222_v61, 16  ;;  %v2187_v30 = vld [vmem:[%s2485_s28 + $0x64] sm:$0xf]  ;;  %v1788_v31 = vld [vmem:[%s2485_s28 + $0x68] sm:$0xf0]  ;;  %v2719_v37 = vor.u32 %v2188_v21, %v1786_v20 }
  0x3f   : > { %501 = vmatmul.bf16.gmra.mxu1 %v2616_v52  ;;  %1198 = vmatpush.bf16.msrb.mxu0 %v2232_v34  ;;  %v795_v50 = vunpack.c.l.b16 %v651_v39  ;;  %v796_v54 = vunpack.c.h.b16 %v651_v39  ;;  %v660_v10 = vrot.slane %v659_v2, 4  ;;  %v2721_v38 = vor.u32 %v2187_v30, %v1788_v31  ;;  %v224_v16 = vld [vmem:[%s2485_s28 + $0xa0] sm:$0x11] }
  0x40   : > { %954 = vmatmul.bf16.gmra.mxu2 %v2618_v56  ;;  %1247 = vmatpush.bf16.msrb.mxu1 %v2240_v35  ;;  %v674_v12 = vrot.slane %v672_v4, 5  ;;  %v683_v39 = vor.u32 %v682_v27, %v679_v26  ;;  %v693_v40 = vor.u32 %v692_v29, %v688_v28  ;;  %v696_v41 = vshll.u32 %v223_v36, 16  ;;  %v1794_v4 = vld [vmem:[%s2485_s28 + $0x78] sm:$0xf]  ;;  %v2245_v31 = vld [vmem:[%s2960_s1 + $0x180] sm:$0xff]  ;;  %v215_v36 = vld [vmem:[%s2485_s28 + $0xb0] sm:$0xff] }
  0x41   : > { %1003 = vmatmul.bf16.gmra.mxu3 %v2620_v57  ;;  %1473 = vmatpush.bf16.msrb.mxu2 %v2248_v32  ;;  %v2688_v0 = vpack.c.b16 %v795_v50, %v793_v49  ;;  %v2690_v1 = vpack.c.b16 %v796_v54, %v794_v53  ;;  %v665_v18 = vsel %vm2529_vm2, %v660_v10, %v664_v59  ;;  %v2254_v49 = vld [vmem:[%s2960_s1 + $0x1c8] sm:$0xff]  ;;  %v212_v53 = vld [vmem:[%s2485_s28 + $0x90] sm:$0xff]  ;;  %v213_v54 = vld [vmem:[%s2485_s28 + $0x98] sm:$0xff]  ;;  %v720_v27 = vshll.u32 %v224_v16, 16 }
  0x42   : > { %1522 = vmatpush.bf16.msrb.mxu3 %v2256_v33  ;;  %v675_v19 = vsel %vm2529_vm2, %v670_v11, %v674_v12  ;;  %v797_v32 = vunpack.c.l.b16 %v665_v18  ;;  %v798_v34 = vunpack.c.h.b16 %v665_v18  ;;  %v684_v45 = vrot.slane %v683_v39, 4  ;;  %v2230_v50 = vld [vmem:[%s2960_s1 + $0x108] sm:$0xff]  ;;  %v1796_v11 = vld [vmem:[%s2485_s28 + $0x80] sm:$0xf0] }
  0x43   : > { %1199 = vmatpush.bf16.msrb.mxu0 %v2231_v9  ;;  %v799_v33 = vunpack.c.l.b16 %v675_v19  ;;  %v800_v35 = vunpack.c.h.b16 %v675_v19  ;;  %v694_v46 = vrot.slane %v693_v40, 4  ;;  %v698_v47 = vrot.slane %v696_v41, 5 }
  0x44   : > { %1248 = vmatpush.bf16.msrb.mxu1 %v2239_v13  ;;  %v689_v58 = vsel %vm2529_vm2, %v684_v45, %v688_v28  ;;  %v701_v60 = vshrl.u32 %v212_v53, 16  ;;  %v704_v61 = vshll.u32 %v212_v53, 16  ;;  %v710_v2 = vshll.u32 %v213_v54, 16  ;;  %v1804_v53 = vld [vmem:[%s2485_s28 + $0x98] sm:$0xf0] }
  0x45   : > { %1474 = vmatpush.bf16.msrb.mxu2 %v2247_v7  ;;  %v2723_v43 = vpack.c.b16 %v799_v33, %v797_v32  ;;  %v2725_v44 = vpack.c.b16 %v800_v35, %v798_v34  ;;  %v699_v59 = vsel %vm2529_vm2, %v694_v46, %v698_v47  ;;  %v714_v3 = vshrl.u32 %v213_v54, 16  ;;  %v2253_v32 = vld [vmem:[%s2960_s1 + $0x1c0] sm:$0xff]  ;;  %v214_v35 = vld [vmem:[%s2485_s28 + $0xa8] sm:$0xff] }
  0x46   : > { %1523 = vmatpush.bf16.msrb.mxu3 %v2255_v8  ;;  %v801_v7 = vunpack.c.l.b16 %v689_v58  ;;  %v803_v8 = vunpack.c.l.b16 %v699_v59  ;;  %v802_v9 = vunpack.c.h.b16 %v689_v58  ;;  %v804_v10 = vunpack.c.h.b16 %v699_v59  ;;  %v2229_v33 = vld [vmem:[%s2960_s1 + $0x100] sm:$0xff] }
  0x47   : > { %1200 = vmatpush.bf16.msrb.mxu0 %v2230_v50  ;;  %v703_v12 = vrot.slane %v701_v60, 4  ;;  %v706_v13 = vrot.slane %v704_v61, 5  ;;  %v712_v14 = vrot.slane %v710_v2, 5  ;;  %v716_v15 = vrot.slane %v714_v3, 4  ;;  %v2237_v34 = vld [vmem:[%s2960_s1 + $0x140] sm:$0xff] }
  0x48   : > { %1249 = vmatpush.bf16.msrb.mxu1 %v2238_v55  ;;  %v2754_v17 = vor.u32 %v2190_v5, %v1794_v4  ;;  %v2756_v18 = vor.u32 %v2189_v6, %v1796_v11  ;;  %v2758_v19 = vpack.c.b16 %v803_v8, %v801_v7  ;;  %v2760_v20 = vpack.c.b16 %v804_v10, %v802_v9  ;;  %v2191_v50 = vld [vmem:[%s2485_s28 + $0x94] sm:$0xf]  ;;  %v225_v4 = vld [vmem:[%s2485_s28 + $0xb8] sm:$0x11] }
  0x49   : > { %1475 = vmatpush.bf16.msrb.mxu2 %v2246_v48  ;;  %v707_v21 = vor.u32 %v706_v13, %v703_v12  ;;  %v717_v26 = vor.u32 %v716_v15, %v712_v14  ;;  %v722_v30 = vrot.slane %v720_v27, 5  ;;  %v725_v41 = vshrl.u32 %v214_v35, 16  ;;  %v1802_v48 = vld [vmem:[%s2485_s28 + $0x90] sm:$0xf]  ;;  %v2193_v27 = vld [vmem:[%s2485_s28 + $0xac] sm:$0xf] }
  0x4a   : > { %1524 = vmatpush.bf16.msrb.mxu3 %v2254_v49  ;;  %v728_v45 = vshll.u32 %v214_v35, 16  ;;  %v734_v46 = vshll.u32 %v215_v36, 16  ;;  %v738_v47 = vshrl.u32 %v215_v36, 16  ;;  %v2192_v49 = vld [vmem:[%s2485_s28 + $0x94] sm:$0xf0]  ;;  %v2791_v6 = vor.u32 %v2191_v50, %v1804_v53 }
  0x4b   : > { %v708_v28 = vrot.slane %v707_v21, 4  ;;  %v718_v29 = vrot.slane %v717_v26, 4  ;;  %1201 = vmatpush.bf16.msrb.mxu0 %v2229_v33  ;;  %v727_v60 = vrot.slane %v725_v41, 4  ;;  %v2789_v5 = vor.u32 %v2192_v49, %v1802_v48  ;;  %v1810_v21 = vld [vmem:[%s2485_s28 + $0xa8] sm:$0xf] }
  0x4c   : > { %1250 = vmatpush.bf16.msrb.mxu1 %v2237_v34  ;;  %v730_v61 = vrot.slane %v728_v45, 5  ;;  %v736_v2 = vrot.slane %v734_v46, 5  ;;  %v740_v3 = vrot.slane %v738_v47, 4  ;;  %v744_v11 = vshll.u32 %v225_v4, 16  ;;  %v2194_v26 = vld [vmem:[%s2485_s28 + $0xac] sm:$0xf0] }
  0x4d   : > { %1476 = vmatpush.bf16.msrb.mxu2 %v2245_v31  ;;  %v713_v39 = vsel %vm2529_vm2, %v708_v28, %v712_v14  ;;  %v723_v40 = vsel %vm2529_vm2, %v718_v29, %v722_v30  ;;  %v1812_v28 = vld [vmem:[%s2485_s28 + $0xb0] sm:$0xf0]  ;;  %v2809_v33 = vor.u32 %v2194_v26, %v1810_v21  ;;  %v2824_v45 = vld [vmem:[%s2961_s2] ss:$0 sm:$0xff] }
  0x4e   : > { %457 = vmatmul.bf16.gmra.mxu0 %v2649_v22  ;;  %1525 = vmatpush.bf16.msrb.mxu3 %v2253_v32  ;;  %v805_v54 = vunpack.c.l.b16 %v713_v39  ;;  %v807_v55 = vunpack.c.l.b16 %v723_v40  ;;  %v806_v58 = vunpack.c.h.b16 %v713_v39  ;;  %v808_v59 = vunpack.c.h.b16 %v723_v40 }
  0x4f   : > { %506 = vmatmul.bf16.gmra.mxu1 %v2651_v23  ;;  %v731_v9 = vor.u32 %v730_v61, %v727_v60  ;;  %v741_v10 = vor.u32 %v740_v3, %v736_v2  ;;  %v746_v14 = vrot.slane %v744_v11, 5  ;;  %v2811_v34 = vor.u32 %v2193_v27, %v1812_v28 }
  0x50   : > { %959 = vmatmul.bf16.gmra.mxu2 %v2653_v24  ;;  %v2793_v7 = vpack.c.b16 %v807_v55, %v805_v54  ;;  %v2795_v8 = vpack.c.b16 %v808_v59, %v806_v58 }
  0x51   : > { %1008 = vmatmul.bf16.gmra.mxu3 %v2655_v25  ;;  %v732_v12 = vrot.slane %v731_v9, 4  ;;  %v742_v13 = vrot.slane %v741_v10, 4 }
  0x53   : > { %v737_v15 = vsel %vm2529_vm2, %v732_v12, %v736_v2  ;;  %v747_v16 = vsel %vm2529_vm2, %v742_v13, %v746_v14 }
  0x54   : > { %v809_v29 = vunpack.c.l.b16 %v737_v15  ;;  %v811_v30 = vunpack.c.l.b16 %v747_v16  ;;  %v810_v31 = vunpack.c.h.b16 %v737_v15  ;;  %v812_v32 = vunpack.c.h.b16 %v747_v16 }
  0x56   : > { %v2813_v35 = vpack.c.b16 %v811_v30, %v809_v29  ;;  %v2815_v36 = vpack.c.b16 %v812_v32, %v810_v31 }
  0x5e   : > { %462 = vmatmul.bf16.gmra.mxu0 %v2684_v62 }
  0x5f   : > { %511 = vmatmul.bf16.gmra.mxu1 %v2686_v63 }
  0x60   : > { %964 = vmatmul.bf16.gmra.mxu2 %v2688_v0 }
  0x61   : > { %1013 = vmatmul.bf16.gmra.mxu3 %v2690_v1 }
  0x6e   : > { %467 = vmatmul.bf16.gmra.mxu0 %v2719_v37 }
  0x6f   : > { %516 = vmatmul.bf16.gmra.mxu1 %v2721_v38 }
  0x70   : > { %969 = vmatmul.bf16.gmra.mxu2 %v2723_v43 }
  0x71   : > { %1018 = vmatmul.bf16.gmra.mxu3 %v2725_v44 }
  0x7e   : > { %472 = vmatmul.bf16.gmra.mxu0 %v2754_v17 }
  0x7f   : > { %521 = vmatmul.bf16.gmra.mxu1 %v2756_v18 }
  0x80   : > { %974 = vmatmul.bf16.gmra.mxu2 %v2758_v19 }
  0x81   : > { %1023 = vmatmul.bf16.gmra.mxu3 %v2760_v20 }
  0x8e   : > { %477 = vmatmul.bf16.gmra.mxu0 %v2789_v5 }
  0x8f   : > { %526 = vmatmul.bf16.gmra.mxu1 %v2791_v6 }
  0x90   : > { %979 = vmatmul.bf16.gmra.mxu2 %v2793_v7 }
  0x91   : > { %1028 = vmatmul.bf16.gmra.mxu3 %v2795_v8 }
  0x9e   : > { %482 = vmatmul.bf16.gmra.mxu0 %v2809_v33 }
  0x9f   : > { %531 = vmatmul.bf16.gmra.mxu1 %v2811_v34 }
  0xa0   : > { %984 = vmatmul.bf16.gmra.mxu2 %v2813_v35 }
  0xa1   : > { %1033 = vmatmul.bf16.gmra.mxu3 %v2815_v36 }
  0xab   : > { %v448_v39 = vpop.f32.mrf.mxu0 }
  0xac   : > { %v497_v40 = vpop.f32.mrf.mxu1 }
  0xad   : > { %v498_v41 = vadd.f32 %v497_v40, %v448_v39 }
  0xae   : > { %1202 = vmatmul.bf16.vlgmr.msrb.gmra.mxu0 %v2614_v51 }
  0xaf   : > { %1251 = vmatmul.bf16.vlgmr.msrb.gmra.mxu1 %v2616_v52  ;;  %v537_v46 = vadd.f32 %v2824_v45, %v498_v41 }
  0xb0   : > { %1477 = vmatmul.bf16.vlgmr.msrb.gmra.mxu2 %v2618_v56 }
  0xb1   : > { %1526 = vmatmul.bf16.vlgmr.msrb.gmra.mxu3 %v2620_v57 }
  0xb3   : > { %v950_v47 = vpop.f32.mrf.mxu2  ;;  %v450_v50 = vpop.f32.mrf.mxu0 }
  0xb4   : > { %v999_v48 = vpop.f32.mrf.mxu3  ;;  %v499_v53 = vpop.f32.mrf.mxu1 }
  0xb5   : > { %v1000_v49 = vadd.f32 %v999_v48, %v950_v47  ;;  %v500_v54 = vadd.f32 %v499_v53, %v450_v50 }
  0xb7   : > { %v2831_v55 = vadd.f32 %v1000_v49, %v537_v46  ;;  %v538_v51 = vadd.f32 %v2824_v45, %v500_v54 }
  0xbb   : > { %v952_v58 = vpop.f32.mrf.mxu2  ;;  %v453_v52 = vpop.f32.mrf.mxu0 }
  0xbc   : > { %v1001_v59 = vpop.f32.mrf.mxu3  ;;  %v502_v61 = vpop.f32.mrf.mxu1 }
  0xbd   : > { %v1002_v60 = vadd.f32 %v1001_v59, %v952_v58  ;;  %v503_v56 = vadd.f32 %v502_v61, %v453_v52 }
  0xbe   : > { %1207 = vmatmul.bf16.gmra.mxu0 %v2649_v22 }
  0xbf   : > { %v2834_v2 = vadd.f32 %v1002_v60, %v538_v51  ;;  %1256 = vmatmul.bf16.gmra.mxu1 %v2651_v23  ;;  %v539_v57 = vadd.f32 %v2824_v45, %v503_v56 }
  0xc0   : > { %1482 = vmatmul.bf16.gmra.mxu2 %v2653_v24 }
  0xc1   : > { %1531 = vmatmul.bf16.gmra.mxu3 %v2655_v25 }
  0xc3   : > { %v955_v3 = vpop.f32.mrf.mxu2  ;;  %v455_v10 = vpop.f32.mrf.mxu0 }
  0xc4   : > { %v1004_v4 = vpop.f32.mrf.mxu3  ;;  %v504_v11 = vpop.f32.mrf.mxu1 }
  0xc5   : > { %v1005_v9 = vadd.f32 %v1004_v4, %v955_v3  ;;  %v505_v12 = vadd.f32 %v504_v11, %v455_v10 }
  0xc7   : > { %v2841_v13 = vadd.f32 %v1005_v9, %v539_v57  ;;  %v540_v22 = vadd.f32 %v2824_v45, %v505_v12 }
  0xcb   : > { %v957_v14 = vpop.f32.mrf.mxu2  ;;  %v458_v23 = vpop.f32.mrf.mxu0 }
  0xcc   : > { %v1006_v15 = vpop.f32.mrf.mxu3  ;;  %v507_v21 = vpop.f32.mrf.mxu1 }
  0xcd   : > { %v1007_v16 = vadd.f32 %v1006_v15, %v957_v14  ;;  %v508_v24 = vadd.f32 %v507_v21, %v458_v23  ;;  %v216_v21 = vld [vmem:[%s2485_s28 + $0xc0] sm:$0xff] }
  0xce   : > { %1212 = vmatmul.bf16.gmra.mxu0 %v2684_v62 }
  0xcf   : > { %v2844_v26 = vadd.f32 %v1007_v16, %v540_v22  ;;  %1261 = vmatmul.bf16.gmra.mxu1 %v2686_v63  ;;  %v541_v25 = vadd.f32 %v2824_v45, %v508_v24 }
  0xd0   : > { %1487 = vmatmul.bf16.gmra.mxu2 %v2688_v0 }
  0xd1   : > { %1536 = vmatmul.bf16.gmra.mxu3 %v2690_v1 }
  0xd3   : > { %v960_v27 = vpop.f32.mrf.mxu2  ;;  %v460_v30 = vpop.f32.mrf.mxu0 }
  0xd4   : > { %v1009_v28 = vpop.f32.mrf.mxu3  ;;  %v509_v31 = vpop.f32.mrf.mxu1 }
  0xd5   : > { %v1010_v29 = vadd.f32 %v1009_v28, %v960_v27  ;;  %v510_v32 = vadd.f32 %v509_v31, %v460_v30 }
  0xd7   : > { %v2851_v39 = vadd.f32 %v1010_v29, %v541_v25  ;;  %v542_v62 = vadd.f32 %v2824_v45, %v510_v32  ;;  %v217_v25 = vld [vmem:[%s2485_s28 + $0xc8] sm:$0xff]  ;;  %v1309_v32 = vshrl.u32 %v216_v21, 16 }
  0xdb   : > { %v962_v40 = vpop.f32.mrf.mxu2  ;;  %v463_v63 = vpop.f32.mrf.mxu0 }
  0xdc   : > { %v1011_v41 = vpop.f32.mrf.mxu3  ;;  %v512_v47 = vpop.f32.mrf.mxu1 }
  0xdd   : > { %v1012_v46 = vadd.f32 %v1011_v41, %v962_v40  ;;  %v513_v0 = vadd.f32 %v512_v47, %v463_v63  ;;  %v1312_v41 = vshll.u32 %v216_v21, 16  ;;  %v226_v47 = vld [vmem:[%s2485_s28 + $0xd0] sm:$0x11] }
  0xde   : > { %1217 = vmatmul.bf16.gmra.mxu0 %v2719_v37 }
  0xdf   : > { %v2854_v48 = vadd.f32 %v1012_v46, %v542_v62  ;;  %1266 = vmatmul.bf16.gmra.mxu1 %v2721_v38  ;;  %v543_v1 = vadd.f32 %v2824_v45, %v513_v0  ;;  %v1322_v62 = vshrl.u32 %v217_v25, 16  ;;  %v1314_v46 = vrot.slane %v1312_v41, 5 }
  0xe0   : > { %1492 = vmatmul.bf16.gmra.mxu2 %v2723_v43 }
  0xe1   : > { %1541 = vmatmul.bf16.gmra.mxu3 %v2725_v44  ;;  %v1324_v63 = vrot.slane %v1322_v62, 4 }
  0xe3   : > { %v965_v49 = vpop.f32.mrf.mxu2  ;;  %v465_v54 = vpop.f32.mrf.mxu0 }
  0xe4   : > { %v1014_v50 = vpop.f32.mrf.mxu3  ;;  %v514_v58 = vpop.f32.mrf.mxu1 }
  0xe5   : > { %v1015_v53 = vadd.f32 %v1014_v50, %v965_v49  ;;  %v515_v59 = vadd.f32 %v514_v58, %v465_v54 }
  0xe7   : > { %v2861_v51 = vadd.f32 %v1015_v53, %v543_v1  ;;  %v544_v37 = vadd.f32 %v2824_v45, %v515_v59 }
  0xeb   : > { %v967_v60 = vpop.f32.mrf.mxu2  ;;  %v468_v38 = vpop.f32.mrf.mxu0 }
  0xec   : > { %v1016_v52 = vpop.f32.mrf.mxu3  ;;  %v517_v56 = vpop.f32.mrf.mxu1 }
  0xed   : > { %v1017_v61 = vadd.f32 %v1016_v52, %v967_v60  ;;  %v518_v43 = vadd.f32 %v517_v56, %v468_v38  ;;  %v1328_v52 = vshll.u32 %v226_v47, 16 }
  0xee   : > { %1222 = vmatmul.bf16.gmra.mxu0 %v2754_v17 }
  0xef   : > { %v2864_v57 = vadd.f32 %v1017_v61, %v544_v37  ;;  %1271 = vmatmul.bf16.gmra.mxu1 %v2756_v18  ;;  %v545_v44 = vadd.f32 %v2824_v45, %v518_v43  ;;  %v1330_v56 = vrot.slane %v1328_v52, 5 }
  0xf0   : > { %1497 = vmatmul.bf16.gmra.mxu2 %v2758_v19 }
  0xf1   : > { %1546 = vmatmul.bf16.gmra.mxu3 %v2760_v20 }
  0xf3   : > { %v970_v3 = vpop.f32.mrf.mxu2  ;;  %v470_v10 = vpop.f32.mrf.mxu0 }
  0xf4   : > { %v1019_v4 = vpop.f32.mrf.mxu3  ;;  %v519_v11 = vpop.f32.mrf.mxu1 }
  0xf5   : > { %v1020_v9 = vadd.f32 %v1019_v4, %v970_v3  ;;  %v520_v12 = vadd.f32 %v519_v11, %v470_v10  ;;  %v2010_v11 = vld [vmem:[%s2485_s28 + $0xc0] sm:$0xf] }
  0xf7   : > { %v2871_v14 = vadd.f32 %v1020_v9, %v545_v44  ;;  %v546_v18 = vadd.f32 %v2824_v45, %v520_v12  ;;  %v2196_v12 = vld [vmem:[%s2485_s28 + $0xc4] sm:$0xf0] }
  0xfb   : > { %v972_v15 = vpop.f32.mrf.mxu2  ;;  %v473_v19 = vpop.f32.mrf.mxu0 }
  0xfc   : > { %v1021_v17 = vpop.f32.mrf.mxu3  ;;  %v522_v16 = vpop.f32.mrf.mxu1 }
  0xfd   : > { %v1022_v22 = vadd.f32 %v1021_v17, %v972_v15  ;;  %v523_v20 = vadd.f32 %v522_v16, %v473_v19  ;;  %v2195_v15 = vld [vmem:[%s2485_s28 + $0xc4] sm:$0xf]  ;;  %v2012_v17 = vld [vmem:[%s2485_s28 + $0xc8] sm:$0xf0]  ;;  %s1745_s28 = sshll.u32 %s2372_s12, 3 }
  0xfe   : > { %1227 = vmatmul.bf16.gmra.mxu0 %v2789_v5  ;;  %v1318_v5 = vshll.u32 %v217_v25, 16  ;;  %v2015_v25 = vor.u32 %v2195_v15, %v2012_v17  ;;  %p188_p6 = scmp.lt.s32.totalorder %s1745_s28, 15 }
  0xff   : > { %v2874_v23 = vadd.f32 %v1022_v22, %v546_v18  ;;  %1276 = vmatmul.bf16.gmra.mxu1 %v2791_v6  ;;  %v547_v24 = vadd.f32 %v2824_v45, %v523_v20 }
 0x100   : > { %1502 = vmatmul.bf16.gmra.mxu2 %v2793_v7  ;;  %v1311_v7 = vrot.slane %v1309_v32, 4  ;;  %s2978_s28 = smov (!%p188_p6, %s1745_s28), 15 }
 0x101   : > { %1551 = vmatmul.bf16.gmra.mxu3 %v2795_v8  ;;  %v1320_v8 = vrot.slane %v1318_v5, 5  ;;  %s1746_s20 = sshll.u32 %s2978_s28, 1 }
 0x102   : > { %v1315_v59 = vor.u32 %v1314_v46, %v1311_v7  ;;  %s192_s12 = sadd.s32 %s1747_s21, %s1746_s20 }
 0x103   : > { %v975_v27 = vpop.f32.mrf.mxu2  ;;  %v475_v30 = vpop.f32.mrf.mxu0  ;;  %v1325_v60 = vor.u32 %v1324_v63, %v1320_v8  ;;  %s1748_s22 = sshll.u32 %s192_s12, 2 }
 0x104   : > { %v1024_v28 = vpop.f32.mrf.mxu3  ;;  %v524_v31 = vpop.f32.mrf.mxu1  ;;  %v1316_v61 = vrot.slane %v1315_v59, 4  ;;  %s2920_s25 = scalar_lea.vmem %s2962_s3, %s1748_s22 }
 0x105   : > { %v1025_v29 = vadd.f32 %v1024_v28, %v975_v27  ;;  %v525_v40 = vadd.f32 %v524_v31, %v475_v30  ;;  %v1326_v38 = vrot.slane %v1325_v60, 4 }
 0x107   : > { %v2883_v6 = vadd.f32 %v1025_v29, %v547_v24  ;;  %v548_v49 = vadd.f32 %v2824_v45, %v525_v40  ;;  %v2011_v24 = vor.u32 %v2196_v12, %v2010_v11 }
 0x10b   : > { %v977_v0 = vpop.f32.mrf.mxu2  ;;  %v478_v53 = vpop.f32.mrf.mxu0 }
 0x10c   : > { %v1026_v1 = vpop.f32.mrf.mxu3  ;;  %v527_v54 = vpop.f32.mrf.mxu1 }
 0x10d   : > { %v1027_v50 = vadd.f32 %v1026_v1, %v977_v0  ;;  %v528_v58 = vadd.f32 %v527_v54, %v478_v53 }
 0x10e   : > { %1232 = vmatmul.bf16.gmra.mxu0 %v2809_v33 }
 0x10f   : > { %v2887_v37 = vadd.f32 %v1027_v50, %v548_v49  ;;  %1281 = vmatmul.bf16.gmra.mxu1 %v2811_v34  ;;  %v549_v43 = vadd.f32 %v2824_v45, %v528_v58  ;;  %v1321_v34 = vsel %vm2529_vm2, %v1316_v61, %v1320_v8 }
 0x110   : > { %1507 = vmatmul.bf16.gmra.mxu2 %v2813_v35  ;;  %v1331_v35 = vsel %vm2529_vm2, %v1326_v38, %v1330_v56  ;;  %v1365_v18 = vunpack.c.l.b16 %v1321_v34  ;;  %v1366_v19 = vunpack.c.h.b16 %v1321_v34 }
 0x111   : > { %1556 = vmatmul.bf16.gmra.mxu3 %v2815_v36  ;;  %v1367_v22 = vunpack.c.l.b16 %v1331_v35  ;;  %v1368_v16 = vunpack.c.h.b16 %v1331_v35 }
 0x113   : > { %v980_v44 = vpop.f32.mrf.mxu2  ;;  %v480_v9 = vpop.f32.mrf.mxu0  ;;  %v1369_v30 = vpack.c.b16 %v1367_v22, %v1365_v18  ;;  %v1370_v31 = vpack.c.b16 %v1368_v16, %v1366_v19 }
 0x114   : > { %v1029_v3 = vpop.f32.mrf.mxu3  ;;  %v529_v33 = vpop.f32.mrf.mxu1 }
 0x115   : > { %v1030_v4 = vadd.f32 %v1029_v3, %v980_v44  ;;  %v530_v10 = vadd.f32 %v529_v33, %v480_v9 }
 0x117   : > { %v2898_v36 = vadd.f32 %v1030_v4, %v549_v43  ;;  %v550_v27 = vadd.f32 %v2824_v45, %v530_v10 }
 0x11b   : > { %v982_v20 = vpop.f32.mrf.mxu2  ;;  %v483_v29 = vpop.f32.mrf.mxu0 }
 0x11c   : > { %v1031_v21 = vpop.f32.mrf.mxu3  ;;  %v532_v42 = vpop.f32.mrf.mxu1 }
 0x11d   : > { %v1032_v28 = vadd.f32 %v1031_v21, %v982_v20  ;;  %v533_v32 = vadd.f32 %v532_v42, %v483_v29 }
 0x11e   : > { %1237 = vmatmul.bf16.gmra.mxu0 %v2011_v24 }
 0x11f   : > { %v2905_v40 = vadd.f32 %v1032_v28, %v550_v27  ;;  %1286 = vmatmul.bf16.gmra.mxu1 %v2015_v25  ;;  %v551_v41 = vadd.f32 %v2824_v45, %v533_v32 }
 0x120   : > { %1512 = vmatmul.bf16.gmra.mxu2 %v1369_v30 }
 0x121   : > { %1561 = vmatmul.bf16.gmra.mxu3 %v1370_v31 }
 0x123   : > { %v985_v5 = vpop.f32.mrf.mxu2  ;;  %v485_v46 = vpop.f32.mrf.mxu0 }
 0x124   : > { %v1034_v62 = vpop.f32.mrf.mxu3  ;;  %v534_v8 = vpop.f32.mrf.mxu1 }
 0x125   : > { %v1035_v7 = vadd.f32 %v1034_v62, %v985_v5  ;;  %v535_v63 = vadd.f32 %v534_v8, %v485_v46 }
 0x127   : > { %v2908_v47 = vadd.f32 %v1035_v7, %v551_v41  ;;  %v552_v49 = vadd.f32 %v2824_v45, %v535_v63 }
 0x12b   : > { %v987_v0 = vpop.f32.mrf.mxu2  ;;  %v1203_v53 = vpop.f32.mrf.mxu0 }
 0x12c   : > { %v1036_v1 = vpop.f32.mrf.mxu3  ;;  %v1252_v54 = vpop.f32.mrf.mxu1 }
 0x12d   : > { %v1037_v50 = vadd.f32 %v1036_v1, %v987_v0  ;;  %v1253_v52 = vadd.f32 %v1252_v54, %v1203_v53 }
 0x12f   : > { %v2911_v58 = vadd.f32 %v1037_v50, %v552_v49  ;;  %v1292_v43 = vadd.f32 %v1253_v52, %v2831_v55 }
 0x133   : > { %v1478_v59 = vpop.f32.mrf.mxu2  ;;  %v1205_v61 = vpop.f32.mrf.mxu0 }
 0x134   : > { %v1527_v60 = vpop.f32.mrf.mxu3  ;;  %v1254_v38 = vpop.f32.mrf.mxu1 }
 0x135   : > { %v1528_v56 = vadd.f32 %v1527_v60, %v1478_v59  ;;  %v1255_v44 = vadd.f32 %v1254_v38, %v1205_v61 }
 0x137   : > { %v1567_v3 = vadd.f32 %v1528_v56, %v1292_v43  ;;  %v1293_v9 = vadd.f32 %v1255_v44, %v2834_v2 }
 0x139   : > { %v1583_v35 = vmul.f32 0.2, %v1567_v3 }
 0x13b   : > { %v1480_v45 = vpop.f32.mrf.mxu2  ;;  %v1208_v10 = vpop.f32.mrf.mxu0  ;;  %v1599_v15 = vmax.f32 %v1567_v3, %v1583_v35 }
 0x13c   : > { %v1529_v4 = vpop.f32.mrf.mxu3  ;;  %v1257_v34 = vpop.f32.mrf.mxu1 }
 0x13d   : > { %v1530_v33 = vadd.f32 %v1529_v4, %v1480_v45  ;;  %v1258_v2 = vadd.f32 %v1257_v34, %v1208_v10 }
 0x13f   : > { %v1568_v11 = vadd.f32 %v1530_v33, %v1293_v9  ;;  %v1294_v21 = vadd.f32 %v1258_v2, %v2841_v13 }
 0x141   : > { %v1584_v12 = vmul.f32 0.2, %v1568_v11 }
 0x143   : > { %v1600_v17 = vmax.f32 %v1568_v11, %v1584_v12  ;;  %v1483_v55 = vpop.f32.mrf.mxu2  ;;  %v1210_v19 = vpop.f32.mrf.mxu0 }
 0x144   : > { %v1532_v18 = vpop.f32.mrf.mxu3  ;;  %v1259_v16 = vpop.f32.mrf.mxu1 }
 0x145   : > { %v2264_v22 = vpack.c.bf16 %v1600_v17, %v1599_v15  ;;  %v1533_v20 = vadd.f32 %v1532_v18, %v1483_v55  ;;  %v1260_v24 = vadd.f32 %v1259_v16, %v1210_v19 }
 0x147   : > { %2265 = vst [vmem:[%s2920_s25] sm:$0xff] %v2264_v22   ;;  %v1569_v25 = vadd.f32 %v1533_v20, %v1294_v21  ;;  %v1295_v29 = vadd.f32 %v1260_v24, %v2844_v26 }
 0x149   : > { %v1585_v32 = vmul.f32 0.2, %v1569_v25 }
 0x14b   : > { %v1485_v27 = vpop.f32.mrf.mxu2  ;;  %v1213_v30 = vpop.f32.mrf.mxu0  ;;  %v1601_v62 = vmax.f32 %v1569_v25, %v1585_v32 }
 0x14c   : > { %v1534_v28 = vpop.f32.mrf.mxu3  ;;  %v1262_v31 = vpop.f32.mrf.mxu1 }
 0x14d   : > { %v1535_v42 = vadd.f32 %v1534_v28, %v1485_v27  ;;  %v1263_v0 = vadd.f32 %v1262_v31, %v1213_v30 }
 0x14f   : > { %v1570_v41 = vadd.f32 %v1535_v42, %v1295_v29  ;;  %v1296_v50 = vadd.f32 %v1263_v0, %v2851_v39 }
 0x151   : > { %v1586_v5 = vmul.f32 0.2, %v1570_v41 }
 0x153   : > { %v1602_v7 = vmax.f32 %v1570_v41, %v1586_v5  ;;  %v1488_v46 = vpop.f32.mrf.mxu2  ;;  %v1215_v13 = vpop.f32.mrf.mxu0 }
 0x154   : > { %v1537_v8 = vpop.f32.mrf.mxu3  ;;  %v1264_v1 = vpop.f32.mrf.mxu1 }
 0x155   : > { %v2269_v63 = vpack.c.bf16 %v1602_v7, %v1601_v62  ;;  %v1538_v49 = vadd.f32 %v1537_v8, %v1488_v46  ;;  %v1265_v53 = vadd.f32 %v1264_v1, %v1215_v13 }
 0x157   : > { %2301 = vst [vmem:[%s2920_s25 + $0x8] sm:$0xff] %v2269_v63   ;;  %v1571_v26 = vadd.f32 %v1538_v49, %v1296_v50  ;;  %v1297_v60 = vadd.f32 %v1265_v53, %v2854_v48 }
 0x159   : > { %v1587_v56 = vmul.f32 0.2, %v1571_v26 }
 0x15b   : > { %v1490_v54 = vpop.f32.mrf.mxu2  ;;  %v1218_v61 = vpop.f32.mrf.mxu0  ;;  %v1603_v3 = vmax.f32 %v1571_v26, %v1587_v56 }
 0x15c   : > { %v1539_v59 = vpop.f32.mrf.mxu3  ;;  %v1267_v38 = vpop.f32.mrf.mxu1 }
 0x15d   : > { %v1540_v52 = vadd.f32 %v1539_v59, %v1490_v54  ;;  %v1268_v10 = vadd.f32 %v1267_v38, %v1218_v61 }
 0x15f   : > { %v1572_v43 = vadd.f32 %v1540_v52, %v1297_v60  ;;  %v1298_v11 = vadd.f32 %v1268_v10, %v2861_v51 }
 0x161   : > { %v1588_v44 = vmul.f32 0.2, %v1572_v43 }
 0x163   : > { %v1604_v45 = vmax.f32 %v1572_v43, %v1588_v44  ;;  %v1493_v4 = vpop.f32.mrf.mxu2  ;;  %v1220_v39 = vpop.f32.mrf.mxu0 }
 0x164   : > { %v1542_v9 = vpop.f32.mrf.mxu3  ;;  %v1269_v34 = vpop.f32.mrf.mxu1 }
 0x165   : > { %v2274_v33 = vpack.c.bf16 %v1604_v45, %v1603_v3  ;;  %v1543_v35 = vadd.f32 %v1542_v9, %v1493_v4  ;;  %v1270_v12 = vadd.f32 %v1269_v34, %v1220_v39 }
 0x167   : > { %2302 = vst [vmem:[%s2920_s25 + $0x10] sm:$0xff] %v2274_v33   ;;  %v1573_v48 = vadd.f32 %v1543_v35, %v1298_v11  ;;  %v1299_v55 = vadd.f32 %v1270_v12, %v2864_v57 }
 0x169   : > { %v1589_v19 = vmul.f32 0.2, %v1573_v48 }
 0x16b   : > { %v1495_v15 = vpop.f32.mrf.mxu2  ;;  %v1223_v22 = vpop.f32.mrf.mxu0  ;;  %v1605_v21 = vmax.f32 %v1573_v48, %v1589_v19 }
 0x16c   : > { %v1544_v17 = vpop.f32.mrf.mxu3  ;;  %v1272_v2 = vpop.f32.mrf.mxu1 }
 0x16d   : > { %v1545_v18 = vadd.f32 %v1544_v17, %v1495_v15  ;;  %v1273_v29 = vadd.f32 %v1272_v2, %v1223_v22 }
 0x16f   : > { %v1574_v16 = vadd.f32 %v1545_v18, %v1299_v55  ;;  %v1300_v31 = vadd.f32 %v1273_v29, %v2871_v14 }
 0x171   : > { %v1590_v20 = vmul.f32 0.2, %v1574_v16 }
 0x173   : > { %v1606_v24 = vmax.f32 %v1574_v16, %v1590_v20  ;;  %v1498_v25 = vpop.f32.mrf.mxu2  ;;  %v1225_v51 = vpop.f32.mrf.mxu0 }
 0x174   : > { %v1547_v27 = vpop.f32.mrf.mxu3  ;;  %v1274_v42 = vpop.f32.mrf.mxu1 }
 0x175   : > { %v2279_v28 = vpack.c.bf16 %v1606_v24, %v1605_v21  ;;  %v1548_v30 = vadd.f32 %v1547_v27, %v1498_v25  ;;  %v1275_v32 = vadd.f32 %v1274_v42, %v1225_v51 }
 0x177   : > { %2303 = vst [vmem:[%s2920_s25 + $0x18] sm:$0xff] %v2279_v28   ;;  %v1575_v57 = vadd.f32 %v1548_v30, %v1300_v31  ;;  %v1301_v62 = vadd.f32 %v1275_v32, %v2874_v23 }
 0x179   : > { %v1591_v63 = vmul.f32 0.2, %v1575_v57 }
 0x17b   : > { %v1500_v41 = vpop.f32.mrf.mxu2  ;;  %v1228_v46 = vpop.f32.mrf.mxu0  ;;  %v1607_v1 = vmax.f32 %v1575_v57, %v1591_v63 }
 0x17c   : > { %v1549_v5 = vpop.f32.mrf.mxu3  ;;  %v1277_v8 = vpop.f32.mrf.mxu1 }
 0x17d   : > { %v1550_v7 = vadd.f32 %v1549_v5, %v1500_v41  ;;  %v1278_v54 = vadd.f32 %v1277_v8, %v1228_v46 }
 0x17f   : > { %v1576_v0 = vadd.f32 %v1550_v7, %v1301_v62  ;;  %v1302_v52 = vadd.f32 %v1278_v54, %v2883_v6 }
 0x181   : > { %v1592_v13 = vmul.f32 0.2, %v1576_v0 }
 0x183   : > { %v1608_v49 = vmax.f32 %v1576_v0, %v1592_v13  ;;  %v1503_v50 = vpop.f32.mrf.mxu2  ;;  %v1230_v14 = vpop.f32.mrf.mxu0 }
 0x184   : > { %v1552_v53 = vpop.f32.mrf.mxu3  ;;  %v1279_v59 = vpop.f32.mrf.mxu1 }
 0x185   : > { %v2284_v26 = vpack.c.bf16 %v1608_v49, %v1607_v1  ;;  %v1553_v60 = vadd.f32 %v1552_v53, %v1503_v50  ;;  %v1280_v61 = vadd.f32 %v1279_v59, %v1230_v14 }
 0x187   : > { %2304 = vst [vmem:[%s2920_s25 + $0x20] sm:$0xff] %v2284_v26   ;;  %v1577_v23 = vadd.f32 %v1553_v60, %v1302_v52  ;;  %v1303_v43 = vadd.f32 %v1280_v61, %v2887_v37 }
 0x189   : > { %v1593_v4 = vmul.f32 0.2, %v1577_v23 }
 0x18b   : > { %v1505_v38 = vpop.f32.mrf.mxu2  ;;  %v1233_v3 = vpop.f32.mrf.mxu0  ;;  %v1609_v10 = vmax.f32 %v1577_v23, %v1593_v4 }
 0x18c   : > { %v1554_v56 = vpop.f32.mrf.mxu3  ;;  %v1282_v45 = vpop.f32.mrf.mxu1 }
 0x18d   : > { %v1555_v44 = vadd.f32 %v1554_v56, %v1505_v38  ;;  %v1283_v12 = vadd.f32 %v1282_v45, %v1233_v3 }
 0x18f   : > { %v1578_v9 = vadd.f32 %v1555_v44, %v1303_v43  ;;  %v1304_v17 = vadd.f32 %v1283_v12, %v2898_v36 }
 0x191   : > { %v1594_v33 = vmul.f32 0.2, %v1578_v9 }
 0x193   : > { %v1610_v39 = vmax.f32 %v1578_v9, %v1594_v33  ;;  %v1508_v34 = vpop.f32.mrf.mxu2  ;;  %v1235_v6 = vpop.f32.mrf.mxu0 }
 0x194   : > { %v1557_v35 = vpop.f32.mrf.mxu3  ;;  %v1284_v48 = vpop.f32.mrf.mxu1 }
 0x195   : > { %v2289_v11 = vpack.c.bf16 %v1610_v39, %v1609_v10  ;;  %v1558_v15 = vadd.f32 %v1557_v35, %v1508_v34  ;;  %v1285_v55 = vadd.f32 %v1284_v48, %v1235_v6 }
 0x197   : > { %2305 = vst [vmem:[%s2920_s25 + $0x28] sm:$0xff] %v2289_v11   ;;  %v1579_v37 = vadd.f32 %v1558_v15, %v1304_v17  ;;  %v1305_v2 = vadd.f32 %v1285_v55, %v2905_v40 }
 0x199   : > { %v1595_v21 = vmul.f32 0.2, %v1579_v37 }
 0x19b   : > { %v1510_v18 = vpop.f32.mrf.mxu2  ;;  %v1238_v16 = vpop.f32.mrf.mxu0  ;;  %v1611_v27 = vmax.f32 %v1579_v37, %v1595_v21 }
 0x19c   : > { %v1559_v22 = vpop.f32.mrf.mxu3  ;;  %v1287_v20 = vpop.f32.mrf.mxu1 }
 0x19d   : > { %v1560_v19 = vadd.f32 %v1559_v22, %v1510_v18  ;;  %v1288_v30 = vadd.f32 %v1287_v20, %v1238_v16 }
 0x19f   : > { %v1580_v24 = vadd.f32 %v1560_v19, %v1305_v2  ;;  %v1306_v57 = vadd.f32 %v1288_v30, %v2908_v47 }
 0x1a1   : > { %v1596_v25 = vmul.f32 0.2, %v1580_v24 }
 0x1a3   : > { %v1612_v28 = vmax.f32 %v1580_v24, %v1596_v25  ;;  %v1513_v29 = vpop.f32.mrf.mxu2  ;;  %v1240_v36 = vpop.f32.mrf.mxu0 }
 0x1a4   : > { %v1562_v51 = vpop.f32.mrf.mxu3  ;;  %v1289_v31 = vpop.f32.mrf.mxu1 }
 0x1a5   : > { %v2294_v42 = vpack.c.bf16 %v1612_v28, %v1611_v27  ;;  %v1563_v32 = vadd.f32 %v1562_v51, %v1513_v29  ;;  %v1290_v40 = vadd.f32 %v1289_v31, %v1240_v36 }
 0x1a7   : > { %2306 = vst [vmem:[%s2920_s25 + $0x30] sm:$0xff] %v2294_v42   ;;  %v1581_v41 = vadd.f32 %v1563_v32, %v1306_v57  ;;  %v1307_v7 = vadd.f32 %v1290_v40, %v2911_v58 }
 0x1a9   : > { %v1597_v8 = vmul.f32 0.2, %v1581_v41 }
 0x1ab   : > { %v1515_v5 = vpop.f32.mrf.mxu2  ;;  %v1613_v13 = vmax.f32 %v1581_v41, %v1597_v8 }
 0x1ac   : > { %v1564_v62 = vpop.f32.mrf.mxu3 }
 0x1ad   : > { %v1565_v46 = vadd.f32 %v1564_v62, %v1515_v5 }
 0x1af   : > { %v1582_v63 = vadd.f32 %v1565_v46, %v1307_v7 }
 0x1b1   : > { %v1598_v0 = vmul.f32 0.2, %v1582_v63 }
 0x1b3   : > { %v1614_v1 = vmax.f32 %v1582_v63, %v1598_v0 }
 0x1b5   : > { %v2299_v49 = vpack.c.bf16 %v1614_v1, %v1613_v13 }
 0x1b7   : > { %2307 = vst [vmem:[%s2920_s25 + $0x38] sm:$0xff] %v2299_v49  }
 0x1b8 PF: > { %s13_s16 = sadd.s32 1, %s2388_s16   ;;  %s2965_s12 = smov %s2380_s14 }
 0x1b9   : > { %p10_p7 = scmp.ge.s32.totalorder %s13_s16, 6   ;;  %s2966_s13 = smov %s2384_s15 }
 0x1ba   : > { %s2967_s14 = smov %s2970_s17  ;;  %s2968_s15 = smov %s2974_s18 }
 0x1bb   :  { %12 = sbr.rel (!%p10_p7) target bundleno = 3 (0x3), region = 66 }

// kernel: feat_map_forward.4
= control target key start
LH: loop header
LB: loop body
LE: loop exit
PB: predicated region body
PF: predicated region fallthrough
CT: control target
= control target key end

     0   :  { %s4935_s12 = smov 0   ;;  %s4937_s13 = smov 0   ;;  %s7428_s0 = inlined_call_operand.vmem [shape: bf16[2,9,9,512], index: 0, kind: input, shape index: {}]   ;;  %s7429_s1 = inlined_call_operand.vmem [shape: bf16[4,512,256], index: 1, kind: input, shape index: {}]   ;;  %s7430_s2 = inlined_call_operand.vmem [shape: f32[1,256], index: 2, kind: input, shape index: {}]   ;;  %s7431_s3 = inlined_call_operand.vmem [shape: bf16[2,8,8,256], index: 3, kind: output, shape index: {}]  }
   0x1   :  { %s4939_s14 = smov 0  }
   0x2 LB: > { %s25_s15 = sadd.s32 1, %s4909_s13  ;;  %p3387_p0 = scmp.ge.s32.totalorder %s4913_s14, 1  ;;  %s4913_s14 = sphi %s4939_s14, %s13_s14   ;;  %s4909_s13 = sphi %s4937_s13, %s7543_s13   ;;  %s4905_s12 = sphi %s4935_s12, %s7542_s12  }
   0x3   : > { %p27_p1 = scmp.ge.s32.totalorder %s25_s15, 2  ;;  %p151_p2 = scmp.lt.s32.totalorder %s4913_s14, 3 }
   0x5   : > { %s7545_s15 = smov (%p27_p1, %s25_s15), 0  ;;  %p152_p3 = pnand %p3387_p0, %p151_p2 }
   0x7   : > { %155 = sbr.rel (%p152_p3) target bundleno = 697 (0x2b9), region = 32 }
   0xc   : > { %v3449_v0 = vld [vmem:[%s7429_s1 + $0x70] sm:$0xf]  ;;  %v4625_v1 = vld [vmem:[%s7429_s1 + $0x74] sm:$0xf0]  ;;  %v3441_v11 = vld [vmem:[%s7429_s1 + $0x60] sm:$0xf] }
   0xd   : > { %v3513_v2 = vld [vmem:[%s7429_s1 + $0xf0] sm:$0xf]  ;;  %v3450_v3 = vor.u32 %v4625_v1, %v3449_v0  ;;  %v4641_v4 = vld [vmem:[%s7429_s1 + $0xf4] sm:$0xf0]  ;;  %v4623_v13 = vld [vmem:[%s7429_s1 + $0x64] sm:$0xf0] }
   0xe   : > { %v3577_v5 = vld [vmem:[%s7429_s1 + $0x170] sm:$0xf]  ;;  %v4657_v6 = vld [vmem:[%s7429_s1 + $0x174] sm:$0xf0]  ;;  %v3514_v7 = vor.u32 %v4641_v4, %v3513_v2  ;;  %v3505_v14 = vld [vmem:[%s7429_s1 + $0xe0] sm:$0xf]  ;;  %v3442_v16 = vor.u32 %v4623_v13, %v3441_v11 }
   0xf   : > { %v3578_v8 = vor.u32 %v4657_v6, %v3577_v5  ;;  %v3641_v9 = vld [vmem:[%s7429_s1 + $0x1f0] sm:$0xf]  ;;  %v4673_v10 = vld [vmem:[%s7429_s1 + $0x1f4] sm:$0xf0]  ;;  %706 = vmatpush.bf16.msra.mxu0 %v3450_v3  ;;  %v4639_v15 = vld [vmem:[%s7429_s1 + $0xe4] sm:$0xf0] }
  0x10   : > { %v3642_v12 = vor.u32 %v4673_v10, %v3641_v9  ;;  %735 = vmatpush.bf16.msra.mxu1 %v3514_v7  ;;  %v3506_v17 = vor.u32 %v4639_v15, %v3505_v14  ;;  %v3569_v18 = vld [vmem:[%s7429_s1 + $0x160] sm:$0xf]  ;;  %v4655_v19 = vld [vmem:[%s7429_s1 + $0x164] sm:$0xf0]  ;;  %v3433_v23 = vld [vmem:[%s7429_s1 + $0x50] sm:$0xf] }
  0x11   : > { %764 = vmatpush.bf16.msra.mxu2 %v3578_v8  ;;  %v3633_v20 = vld [vmem:[%s7429_s1 + $0x1e0] sm:$0xf]  ;;  %v3570_v21 = vor.u32 %v4655_v19, %v3569_v18  ;;  %v4671_v22 = vld [vmem:[%s7429_s1 + $0x1e4] sm:$0xf0]  ;;  %v4621_v24 = vld [vmem:[%s7429_s1 + $0x54] sm:$0xf0] }
  0x12   : > { %793 = vmatpush.bf16.msra.mxu3 %v3642_v12  ;;  %v3634_v25 = vor.u32 %v4671_v22, %v3633_v20  ;;  %v3497_v26 = vld [vmem:[%s7429_s1 + $0xd0] sm:$0xf]  ;;  %v4637_v27 = vld [vmem:[%s7429_s1 + $0xd4] sm:$0xf0]  ;;  %v3434_v29 = vor.u32 %v4621_v24, %v3433_v23  ;;  %v3425_v35 = vld [vmem:[%s7429_s1 + $0x40] sm:$0xf] }
  0x13   : > { %v3561_v28 = vld [vmem:[%s7429_s1 + $0x150] sm:$0xf]  ;;  %707 = vmatpush.bf16.msra.mxu0 %v3442_v16  ;;  %v4653_v30 = vld [vmem:[%s7429_s1 + $0x154] sm:$0xf0]  ;;  %v3498_v33 = vor.u32 %v4637_v27, %v3497_v26  ;;  %v4619_v36 = vld [vmem:[%s7429_s1 + $0x44] sm:$0xf0] }
  0x14   : > { %v3625_v31 = vld [vmem:[%s7429_s1 + $0x1d0] sm:$0xf]  ;;  %v4669_v32 = vld [vmem:[%s7429_s1 + $0x1d4] sm:$0xf0]  ;;  %736 = vmatpush.bf16.msra.mxu1 %v3506_v17  ;;  %v3562_v34 = vor.u32 %v4653_v30, %v3561_v28  ;;  %v3489_v37 = vld [vmem:[%s7429_s1 + $0xc0] sm:$0xf]  ;;  %v3426_v44 = vor.u32 %v4619_v36, %v3425_v35 }
  0x15   : > { %765 = vmatpush.bf16.msra.mxu2 %v3570_v21  ;;  %v3626_v38 = vor.u32 %v4669_v32, %v3625_v31  ;;  %v4635_v39 = vld [vmem:[%s7429_s1 + $0xc4] sm:$0xf0]  ;;  %v3553_v40 = vld [vmem:[%s7429_s1 + $0x140] sm:$0xf]  ;;  %v3417_v47 = vld [vmem:[%s7429_s1 + $0x30] sm:$0xf] }
  0x16   : > { %794 = vmatpush.bf16.msra.mxu3 %v3634_v25  ;;  %v4651_v41 = vld [vmem:[%s7429_s1 + $0x144] sm:$0xf0]  ;;  %v3617_v42 = vld [vmem:[%s7429_s1 + $0x1c0] sm:$0xf]  ;;  %v3490_v45 = vor.u32 %v4635_v39, %v3489_v37  ;;  %v4617_v48 = vld [vmem:[%s7429_s1 + $0x34] sm:$0xf0] }
  0x17   : > { %v4667_v43 = vld [vmem:[%s7429_s1 + $0x1c4] sm:$0xf0]  ;;  %708 = vmatpush.bf16.msra.mxu0 %v3434_v29  ;;  %v3554_v46 = vor.u32 %v4651_v41, %v3553_v40  ;;  %v3481_v49 = vld [vmem:[%s7429_s1 + $0xb0] sm:$0xf]  ;;  %v4633_v51 = vld [vmem:[%s7429_s1 + $0xb4] sm:$0xf0]  ;;  %v3418_v56 = vor.u32 %v4617_v48, %v3417_v47 }
  0x18   : > { %737 = vmatpush.bf16.msra.mxu1 %v3498_v33  ;;  %v3618_v50 = vor.u32 %v4667_v43, %v3617_v42  ;;  %v3545_v52 = vld [vmem:[%s7429_s1 + $0x130] sm:$0xf]  ;;  %v4649_v53 = vld [vmem:[%s7429_s1 + $0x134] sm:$0xf0]  ;;  %v3482_v57 = vor.u32 %v4633_v51, %v3481_v49  ;;  %v3409_v59 = vld [vmem:[%s7429_s1 + $0x20] sm:$0xf] }
  0x19   : > { %766 = vmatpush.bf16.msra.mxu2 %v3562_v34  ;;  %v3609_v54 = vld [vmem:[%s7429_s1 + $0x1b0] sm:$0xf]  ;;  %v4665_v55 = vld [vmem:[%s7429_s1 + $0x1b4] sm:$0xf0]  ;;  %v3546_v58 = vor.u32 %v4649_v53, %v3545_v52  ;;  %v4615_v60 = vld [vmem:[%s7429_s1 + $0x24] sm:$0xf0] }
  0x1a   : > { %795 = vmatpush.bf16.msra.mxu3 %v3626_v38  ;;  %v3473_v61 = vld [vmem:[%s7429_s1 + $0xa0] sm:$0xf]  ;;  %v3610_v62 = vor.u32 %v4665_v55, %v3609_v54  ;;  %v4631_v63 = vld [vmem:[%s7429_s1 + $0xa4] sm:$0xf0]  ;;  %v3410_v4 = vor.u32 %v4615_v60, %v3409_v59  ;;  %v3401_v5 = vld [vmem:[%s7429_s1 + $0x10] sm:$0xf] }
  0x1b   : > { %709 = vmatpush.bf16.msra.mxu0 %v3426_v44  ;;  %v3537_v0 = vld [vmem:[%s7429_s1 + $0x120] sm:$0xf]  ;;  %v4647_v1 = vld [vmem:[%s7429_s1 + $0x124] sm:$0xf0]  ;;  %v3474_v6 = vor.u32 %v4631_v63, %v3473_v61  ;;  %v4613_v8 = vld [vmem:[%s7429_s1 + $0x14] sm:$0xf0] }
  0x1c   : > { %738 = vmatpush.bf16.msra.mxu1 %v3490_v45  ;;  %v3601_v2 = vld [vmem:[%s7429_s1 + $0x1a0] sm:$0xf]  ;;  %v4663_v3 = vld [vmem:[%s7429_s1 + $0x1a4] sm:$0xf0]  ;;  %v3538_v7 = vor.u32 %v4647_v1, %v3537_v0  ;;  %v3465_v9 = vld [vmem:[%s7429_s1 + $0x90] sm:$0xf]  ;;  %v3402_v17 = vor.u32 %v4613_v8, %v3401_v5 }
  0x1d   : > { %767 = vmatpush.bf16.msra.mxu2 %v3554_v46  ;;  %v4629_v10 = vld [vmem:[%s7429_s1 + $0x94] sm:$0xf0]  ;;  %v3602_v11 = vor.u32 %v4663_v3, %v3601_v2  ;;  %v3529_v12 = vld [vmem:[%s7429_s1 + $0x110] sm:$0xf]  ;;  %p180_p4 = scmp.lt.s32.totalorder %s4905_s12, 1 }
  0x1e   : > { %796 = vmatpush.bf16.msra.mxu3 %v3618_v50  ;;  %v4645_v13 = vld [vmem:[%s7429_s1 + $0x114] sm:$0xf0]  ;;  %v3593_v14 = vld [vmem:[%s7429_s1 + $0x190] sm:$0xf]  ;;  %v3393_v16 = vld [vmem:[%s7429_s1] sm:$0xf]  ;;  %v3466_v20 = vor.u32 %v4629_v10, %v3465_v9 }
  0x1f   : > { %710 = vmatpush.bf16.msra.mxu0 %v3418_v56  ;;  %v4661_v15 = vld [vmem:[%s7429_s1 + $0x194] sm:$0xf0]  ;;  %v4611_v18 = vld [vmem:[%s7429_s1 + $0x4] sm:$0xf0]  ;;  %v3457_v19 = vld [vmem:[%s7429_s1 + $0x80] sm:$0xf]  ;;  %v3530_v21 = vor.u32 %v4645_v13, %v3529_v12 }
  0x20   : > { %739 = vmatpush.bf16.msra.mxu1 %v3482_v57  ;;  %s7547_s12 = smov (!%p180_p4, %s4905_s12), 1  ;;  %v4627_v22 = vld [vmem:[%s7429_s1 + $0x84] sm:$0xf0]  ;;  %v3521_v23 = vld [vmem:[%s7429_s1 + $0x100] sm:$0xf]  ;;  %v3594_v25 = vor.u32 %v4661_v15, %v3593_v14  ;;  %v3394_v31 = vor.u32 %v4611_v18, %v3393_v16 }
  0x21   : > { %768 = vmatpush.bf16.msra.mxu2 %v3546_v58  ;;  %v4643_v24 = vld [vmem:[%s7429_s1 + $0x104] sm:$0xf0]  ;;  %v3585_v26 = vld [vmem:[%s7429_s1 + $0x180] sm:$0xf]  ;;  %s4866_s29 = smul.u32 288, %s7547_s12  ;;  %v3458_v35 = vor.u32 %v4627_v22, %v3457_v19  ;;  %s4609_s27 = sshll.u32 %s7547_s12, 6 }
  0x22   : > { %797 = vmatpush.bf16.msra.mxu3 %v3610_v62  ;;  %v4659_v27 = vld [vmem:[%s7429_s1 + $0x184] sm:$0xf0]  ;;  %v4656_v28 = vld [vmem:[%s7429_s1 + $0x174] sm:$0xf]  ;;  %v3579_v29 = vld [vmem:[%s7429_s1 + $0x178] sm:$0xf0]  ;;  %v3522_v36 = vor.u32 %v4643_v24, %v3521_v23 }
  0x23   : > { %711 = vmatpush.bf16.msra.mxu0 %v3410_v4  ;;  %v4672_v30 = vld [vmem:[%s7429_s1 + $0x1f4] sm:$0xf]  ;;  %s5164_s11 = scalar_lea.vmem %s7428_s0, %s4866_s29  ;;  %v3643_v32 = vld [vmem:[%s7429_s1 + $0x1f8] sm:$0xf0]  ;;  %v3586_v40 = vor.u32 %v4659_v27, %v3585_v26  ;;  %v3582_v44 = vor.u32 %v4656_v28, %v3579_v29  ;;  %v4654_v50 = vld [vmem:[%s7429_s1 + $0x164] sm:$0xf] }
  0x24   : > { %740 = vmatpush.bf16.msra.mxu1 %v3474_v6  ;;  %v4624_v33 = vld [vmem:[%s7429_s1 + $0x74] sm:$0xf]  ;;  %v3451_v34 = vld [vmem:[%s7429_s1 + $0x78] sm:$0xf0]  ;;  %v5176_v37 = vld [vmem:[%s5164_s11] sm:$0xff]  ;;  %v3646_v49 = vor.u32 %v4672_v30, %v3643_v32 }
  0x25   : > { %769 = vmatpush.bf16.msra.mxu2 %v3538_v7  ;;  %v5179_v38 = vld [vmem:[%s5164_s11 + $0x20] sm:$0xff]  ;;  %v5182_v39 = vld [vmem:[%s5164_s11 + $0x8] sm:$0xff]  ;;  %v322_v41 = vunpack.c.l.b16 %v5176_v37  ;;  %v4640_v45 = vld [vmem:[%s7429_s1 + $0xf4] sm:$0xf]  ;;  %v323_v47 = vunpack.c.h.b16 %v5176_v37  ;;  %v3454_v54 = vor.u32 %v4624_v33, %v3451_v34  ;;  %vm954_vm0 = vsmask.f32 3328 }
  0x26   : > { %798 = vmatpush.bf16.msra.mxu3 %v3602_v11  ;;  %v326_v42 = vunpack.c.l.b16 %v5179_v38  ;;  %v5187_v43 = vld [vmem:[%s5164_s11 + $0x28] sm:$0xff]  ;;  %v3515_v46 = vld [vmem:[%s7429_s1 + $0xf8] sm:$0xf0]  ;;  %v327_v48 = vunpack.c.h.b16 %v5179_v38  ;;  %v324_v53 = vunpack.c.l.b16 %v5182_v39  ;;  %v4670_v55 = vld [vmem:[%s7429_s1 + $0x1e4] sm:$0xf]  ;;  %v325_v2 = vunpack.c.h.b16 %v5182_v39 }
  0x27   : > { %712 = vmatpush.bf16.msra.mxu0 %v3402_v17  ;;  %v3571_v51 = vld [vmem:[%s7429_s1 + $0x168] sm:$0xf0]  ;;  %v328_v58 = vunpack.c.l.b16 %v5187_v43  ;;  %v3518_v59 = vor.u32 %v4640_v45, %v3515_v46  ;;  %v4622_v60 = vld [vmem:[%s7429_s1 + $0x64] sm:$0xf]  ;;  %v329_v6 = vunpack.c.h.b16 %v5187_v43  ;;  %v4652_v12 = vld [vmem:[%s7429_s1 + $0x154] sm:$0xf] }
  0x28   : > { %741 = vmatpush.bf16.msra.mxu1 %v3466_v20  ;;  %v5203_v52 = vpack.c.b16 %v326_v42, %v322_v41  ;;  %v3635_v56 = vld [vmem:[%s7429_s1 + $0x1e8] sm:$0xf0]  ;;  %v5212_v57 = vpack.c.b16 %v327_v48, %v323_v47  ;;  %v3574_v62 = vor.u32 %v4654_v50, %v3571_v51  ;;  %v4638_v63 = vld [vmem:[%s7429_s1 + $0xe4] sm:$0xf]  ;;  %v3563_v16 = vld [vmem:[%s7429_s1 + $0x158] sm:$0xf0] }
  0x29   : > { %770 = vmatpush.bf16.msra.mxu2 %v3530_v21  ;;  %v3443_v61 = vld [vmem:[%s7429_s1 + $0x68] sm:$0xf0]  ;;  %v5228_v1 = vpack.c.b16 %v328_v58, %v324_v53  ;;  %v3638_v3 = vor.u32 %v4670_v55, %v3635_v56  ;;  %v5232_v4 = vld [vmem:[%s5164_s11 + $0x40] sm:$0xff]  ;;  %v5241_v10 = vpack.c.b16 %v329_v6, %v325_v2  ;;  %v4668_v17 = vld [vmem:[%s7429_s1 + $0x1d4] sm:$0xf]  ;;  %v3566_v33 = vor.u32 %v4652_v12, %v3563_v16 }
  0x2a   : > { %799 = vmatpush.bf16.msra.mxu3 %v3594_v25  ;;  %v3507_v0 = vld [vmem:[%s7429_s1 + $0xe8] sm:$0xf0]  ;;  %v3446_v5 = vor.u32 %v4622_v60, %v3443_v61  ;;  %v330_v8 = vunpack.c.l.b16 %v5232_v4  ;;  %v5244_v11 = vld [vmem:[%s5164_s11 + $0x60] sm:$0xff]  ;;  %v331_v14 = vunpack.c.h.b16 %v5232_v4  ;;  %v3627_v19 = vld [vmem:[%s7429_s1 + $0x1d8] sm:$0xf0] }
  0x2b   : > { %713 = vmatpush.bf16.msra.mxu0 %v3394_v31  ;;  %v3510_v7 = vor.u32 %v4638_v63, %v3507_v0  ;;  %v5239_v9 = vld [vmem:[%s5164_s11 + $0x48] sm:$0xff]  ;;  %v4620_v20 = vld [vmem:[%s7429_s1 + $0x54] sm:$0xf]  ;;  %v3435_v21 = vld [vmem:[%s7429_s1 + $0x58] sm:$0xf0]  ;;  %v7451_v26 = vunpack.c.l.b16 %v5244_v11  ;;  %v7449_v31 = vunpack.c.h.b16 %v5244_v11  ;;  %v3630_v34 = vor.u32 %v4668_v17, %v3627_v19 }
  0x2c   : > { %742 = vmatpush.bf16.msra.mxu1 %v3458_v35  ;;  %v5249_v13 = vpack.c.b16 %v330_v8, %v326_v42  ;;  %v5253_v15 = vld [vmem:[%s5164_s11 + $0x68] sm:$0xff]  ;;  %v332_v18 = vunpack.c.l.b16 %v5239_v9  ;;  %v5272_v22 = vpack.c.b16 %v331_v14, %v327_v48  ;;  %v4636_v23 = vld [vmem:[%s7429_s1 + $0xd4] sm:$0xf]  ;;  %v3499_v24 = vld [vmem:[%s7429_s1 + $0xd8] sm:$0xf0]  ;;  %v333_v32 = vunpack.c.h.b16 %v5239_v9 }
  0x2d   : > { %771 = vmatpush.bf16.msra.mxu2 %v3522_v36  ;;  %v4650_v25 = vld [vmem:[%s7429_s1 + $0x144] sm:$0xf]  ;;  %v3555_v28 = vld [vmem:[%s7429_s1 + $0x148] sm:$0xf0]  ;;  %v3438_v41 = vor.u32 %v4620_v20, %v3435_v21  ;;  %v3502_v42 = vor.u32 %v4636_v23, %v3499_v24  ;;  %v4648_v51 = vld [vmem:[%s7429_s1 + $0x134] sm:$0xf]  ;;  %v7445_v61 = vunpack.c.h.b16 %v5253_v15 }
  0x2e   : > { %800 = vmatpush.bf16.msra.mxu3 %v3586_v40  ;;  %714 = vmatmul.bf16.vlgmr.msra.gmra.mxu0 %v5203_v52  ;;  %v5284_v27 = vpack.c.b16 %v332_v18, %v328_v58  ;;  %v4666_v29 = vld [vmem:[%s7429_s1 + $0x1c4] sm:$0xf]  ;;  %v3619_v30 = vld [vmem:[%s7429_s1 + $0x1c8] sm:$0xf0]  ;;  %v7447_v40 = vunpack.c.l.b16 %v5253_v15  ;;  %v5310_v46 = vpack.c.b16 %v333_v32, %v329_v6  ;;  %v3558_v47 = vor.u32 %v4650_v25, %v3555_v28  ;;  %v3547_v53 = vld [vmem:[%s7429_s1 + $0x138] sm:$0xf0] }
  0x2f   : > { %743 = vmatmul.bf16.vlgmr.msra.gmra.mxu1 %v5212_v57  ;;  %822 = vmatpush.bf16.msrb.mxu0 %v3454_v54  ;;  %v4634_v35 = vld [vmem:[%s7429_s1 + $0xc4] sm:$0xf]  ;;  %v3491_v36 = vld [vmem:[%s7429_s1 + $0xc8] sm:$0xf0]  ;;  %v3622_v48 = vor.u32 %v4666_v29, %v3619_v30  ;;  %v5324_v54 = vpack.c.b16 %v7449_v31, %v331_v14  ;;  %v4664_v56 = vld [vmem:[%s7429_s1 + $0x1b4] sm:$0xf] }
  0x30   : > { %772 = vmatmul.bf16.vlgmr.msra.gmra.mxu2 %v5228_v1  ;;  %851 = vmatpush.bf16.msrb.mxu1 %v3518_v59  ;;  %v3427_v45 = vld [vmem:[%s7429_s1 + $0x48] sm:$0xf0]  ;;  %v3494_v50 = vor.u32 %v4634_v35, %v3491_v36  ;;  %v3611_v58 = vld [vmem:[%s7429_s1 + $0x1b8] sm:$0xf0]  ;;  %v4616_v59 = vld [vmem:[%s7429_s1 + $0x34] sm:$0xf]  ;;  %v5337_v60 = vpack.c.b16 %v7447_v40, %v332_v18  ;;  %v5372_v18 = vpack.c.b16 %v7445_v61, %v333_v32 }
  0x31   : > { %880 = vmatpush.bf16.msrb.mxu2 %v3582_v44  ;;  %801 = vmatmul.bf16.vlgmr.msra.gmra.mxu3 %v5241_v10  ;;  %v4618_v44 = vld [vmem:[%s7429_s1 + $0x44] sm:$0xf]  ;;  %v4632_v63 = vld [vmem:[%s7429_s1 + $0xb4] sm:$0xf]  ;;  %v3483_v0 = vld [vmem:[%s7429_s1 + $0xb8] sm:$0xf0] }
  0x32   : > { %909 = vmatpush.bf16.msrb.mxu3 %v3646_v49  ;;  %v5314_v49 = vpack.c.b16 %v7451_v26, %v330_v8  ;;  %v3430_v55 = vor.u32 %v4618_v44, %v3427_v45  ;;  %v4646_v2 = vld [vmem:[%s7429_s1 + $0x124] sm:$0xf]  ;;  %v3614_v8 = vor.u32 %v4664_v56, %v3611_v58  ;;  %v3486_v14 = vor.u32 %v4632_v63, %v3483_v0  ;;  %v3475_v17 = vld [vmem:[%s7429_s1 + $0xa8] sm:$0xf0]  ;;  %v4660_v35 = vld [vmem:[%s7429_s1 + $0x194] sm:$0xf] }
  0x33   : > { %823 = vmatpush.bf16.msrb.mxu0 %v3446_v5  ;;  %v3539_v5 = vld [vmem:[%s7429_s1 + $0x128] sm:$0xf0]  ;;  %v4662_v6 = vld [vmem:[%s7429_s1 + $0x1a4] sm:$0xf]  ;;  %v3595_v36 = vld [vmem:[%s7429_s1 + $0x198] sm:$0xf0] }
  0x34   : > { %852 = vmatpush.bf16.msrb.mxu1 %v3510_v7  ;;  %v3603_v7 = vld [vmem:[%s7429_s1 + $0x1a8] sm:$0xf0]  ;;  %v4630_v16 = vld [vmem:[%s7429_s1 + $0xa4] sm:$0xf]  ;;  %v3542_v21 = vor.u32 %v4646_v2, %v3539_v5  ;;  %v3598_v45 = vor.u32 %v4660_v35, %v3595_v36  ;;  %v3467_v56 = vld [vmem:[%s7429_s1 + $0x98] sm:$0xf0] }
  0x35   : > { %881 = vmatpush.bf16.msrb.mxu2 %v3574_v62  ;;  %v3419_v62 = vld [vmem:[%s7429_s1 + $0x38] sm:$0xf0]  ;;  %v4614_v19 = vld [vmem:[%s7429_s1 + $0x24] sm:$0xf]  ;;  %v3411_v20 = vld [vmem:[%s7429_s1 + $0x28] sm:$0xf0]  ;;  %v3606_v23 = vor.u32 %v4662_v6, %v3603_v7  ;;  %v3478_v24 = vor.u32 %v4630_v16, %v3475_v17 }
  0x36   : > { %910 = vmatpush.bf16.msrb.mxu3 %v3638_v3  ;;  %v3550_v3 = vor.u32 %v4648_v51, %v3547_v53  ;;  %v3422_v12 = vor.u32 %v4616_v59, %v3419_v62  ;;  %v5381_v25 = vld [vmem:[%s5164_s11 + $0x80] sm:$0xff]  ;;  %v3414_v29 = vor.u32 %v4614_v19, %v3411_v20  ;;  %v5388_v30 = vld [vmem:[%s5164_s11 + $0x88] sm:$0xff]  ;;  %vm955_vm1 = vsmask.f32 7440  ;;  %v4712_v61 = vld [vmem:[%s7429_s1 + $0x334] sm:$0xf] }
  0x37   : > { %824 = vmatpush.bf16.msrb.mxu0 %v3438_v41  ;;  %v5384_v28 = vld [vmem:[%s5164_s11 + $0xa0] sm:$0xff]  ;;  %v5391_v32 = vld [vmem:[%s5164_s11 + $0xa8] sm:$0xff]  ;;  %v7450_v41 = vunpack.c.l.b16 %v5381_v25  ;;  %v7448_v51 = vunpack.c.h.b16 %v5381_v25  ;;  %v7446_v62 = vunpack.c.l.b16 %v5388_v30  ;;  %vm5738_vm2 = vmor %vm954_vm0, %vm955_vm1 }
  0x38   : > { %853 = vmatpush.bf16.msrb.mxu1 %v3502_v42  ;;  %v7443_v42 = vunpack.c.l.b16 %v5384_v28  ;;  %v7441_v53 = vunpack.c.h.b16 %v5384_v28  ;;  %v4642_v58 = vld [vmem:[%s7429_s1 + $0x104] sm:$0xf]  ;;  %v3523_v59 = vld [vmem:[%s7429_s1 + $0x108] sm:$0xf0]  ;;  %v7439_v63 = vunpack.c.l.b16 %v5391_v32 }
  0x39   : > { %882 = vmatpush.bf16.msrb.mxu2 %v3566_v33  ;;  %v4644_v33 = vld [vmem:[%s7429_s1 + $0x114] sm:$0xf]  ;;  %v4658_v2 = vld [vmem:[%s7429_s1 + $0x184] sm:$0xf]  ;;  %v3526_v6 = vor.u32 %v4642_v58, %v3523_v59  ;;  %v5483_v35 = vld [vmem:[%s5164_s11 + $0xc8] sm:$0xff] }
  0x3a   : > { %911 = vmatpush.bf16.msrb.mxu3 %v3630_v34  ;;  %v3531_v34 = vld [vmem:[%s7429_s1 + $0x118] sm:$0xf0]  ;;  %v4610_v5 = vld [vmem:[%s7429_s1 + $0x4] sm:$0xf]  ;;  %v5451_v16 = vpack.c.b16 %v7443_v42, %v7450_v41  ;;  %v5457_v19 = vpack.c.b16 %v7441_v53, %v7448_v51  ;;  %v5486_v36 = vld [vmem:[%s5164_s11 + $0xe8] sm:$0xff] }
  0x3b   : > { %825 = vmatpush.bf16.msrb.mxu0 %v3430_v55  ;;  %v3534_v44 = vor.u32 %v4644_v33, %v3531_v34  ;;  %v5477_v33 = vld [vmem:[%s5164_s11 + $0xc0] sm:$0xff] }
  0x3c   : > { %854 = vmatpush.bf16.msrb.mxu1 %v3494_v50  ;;  %v4628_v50 = vld [vmem:[%s7429_s1 + $0x94] sm:$0xf]  ;;  %v5480_v34 = vld [vmem:[%s5164_s11 + $0xe0] sm:$0xff]  ;;  %v7442_v58 = vunpack.c.l.b16 %v5477_v33 }
  0x3d   : > { %883 = vmatpush.bf16.msrb.mxu2 %v3558_v47  ;;  %v4612_v47 = vld [vmem:[%s7429_s1 + $0x14] sm:$0xf]  ;;  %v3470_v0 = vor.u32 %v4628_v50, %v3467_v56  ;;  %v4737_v50 = vld [vmem:[%s7429_s1 + $0x3f4] sm:$0xf0]  ;;  %v7435_v59 = vunpack.c.l.b16 %v5480_v34 }
  0x3e   : > { %912 = vmatpush.bf16.msrb.mxu3 %v3622_v48  ;;  %719 = vmatmul.bf16.gmra.mxu0 %v5314_v49  ;;  %v3403_v48 = vld [vmem:[%s7429_s1 + $0x18] sm:$0xf0]  ;;  %v4689_v56 = vld [vmem:[%s7429_s1 + $0x274] sm:$0xf0] }
  0x3f   : > { %748 = vmatmul.bf16.gmra.mxu1 %v5324_v54  ;;  %826 = vmatpush.bf16.msrb.mxu0 %v3422_v12  ;;  %v3406_v55 = vor.u32 %v4612_v47, %v3403_v48  ;;  %v4626_v12 = vld [vmem:[%s7429_s1 + $0x84] sm:$0xf]  ;;  %v3961_v47 = vld [vmem:[%s7429_s1 + $0x3f0] sm:$0xf] }
  0x40   : > { %777 = vmatmul.bf16.gmra.mxu2 %v5337_v60  ;;  %855 = vmatpush.bf16.msrb.mxu1 %v3486_v14  ;;  %v3459_v14 = vld [vmem:[%s7429_s1 + $0x88] sm:$0xf0] }
  0x41   : > { %884 = vmatpush.bf16.msrb.mxu2 %v3550_v3  ;;  %806 = vmatmul.bf16.gmra.mxu3 %v5372_v18  ;;  %v3587_v3 = vld [vmem:[%s7429_s1 + $0x188] sm:$0xf0]  ;;  %v3462_v17 = vor.u32 %v4626_v12, %v3459_v14  ;;  %v4719_v14 = vld [vmem:[%s7429_s1 + $0x364] sm:$0xf0] }
  0x42   : > { %913 = vmatpush.bf16.msrb.mxu3 %v3614_v8  ;;  %v3590_v7 = vor.u32 %v4658_v2, %v3587_v3  ;;  %v3395_v8 = vld [vmem:[%s7429_s1 + $0x8] sm:$0xf0]  ;;  %v3833_v3 = vld [vmem:[%s7429_s1 + $0x2f0] sm:$0xf] }
  0x43   : > { %827 = vmatpush.bf16.msrb.mxu0 %v3414_v29  ;;  %v3398_v20 = vor.u32 %v4610_v5, %v3395_v8  ;;  %v4705_v5 = vld [vmem:[%s7429_s1 + $0x2f4] sm:$0xf0]  ;;  %v7434_v8 = vunpack.c.h.b16 %v5480_v34 }
  0x44   : > { %856 = vmatpush.bf16.msrb.mxu1 %v3478_v24  ;;  %v7437_v24 = vunpack.c.h.b16 %v5391_v32  ;;  %v3834_v12 = vor.u32 %v4705_v5, %v3833_v3 }
  0x45   : > { %885 = vmatpush.bf16.msrb.mxu2 %v3542_v21  ;;  %v5463_v21 = vpack.c.b16 %v7439_v63, %v7446_v62 }
  0x46   : > { %914 = vmatpush.bf16.msrb.mxu3 %v3606_v23  ;;  %v7444_v23 = vunpack.c.h.b16 %v5388_v30 }
  0x47   : > { %828 = vmatpush.bf16.msrb.mxu0 %v3406_v55  ;;  %v3769_v55 = vld [vmem:[%s7429_s1 + $0x270] sm:$0xf] }
  0x48   : > { %857 = vmatpush.bf16.msrb.mxu1 %v3470_v0  ;;  %v5474_v29 = vpack.c.b16 %v7437_v24, %v7444_v23  ;;  %v3962_v0 = vor.u32 %v4737_v50, %v3961_v47  ;;  %v3770_v2 = vor.u32 %v4689_v56, %v3769_v55  ;;  %v3761_v50 = vld [vmem:[%s7429_s1 + $0x260] sm:$0xf]  ;;  %v4687_v55 = vld [vmem:[%s7429_s1 + $0x264] sm:$0xf0]  ;;  %v226_v23 = vld [vmem:[%s5164_s11 + $0x90] sm:$0x11] }
  0x49   : > { %886 = vmatpush.bf16.msrb.mxu2 %v3534_v44  ;;  %v3897_v44 = vld [vmem:[%s7429_s1 + $0x370] sm:$0xf]  ;;  %v3825_v56 = vld [vmem:[%s7429_s1 + $0x2e0] sm:$0xf]  ;;  %v3762_v3 = vor.u32 %v4687_v55, %v3761_v50 }
  0x4a   : > { %915 = vmatpush.bf16.msrb.mxu3 %v3598_v45  ;;  %v4721_v45 = vld [vmem:[%s7429_s1 + $0x374] sm:$0xf0]  ;;  %v3945_v50 = vld [vmem:[%s7429_s1 + $0x3d0] sm:$0xf] }
  0x4b   : > { %829 = vmatpush.bf16.msrb.mxu0 %v3398_v20  ;;  %v3898_v48 = vor.u32 %v4721_v45, %v3897_v44  ;;  %v4735_v20 = vld [vmem:[%s7429_s1 + $0x3e4] sm:$0xf0]  ;;  %v7438_v44 = vunpack.c.l.b16 %v5483_v35  ;;  %v7433_v45 = vunpack.c.l.b16 %v5486_v36 }
  0x4c   : > { %858 = vmatpush.bf16.msrb.mxu1 %v3462_v17  ;;  %v3953_v17 = vld [vmem:[%s7429_s1 + $0x3e0] sm:$0xf] }
  0x4d   : > { %887 = vmatpush.bf16.msrb.mxu2 %v3526_v6  ;;  %v3889_v6 = vld [vmem:[%s7429_s1 + $0x360] sm:$0xf] }
  0x4e   : > { %916 = vmatpush.bf16.msrb.mxu3 %v3590_v7  ;;  %724 = vmatmul.bf16.gmra.mxu0 %v5451_v16  ;;  %v7440_v7 = vunpack.c.h.b16 %v5477_v33  ;;  %v3890_v47 = vor.u32 %v4719_v14, %v3889_v6  ;;  %v7436_v14 = vunpack.c.h.b16 %v5483_v35 }
  0x4f   : > { %753 = vmatmul.bf16.gmra.mxu1 %v5457_v19  ;;  %1630 = vmatpush.bf16.msra.mxu0 %v3770_v2  ;;  %v5547_v2 = vpack.c.b16 %v7435_v59, %v7442_v58  ;;  %v4715_v59 = vld [vmem:[%s7429_s1 + $0x344] sm:$0xf0] }
  0x50   : > { %782 = vmatmul.bf16.gmra.mxu2 %v5463_v21  ;;  %1659 = vmatpush.bf16.msra.mxu1 %v3834_v12  ;;  %v5553_v6 = vpack.c.b16 %v7434_v8, %v7440_v7  ;;  %v5559_v12 = vpack.c.b16 %v7433_v45, %v7438_v44  ;;  %v3817_v45 = vld [vmem:[%s7429_s1 + $0x2d0] sm:$0xf] }
  0x51   : > { %811 = vmatmul.bf16.gmra.mxu3 %v5474_v29  ;;  %1688 = vmatpush.bf16.msra.mxu2 %v3898_v48  ;;  %v3954_v48 = vor.u32 %v4735_v20, %v3953_v17  ;;  %v7432_v17 = vunpack.c.h.b16 %v5486_v36 }
  0x52   : > { %1717 = vmatpush.bf16.msra.mxu3 %v3962_v0  ;;  %v4703_v0 = vld [vmem:[%s7429_s1 + $0x2e4] sm:$0xf0] }
  0x53   : > { %v3826_v5 = vor.u32 %v4703_v0, %v3825_v56  ;;  %1631 = vmatpush.bf16.msra.mxu0 %v3762_v3  ;;  %v5570_v20 = vpack.c.b16 %v7432_v17, %v7436_v14  ;;  %v4733_v56 = vld [vmem:[%s7429_s1 + $0x3d4] sm:$0xf0]  ;;  %v3753_v3 = vld [vmem:[%s7429_s1 + $0x250] sm:$0xf] }
  0x54   : > { %v4685_v0 = vld [vmem:[%s7429_s1 + $0x254] sm:$0xf0] }
  0x55   : > { %1689 = vmatpush.bf16.msra.mxu2 %v3890_v47  ;;  %1660 = vmatpush.bf16.msra.mxu1 %v3826_v5  ;;  %v3881_v47 = vld [vmem:[%s7429_s1 + $0x350] sm:$0xf]  ;;  %v3946_v5 = vor.u32 %v4733_v56, %v3945_v50  ;;  %v3754_v17 = vor.u32 %v4685_v0, %v3753_v3  ;;  %v3937_v50 = vld [vmem:[%s7429_s1 + $0x3c0] sm:$0xf]  ;;  %v4731_v56 = vld [vmem:[%s7429_s1 + $0x3c4] sm:$0xf0] }
  0x56   : > { %1718 = vmatpush.bf16.msra.mxu3 %v3954_v48  ;;  %v4717_v48 = vld [vmem:[%s7429_s1 + $0x354] sm:$0xf0]  ;;  %v3938_v0 = vor.u32 %v4731_v56, %v3937_v50  ;;  %v3801_v56 = vld [vmem:[%s7429_s1 + $0x2b0] sm:$0xf] }
  0x57   : > { %v3882_v55 = vor.u32 %v4717_v48, %v3881_v47  ;;  %v4701_v47 = vld [vmem:[%s7429_s1 + $0x2d4] sm:$0xf0]  ;;  %v3873_v48 = vld [vmem:[%s7429_s1 + $0x340] sm:$0xf]  ;;  %1632 = vmatpush.bf16.msra.mxu0 %v3754_v17  ;;  %v4699_v17 = vld [vmem:[%s7429_s1 + $0x2c4] sm:$0xf0] }
  0x58   : > { %v3818_v8 = vor.u32 %v4701_v47, %v3817_v45  ;;  %v3874_v3 = vor.u32 %v4715_v59, %v3873_v48  ;;  %v3745_v45 = vld [vmem:[%s7429_s1 + $0x240] sm:$0xf] }
  0x59   : > { %1690 = vmatpush.bf16.msra.mxu2 %v3882_v55  ;;  %v4683_v55 = vld [vmem:[%s7429_s1 + $0x244] sm:$0xf0]  ;;  %v3809_v47 = vld [vmem:[%s7429_s1 + $0x2c0] sm:$0xf] }
  0x5a   : > { %1719 = vmatpush.bf16.msra.mxu3 %v3946_v5  ;;  %1661 = vmatpush.bf16.msra.mxu1 %v3818_v8  ;;  %v3746_v14 = vor.u32 %v4683_v55, %v3745_v45  ;;  %v3810_v59 = vor.u32 %v4699_v17, %v3809_v47  ;;  %v3865_v8 = vld [vmem:[%s7429_s1 + $0x330] sm:$0xf]  ;;  %v4713_v5 = vld [vmem:[%s7429_s1 + $0x334] sm:$0xf0]  ;;  %v4711_v55 = vld [vmem:[%s7429_s1 + $0x324] sm:$0xf0] }
  0x5b   : > { %v3866_v48 = vor.u32 %v4713_v5, %v3865_v8  ;;  %v3921_v47 = vld [vmem:[%s7429_s1 + $0x3a0] sm:$0xf]  ;;  %v4727_v17 = vld [vmem:[%s7429_s1 + $0x3a4] sm:$0xf0] }
  0x5c   : > { %1633 = vmatpush.bf16.msra.mxu0 %v3746_v14  ;;  %v3929_v14 = vld [vmem:[%s7429_s1 + $0x3b0] sm:$0xf]  ;;  %v3922_v8 = vor.u32 %v4727_v17, %v3921_v47  ;;  %v3729_v5 = vld [vmem:[%s7429_s1 + $0x220] sm:$0xf]  ;;  %v1003_v47 = vshll.u32 %v5187_v43, 16 }
  0x5d   : > { %1691 = vmatpush.bf16.msra.mxu2 %v3874_v3  ;;  %v4697_v3 = vld [vmem:[%s7429_s1 + $0x2b4] sm:$0xf0] }
  0x5e   : > { %729 = vmatmul.bf16.gmra.mxu0 %v5547_v2  ;;  %1720 = vmatpush.bf16.msra.mxu3 %v3938_v0  ;;  %v3857_v0 = vld [vmem:[%s7429_s1 + $0x320] sm:$0xf]  ;;  %v3802_v45 = vor.u32 %v4697_v3, %v3801_v56  ;;  %v986_v56 = vshrl.u32 %v5179_v38, 16  ;;  %v989_v3 = vshll.u32 %v5179_v38, 16 }
  0x5f   : > { %758 = vmatmul.bf16.gmra.mxu1 %v5553_v6 }
  0x60   : > { %787 = vmatmul.bf16.gmra.mxu2 %v5559_v12  ;;  %1662 = vmatpush.bf16.msra.mxu1 %v3810_v59  ;;  %v3858_v59 = vor.u32 %v4711_v55, %v3857_v0  ;;  %v972_v0 = vshrl.u32 %v5182_v39, 16  ;;  %v1000_v55 = vshrl.u32 %v5187_v43, 16  ;;  %v4709_v43 = vld [vmem:[%s7429_s1 + $0x314] sm:$0xf0] }
  0x61   : > { %816 = vmatmul.bf16.gmra.mxu3 %v5570_v20  ;;  %1692 = vmatpush.bf16.msra.mxu2 %v3866_v48  ;;  %v3793_v48 = vld [vmem:[%s7429_s1 + $0x2a0] sm:$0xf] }
  0x64   : > { %1663 = vmatpush.bf16.msra.mxu1 %v3802_v45  ;;  %v975_v45 = vshll.u32 %v5182_v39, 16  ;;  %v3849_v39 = vld [vmem:[%s7429_s1 + $0x310] sm:$0xf] }
  0x65   : > { %1693 = vmatpush.bf16.msra.mxu2 %v3858_v59  ;;  %v988_v59 = vrot.slane %v986_v56, 4  ;;  %v4693_v56 = vld [vmem:[%s7429_s1 + $0x294] sm:$0xf0] }
  0x66   : > { %v977_v38 = vrot.slane %v975_v45, 5 }
  0x6e   : > { %830 = vmatmul.bf16.vlgmr.msrb.gmra.mxu0 %v5203_v52  ;;  %v4729_v52 = vld [vmem:[%s7429_s1 + $0x3b4] sm:$0xf0] }
  0x6f   : > { %859 = vmatmul.bf16.vlgmr.msrb.gmra.mxu1 %v5212_v57  ;;  %v3737_v57 = vld [vmem:[%s7429_s1 + $0x230] sm:$0xf] }
  0x70   : > { %888 = vmatmul.bf16.vlgmr.msrb.gmra.mxu2 %v5228_v1  ;;  %v4681_v1 = vld [vmem:[%s7429_s1 + $0x234] sm:$0xf0] }
  0x71   : > { %917 = vmatmul.bf16.vlgmr.msrb.gmra.mxu3 %v5241_v10  ;;  %v3930_v10 = vor.u32 %v4729_v52, %v3929_v14  ;;  %v3738_v50 = vor.u32 %v4681_v1, %v3737_v57  ;;  %v4679_v14 = vld [vmem:[%s7429_s1 + $0x224] sm:$0xf0] }
  0x72   : > { %v3730_v52 = vor.u32 %v4679_v14, %v3729_v5  ;;  %v4695_v57 = vld [vmem:[%s7429_s1 + $0x2a4] sm:$0xf0]  ;;  %v974_v5 = vrot.slane %v972_v0, 4  ;;  %v1002_v14 = vrot.slane %v1000_v55, 4 }
  0x73   : > { %1721 = vmatpush.bf16.msra.mxu3 %v3930_v10  ;;  %1634 = vmatpush.bf16.msra.mxu0 %v3738_v50  ;;  %v3794_v1 = vor.u32 %v4695_v57, %v3793_v48  ;;  %v958_v10 = vshrl.u32 %v5176_v37, 16  ;;  %v961_v50 = vshll.u32 %v5176_v37, 16  ;;  %v3850_v48 = vor.u32 %v4709_v43, %v3849_v39  ;;  %v4677_v57 = vld [vmem:[%s7429_s1 + $0x214] sm:$0xf0]  ;;  %v3777_v43 = vld [vmem:[%s7429_s1 + $0x280] sm:$0xf] }
  0x74   : > { %v978_v45 = vor.u32 %v977_v38, %v974_v5  ;;  %v3713_v5 = vld [vmem:[%s7429_s1 + $0x200] sm:$0xf]  ;;  %v4675_v38 = vld [vmem:[%s7429_s1 + $0x204] sm:$0xf0] }
  0x75   : > { %1664 = vmatpush.bf16.msra.mxu1 %v3794_v1  ;;  %v960_v37 = vrot.slane %v958_v10, 4  ;;  %v963_v17 = vrot.slane %v961_v50, 5  ;;  %v3785_v50 = vld [vmem:[%s7429_s1 + $0x290] sm:$0xf]  ;;  %1694 = vmatpush.bf16.msra.mxu2 %v3850_v48 }
  0x76   : > { %v3786_v55 = vor.u32 %v4693_v56, %v3785_v50  ;;  %v221_v56 = vld [vmem:[%s5164_s11 + $0x38] sm:$0x11] }
  0x77   : > { %1722 = vmatpush.bf16.msra.mxu3 %v3922_v8  ;;  %1635 = vmatpush.bf16.msra.mxu0 %v3730_v52  ;;  %v991_v8 = vrot.slane %v989_v3, 5  ;;  %v4725_v52 = vld [vmem:[%s7429_s1 + $0x394] sm:$0xf0]  ;;  %v3841_v3 = vld [vmem:[%s7429_s1 + $0x300] sm:$0xf] }
  0x79   : > { %v992_v0 = vor.u32 %v991_v8, %v988_v59  ;;  %1665 = vmatpush.bf16.msra.mxu1 %v3786_v55 }
  0x7e   : > { %835 = vmatmul.bf16.gmra.mxu0 %v5314_v49  ;;  %v1005_v49 = vrot.slane %v1003_v47, 5  ;;  %v4707_v47 = vld [vmem:[%s7429_s1 + $0x304] sm:$0xf0] }
  0x7f   : > { %864 = vmatmul.bf16.gmra.mxu1 %v5324_v54  ;;  %v3913_v54 = vld [vmem:[%s7429_s1 + $0x390] sm:$0xf]  ;;  %v3842_v59 = vor.u32 %v4707_v47, %v3841_v3  ;;  %v979_v47 = vrot.slane %v978_v45, 4 }
  0x80   : > { %893 = vmatmul.bf16.gmra.mxu2 %v5337_v60  ;;  %v964_v60 = vor.u32 %v963_v17, %v960_v37  ;;  %v3914_v1 = vor.u32 %v4725_v52, %v3913_v54  ;;  %v3905_v37 = vld [vmem:[%s7429_s1 + $0x380] sm:$0xf]  ;;  %v4723_v17 = vld [vmem:[%s7429_s1 + $0x384] sm:$0xf0]  ;;  %v1006_v39 = vor.u32 %v1005_v49, %v1002_v14  ;;  %v3714_v14 = vor.u32 %v4675_v38, %v3713_v5  ;;  %v218_v52 = vld [vmem:[%s5164_s11 + $0x10] sm:$0x11] }
  0x81   : > { %922 = vmatmul.bf16.gmra.mxu3 %v5372_v18  ;;  %v3721_v18 = vld [vmem:[%s7429_s1 + $0x210] sm:$0xf]  ;;  %v3906_v8 = vor.u32 %v4723_v17, %v3905_v37  ;;  %v4691_v49 = vld [vmem:[%s7429_s1 + $0x284] sm:$0xf0]  ;;  %1695 = vmatpush.bf16.msra.mxu2 %v3842_v59 }
  0x82   : > { %v3722_v10 = vor.u32 %v4677_v57, %v3721_v18  ;;  %1723 = vmatpush.bf16.msra.mxu3 %v3914_v1  ;;  %v965_v54 = vrot.slane %v964_v60, 4  ;;  %v3778_v48 = vor.u32 %v4691_v49, %v3777_v43  ;;  %v220_v18 = vld [vmem:[%s5164_s11 + $0x30] sm:$0x11]  ;;  %v219_v57 = vld [vmem:[%s5164_s11 + $0x18] sm:$0x11]  ;;  %v993_v1 = vrot.slane %v992_v0, 4 }
  0x83   : > { %v995_v50 = vshll.u32 %v220_v18, 16  ;;  %v981_v3 = vshll.u32 %v219_v57, 16  ;;  %v1007_v37 = vrot.slane %v1006_v39, 4  ;;  %v1009_v60 = vshll.u32 %v221_v56, 16 }
  0x84   : > { %1636 = vmatpush.bf16.msra.mxu0 %v3722_v10  ;;  %v967_v10 = vshll.u32 %v218_v52, 16  ;;  %1666 = vmatpush.bf16.msra.mxu1 %v3778_v48  ;;  %v1014_v56 = vshrl.u32 %v5232_v4, 16 }
  0x85   : > { %v997_v17 = vrot.slane %v995_v50, 5  ;;  %v983_v0 = vrot.slane %v981_v3, 5  ;;  %v1011_v59 = vrot.slane %v1009_v60, 5  ;;  %v4736_v50 = vld [vmem:[%s7429_s1 + $0x3f4] sm:$0xf] }
  0x86   : > { %1724 = vmatpush.bf16.msra.mxu3 %v3906_v8  ;;  %v969_v55 = vrot.slane %v967_v10, 5  ;;  %v3899_v10 = vld [vmem:[%s7429_s1 + $0x378] sm:$0xf0] }
  0x87   : > { %v5747_v39 = vsel %vm5738_vm2, %v993_v1, %v997_v17  ;;  %v4720_v1 = vld [vmem:[%s7429_s1 + $0x374] sm:$0xf]  ;;  %v1031_v17 = vshll.u32 %v5239_v9, 16 }
  0x88   : > { %1637 = vmatpush.bf16.msra.mxu0 %v3714_v14  ;;  %v970_v45 = vsel %vm5738_vm2, %v965_v54, %v969_v55  ;;  %v1251_v43 = vunpack.c.h.b16 %v5747_v39  ;;  %v984_v14 = vsel %vm5738_vm2, %v979_v47, %v983_v0  ;;  %v3902_v47 = vor.u32 %v4720_v1, %v3899_v10 }
  0x89   : > { %v1246_v8 = vunpack.c.l.b16 %v970_v45  ;;  %v1247_v38 = vunpack.c.h.b16 %v970_v45  ;;  %v1248_v49 = vunpack.c.l.b16 %v984_v14  ;;  %v1249_v52 = vunpack.c.h.b16 %v984_v14  ;;  %v3771_v45 = vld [vmem:[%s7429_s1 + $0x278] sm:$0xf0]  ;;  %v4718_v14 = vld [vmem:[%s7429_s1 + $0x364] sm:$0xf] }
  0x8a   : > { %1804 = vmatpush.bf16.msrb.mxu2 %v3902_v47  ;;  %v1028_v55 = vshrl.u32 %v5239_v9, 16  ;;  %v1016_v0 = vrot.slane %v1014_v56, 4  ;;  %v3835_v9 = vld [vmem:[%s7429_s1 + $0x2f8] sm:$0xf0]  ;;  %v3955_v56 = vld [vmem:[%s7429_s1 + $0x3e8] sm:$0xf0] }
  0x8e   : > { %840 = vmatmul.bf16.gmra.mxu0 %v5451_v16  ;;  %v1250_v16 = vunpack.c.l.b16 %v5747_v39  ;;  %v4732_v39 = vld [vmem:[%s7429_s1 + $0x3d4] sm:$0xf] }
  0x8f   : > { %869 = vmatmul.bf16.gmra.mxu1 %v5457_v19  ;;  %v5756_v19 = vsel %vm5738_vm2, %v1007_v37, %v1011_v59  ;;  %v3963_v37 = vld [vmem:[%s7429_s1 + $0x3f8] sm:$0xf0] }
  0x90   : > { %898 = vmatmul.bf16.gmra.mxu2 %v5463_v21  ;;  %v5760_v54 = vpack.c.b16 %v1250_v16, %v1246_v8  ;;  %v5764_v21 = vpack.c.b16 %v1251_v43, %v1247_v38  ;;  %v1252_v48 = vunpack.c.l.b16 %v5756_v19  ;;  %v1253_v18 = vunpack.c.h.b16 %v5756_v19  ;;  %v4704_v8 = vld [vmem:[%s7429_s1 + $0x2f4] sm:$0xf] }
  0x91   : > { %927 = vmatmul.bf16.gmra.mxu3 %v5474_v29  ;;  %v1017_v29 = vshll.u32 %v5232_v4, 16  ;;  %v3966_v60 = vor.u32 %v4736_v50, %v3963_v37  ;;  %v4688_v4 = vld [vmem:[%s7429_s1 + $0x274] sm:$0xf]  ;;  %v3838_v1 = vor.u32 %v4704_v8, %v3835_v9  ;;  %v4734_v50 = vld [vmem:[%s7429_s1 + $0x3e4] sm:$0xf]  ;;  %v1042_v9 = vshrl.u32 %v5244_v11, 16 }
  0x92   : > { %v5771_v57 = vpack.c.b16 %v1252_v48, %v1248_v49  ;;  %v5786_v3 = vpack.c.b16 %v1253_v18, %v1249_v52  ;;  %v3774_v38 = vor.u32 %v4688_v4, %v3771_v45  ;;  %v3891_v49 = vld [vmem:[%s7429_s1 + $0x368] sm:$0xf0]  ;;  %v3958_v47 = vor.u32 %v4734_v50, %v3955_v56  ;;  %v223_v4 = vld [vmem:[%s5164_s11 + $0x58] sm:$0x11]  ;;  %v4700_v19 = vld [vmem:[%s7429_s1 + $0x2d4] sm:$0xf] }
  0x93   : > { %1833 = vmatpush.bf16.msrb.mxu3 %v3966_v60  ;;  %v1019_v59 = vrot.slane %v1017_v29, 5  ;;  %v3894_v10 = vor.u32 %v4718_v14, %v3891_v49  ;;  %v222_v29 = vld [vmem:[%s5164_s11 + $0x50] sm:$0x11]  ;;  %1775 = vmatpush.bf16.msrb.mxu1 %v3838_v1  ;;  %v1033_v45 = vrot.slane %v1031_v17, 5  ;;  %v1037_v8 = vshll.u32 %v223_v4, 16 }
  0x94   : > { %1746 = vmatpush.bf16.msrb.mxu0 %v3774_v38  ;;  %v1023_v60 = vshll.u32 %v222_v29, 16  ;;  %v1045_v38 = vshll.u32 %v5244_v11, 16  ;;  %v1056_v1 = vshrl.u32 %v5253_v15, 16  ;;  %v3827_v50 = vld [vmem:[%s7429_s1 + $0x2e8] sm:$0xf0]  ;;  %v1059_v29 = vshll.u32 %v5253_v15, 16 }
  0x95   : > { %v1020_v52 = vor.u32 %v1019_v59, %v1016_v0  ;;  %v1030_v0 = vrot.slane %v1028_v55, 4  ;;  %1805 = vmatpush.bf16.msrb.mxu2 %v3894_v10  ;;  %v1039_v49 = vrot.slane %v1037_v8, 5  ;;  %v3763_v55 = vld [vmem:[%s7429_s1 + $0x268] sm:$0xf0]  ;;  %v4716_v4 = vld [vmem:[%s7429_s1 + $0x354] sm:$0xf] }
  0x96   : > { %v1025_v59 = vrot.slane %v1023_v60, 5 }
  0x97   : > { %v1021_v37 = vrot.slane %v1020_v52, 4  ;;  %1834 = vmatpush.bf16.msrb.mxu3 %v3958_v47 }
  0x99   : > { %v5826_v14 = vsel %vm5738_vm2, %v1021_v37, %v1025_v59  ;;  %v1047_v59 = vrot.slane %v1045_v38, 5 }
  0x9a   : > { %v1254_v17 = vunpack.c.l.b16 %v5826_v14  ;;  %v1255_v52 = vunpack.c.h.b16 %v5826_v14  ;;  %v3859_v14 = vld [vmem:[%s7429_s1 + $0x328] sm:$0xf0] }
  0x9c   : > { %v5849_v37 = vpack.c.b16 %v1254_v17, %v1250_v16  ;;  %v5855_v60 = vpack.c.b16 %v1255_v52, %v1251_v43  ;;  %v3947_v43 = vld [vmem:[%s7429_s1 + $0x3d8] sm:$0xf0] }
  0x9d   : > { %v3950_v38 = vor.u32 %v4732_v39, %v3947_v43 }
  0x9e   : > { %845 = vmatmul.bf16.gmra.mxu0 %v5547_v2  ;;  %v1034_v2 = vor.u32 %v1033_v45, %v1030_v0  ;;  %v1044_v0 = vrot.slane %v1042_v9, 4  ;;  %v224_v45 = vld [vmem:[%s5164_s11 + $0x70] sm:$0x11] }
  0x9f   : > { %874 = vmatmul.bf16.gmra.mxu1 %v5553_v6  ;;  %v4686_v6 = vld [vmem:[%s7429_s1 + $0x264] sm:$0xf]  ;;  %1835 = vmatpush.bf16.msrb.mxu3 %v3950_v38 }
  0xa0   : > { %903 = vmatmul.bf16.gmra.mxu2 %v5559_v12  ;;  %v4702_v12 = vld [vmem:[%s7429_s1 + $0x2e4] sm:$0xf]  ;;  %v3766_v10 = vor.u32 %v4686_v6, %v3763_v55  ;;  %v1035_v56 = vrot.slane %v1034_v2, 4  ;;  %v1051_v55 = vshll.u32 %v224_v45, 16 }
  0xa1   : > { %932 = vmatmul.bf16.gmra.mxu3 %v5570_v20  ;;  %v3830_v47 = vor.u32 %v4702_v12, %v3827_v50  ;;  %v3883_v20 = vld [vmem:[%s7429_s1 + $0x358] sm:$0xf0]  ;;  %v1061_v50 = vrot.slane %v1059_v29, 5  ;;  %v4714_v29 = vld [vmem:[%s7429_s1 + $0x344] sm:$0xf] }
  0xa2   : > { %1747 = vmatpush.bf16.msrb.mxu0 %v3766_v10  ;;  %v5865_v16 = vsel %vm5738_vm2, %v1035_v56, %v1039_v49  ;;  %v3886_v2 = vor.u32 %v4716_v4, %v3883_v20  ;;  %v225_v12 = vld [vmem:[%s5164_s11 + $0x78] sm:$0x11]  ;;  %v1058_v10 = vrot.slane %v1056_v1, 4  ;;  %v1048_v56 = vor.u32 %v1047_v59, %v1044_v0  ;;  %v3875_v20 = vld [vmem:[%s7429_s1 + $0x348] sm:$0xf0] }
  0xa3   : > { %1776 = vmatpush.bf16.msrb.mxu1 %v3830_v47  ;;  %v1256_v8 = vunpack.c.l.b16 %v5865_v16  ;;  %v7452_v9 = vunpack.c.h.b16 %v5865_v16  ;;  %v4684_v47 = vld [vmem:[%s7429_s1 + $0x254] sm:$0xf]  ;;  %v3819_v1 = vld [vmem:[%s7429_s1 + $0x2d8] sm:$0xf0]  ;;  %v1070_v0 = vshrl.u32 %v5381_v25, 16  ;;  %v3878_v43 = vor.u32 %v4714_v29, %v3875_v20 }
  0xa4   : > { %1806 = vmatpush.bf16.msrb.mxu2 %v3886_v2  ;;  %v3822_v39 = vor.u32 %v4700_v19, %v3819_v1  ;;  %v4730_v45 = vld [vmem:[%s7429_s1 + $0x3c4] sm:$0xf]  ;;  %v3939_v2 = vld [vmem:[%s7429_s1 + $0x3c8] sm:$0xf0]  ;;  %v1049_v44 = vrot.slane %v1048_v56, 4  ;;  %v1053_v63 = vrot.slane %v1051_v55, 5 }
  0xa5   : > { %v5880_v49 = vpack.c.b16 %v1256_v8, %v1252_v48  ;;  %v5886_v6 = vpack.c.b16 %v7452_v9, %v1253_v18  ;;  %v3755_v48 = vld [vmem:[%s7429_s1 + $0x258] sm:$0xf0]  ;;  %v3942_v24 = vor.u32 %v4730_v45, %v3939_v2  ;;  %v1073_v19 = vshll.u32 %v5381_v25, 16  ;;  %v3747_v45 = vld [vmem:[%s7429_s1 + $0x248] sm:$0xf0] }
  0xa6   : > { %v3758_v4 = vor.u32 %v4684_v47, %v3755_v48  ;;  %v1062_v47 = vor.u32 %v1061_v50, %v1058_v10  ;;  %v1065_v48 = vshll.u32 %v225_v12, 16  ;;  %v1098_v1 = vshrl.u32 %v5384_v28, 16 }
  0xa7   : > { %1777 = vmatpush.bf16.msrb.mxu1 %v3822_v39  ;;  %v1101_v29 = vshll.u32 %v5384_v28, 16  ;;  %v1084_v20 = vshrl.u32 %v5388_v30, 16  ;;  %v1087_v12 = vshll.u32 %v5388_v30, 16  ;;  %v1112_v10 = vshrl.u32 %v5391_v32, 16  ;;  %1836 = vmatpush.bf16.msrb.mxu3 %v3942_v24  ;;  %v4698_v24 = vld [vmem:[%s7429_s1 + $0x2c4] sm:$0xf] }
  0xa8   : > { %1748 = vmatpush.bf16.msrb.mxu0 %v3758_v4  ;;  %1807 = vmatpush.bf16.msrb.mxu2 %v3878_v43  ;;  %v1115_v50 = vshll.u32 %v5391_v32, 16  ;;  %v1067_v4 = vrot.slane %v1065_v48, 5  ;;  %v5930_v39 = vsel %vm5738_vm2, %v1049_v44, %v1053_v63  ;;  %v4682_v43 = vld [vmem:[%s7429_s1 + $0x244] sm:$0xf]  ;;  %v3811_v63 = vld [vmem:[%s7429_s1 + $0x2c8] sm:$0xf0] }
  0xa9   : > { %7479 = vst [vmem:[#allocation2_spill] sm:$0xff] %v5930_v39  ;;  %v1075_v44 = vrot.slane %v1073_v19, 5  ;;  %v1100_v48 = vrot.slane %v1098_v1, 4  ;;  %v1103_v7 = vrot.slane %v1101_v29, 5  ;;  %v3814_v42 = vor.u32 %v4698_v24, %v3811_v63  ;;  %v228_v1 = vld [vmem:[%s5164_s11 + $0xb0] sm:$0x11] }
  0xaa   : > { %v3931_v29 = vld [vmem:[%s7429_s1 + $0x3b8] sm:$0xf0]  ;;  %v7456_v24 = vunpack.c.l.b16 %v5930_v39  ;;  %v1117_v40 = vrot.slane %v1115_v50, 5  ;;  %v1107_v56 = vshll.u32 %v228_v1, 16 }
  0xab   : > { %v715_v18 = vpop.f32.mrf.mxu0  ;;  %1778 = vmatpush.bf16.msrb.mxu1 %v3814_v42  ;;  %v229_v63 = vld [vmem:[%s5164_s11 + $0xb8] sm:$0x11]  ;;  %v1104_v9 = vor.u32 %v1103_v7, %v1100_v48  ;;  %v1079_v42 = vshll.u32 %v226_v23, 16  ;;  %v4696_v23 = vld [vmem:[%s7429_s1 + $0x2b4] sm:$0xf] }
  0xac   : > { %v744_v59 = vpop.f32.mrf.mxu1  ;;  %v4710_v48 = vld [vmem:[%s7429_s1 + $0x324] sm:$0xf] }
  0xad   : > { %v745_v38 = vadd.f32 %v744_v59, %v715_v18  ;;  %v1063_v18 = vrot.slane %v1062_v47, 4  ;;  %v5926_v59 = vrot.slane %v1070_v0, 4  ;;  %v3750_v47 = vor.u32 %v4682_v43, %v3747_v45  ;;  %v3867_v43 = vld [vmem:[%s7429_s1 + $0x338] sm:$0xf0] }
  0xae   : > { %1638 = vmatmul.bf16.vlgmr.msra.gmra.mxu0 %v5760_v54  ;;  %v3870_v62 = vor.u32 %v4712_v61, %v3867_v43  ;;  %v5975_v61 = vpack.c.b16 %v7456_v24, %v1254_v17 }
  0xaf   : > { %1667 = vmatmul.bf16.vlgmr.msra.gmra.mxu1 %v5764_v21  ;;  %v5954_v19 = vsel %vm5738_vm2, %v1063_v18, %v1067_v4  ;;  %1749 = vmatpush.bf16.msrb.mxu0 %v3750_v47  ;;  %v7455_v4 = vunpack.c.h.b16 %v5930_v39  ;;  %v1114_v47 = vrot.slane %v1112_v10, 4  ;;  %v1076_v26 = vor.u32 %v1075_v44, %v5926_v59  ;;  %v3803_v44 = vld [vmem:[%s7429_s1 + $0x2b8] sm:$0xf0] }
  0xb0   : > { %1696 = vmatmul.bf16.vlgmr.msra.gmra.mxu2 %v5771_v57  ;;  %7480 = vst [vmem:[#allocation3_spill] sm:$0xff] %v5954_v19  ;;  %v7454_v41 = vunpack.c.l.b16 %v5954_v19  ;;  %v7453_v10 = vunpack.c.h.b16 %v5954_v19 }
  0xb1   : > { %1725 = vmatmul.bf16.vlgmr.msra.gmra.mxu3 %v5786_v3  ;;  %1808 = vmatpush.bf16.msrb.mxu2 %v3870_v62  ;;  %v3739_v62 = vld [vmem:[%s7429_s1 + $0x238] sm:$0xf0]  ;;  %v5990_v17 = vpack.c.b16 %v7455_v4, %v1255_v52  ;;  %v1118_v50 = vor.u32 %v1117_v40, %v1114_v47  ;;  %v3806_v52 = vor.u32 %v4696_v23, %v3803_v44  ;;  %v7481_v44 = vshrl.u32 %v5477_v33, 16 }
  0xb2   : > { %v6006_v40 = vpack.c.b16 %v7454_v41, %v1256_v8  ;;  %v1109_v8 = vrot.slane %v1107_v56, 5  ;;  %v7483_v56 = vunpack.c.h.b16 %v5865_v16 }
  0xb3   : > { %v773_v2 = vpop.f32.mrf.mxu2  ;;  %v717_v0 = vpop.f32.mrf.mxu0  ;;  %1779 = vmatpush.bf16.msrb.mxu1 %v3806_v52  ;;  %v1119_v23 = vrot.slane %v1118_v50, 4  ;;  %v1143_v50 = vshll.u32 %v5483_v35, 16 }
  0xb4   : > { %v774_v53 = vadd.f32 %v773_v2, %v745_v38  ;;  %v746_v58 = vpop.f32.mrf.mxu1  ;;  %v4728_v38 = vld [vmem:[%s7429_s1 + $0x3b4] sm:$0xf]  ;;  %v227_v2 = vld [vmem:[%s5164_s11 + $0x98] sm:$0x11]  ;;  %v802_v18 = vpop.f32.mrf.mxu3 }
  0xb5   : > { %v747_v45 = vadd.f32 %v746_v58, %v717_v0  ;;  %v1086_v58 = vrot.slane %v1084_v20, 4  ;;  %v1089_v0 = vrot.slane %v1087_v12, 5  ;;  %v3934_v51 = vor.u32 %v4728_v38, %v3931_v29  ;;  %v4726_v29 = vld [vmem:[%s7429_s1 + $0x3a4] sm:$0xf] }
  0xb6   : > { %v5967_v31 = vadd.f32 %v802_v18, %v774_v53  ;;  %v1093_v55 = vshll.u32 %v227_v2, 16  ;;  %v1121_v20 = vshll.u32 %v229_v63, 16  ;;  %v4680_v53 = vld [vmem:[%s7429_s1 + $0x234] sm:$0xf]  ;;  %v3862_v38 = vor.u32 %v4710_v48, %v3859_v14  ;;  %v3923_v2 = vld [vmem:[%s7429_s1 + $0x3a8] sm:$0xf0] }
  0xb7   : > { %1837 = vmatpush.bf16.msrb.mxu3 %v3934_v51  ;;  %v1090_v12 = vor.u32 %v1089_v0, %v1086_v58  ;;  %v3742_v59 = vor.u32 %v4680_v53, %v3739_v62  ;;  %v1077_v58 = vrot.slane %v1076_v26, 4  ;;  %v3926_v0 = vor.u32 %v4726_v29, %v3923_v2  ;;  %v4678_v14 = vld [vmem:[%s7429_s1 + $0x224] sm:$0xf] }
  0xb8   : > { %v1081_v18 = vrot.slane %v1079_v42, 5  ;;  %v1095_v53 = vrot.slane %v1093_v55, 5  ;;  %1809 = vmatpush.bf16.msrb.mxu2 %v3862_v38  ;;  %v7482_v26 = vshll.u32 %v5477_v33, 16  ;;  %v6027_v55 = vpack.c.b16 %v7453_v10, %v7483_v56  ;;  %v4724_v56 = vld [vmem:[%s7429_s1 + $0x394] sm:$0xf] }
  0xb9   : > { %1750 = vmatpush.bf16.msrb.mxu0 %v3742_v59  ;;  %v1091_v47 = vrot.slane %v1090_v12, 4  ;;  %v1154_v42 = vshrl.u32 %v5480_v34, 16  ;;  %v1140_v12 = vshrl.u32 %v5483_v35, 16 }
  0xba   : > { %v6035_v48 = vsel %vm5738_vm2, %v1077_v58, %v1081_v18  ;;  %v1168_v18 = vshrl.u32 %v5486_v36, 16 }
  0xbb   : > { %v775_v51 = vpop.f32.mrf.mxu2  ;;  %v720_v7 = vpop.f32.mrf.mxu0  ;;  %1838 = vmatpush.bf16.msrb.mxu3 %v3926_v0  ;;  %7484 = vst [vmem:[#allocation4_spill] sm:$0xff] %v6035_v48  ;;  %v6052_v29 = vsel %vm5738_vm2, %v1091_v47, %v1095_v53  ;;  %v7486_v19 = vunpack.c.l.b16 %v6035_v48 }
  0xbc   : > { %v776_v43 = vadd.f32 %v775_v51, %v747_v45  ;;  %v749_v1 = vpop.f32.mrf.mxu1  ;;  %v1105_v45 = vrot.slane %v1104_v9, 4  ;;  %v804_v62 = vpop.f32.mrf.mxu3  ;;  %v1123_v51 = vrot.slane %v1121_v20, 5  ;;  %v1131_v9 = vrot.slane %v7482_v26, 5 }
  0xbd   : > { %v750_v63 = vadd.f32 %v749_v1, %v720_v7  ;;  %v1128_v7 = vrot.slane %v7481_v44, 4  ;;  %v1157_v20 = vshll.u32 %v5480_v34, 16  ;;  %v4694_v1 = vld [vmem:[%s7429_s1 + $0x2a4] sm:$0xf]  ;;  %v1145_v26 = vrot.slane %v1143_v50, 5 }
  0xbe   : > { %1643 = vmatmul.bf16.gmra.mxu0 %v5975_v61  ;;  %v6020_v59 = vadd.f32 %v804_v62, %v776_v43  ;;  %v6039_v16 = vsel %vm5738_vm2, %v1105_v45, %v1109_v8  ;;  %v3731_v43 = vld [vmem:[%s7429_s1 + $0x228] sm:$0xf0]  ;;  %v6056_v2 = vsel %vm5738_vm2, %v1119_v23, %v1123_v51  ;;  %v1171_v8 = vshll.u32 %v5486_v36, 16  ;;  %v4708_v23 = vld [vmem:[%s7429_s1 + $0x314] sm:$0xf] }
  0xbf   : > { %1672 = vmatmul.bf16.gmra.mxu1 %v5990_v17  ;;  %7485 = vst [vmem:[#allocation5_spill] sm:$0xff] %v6039_v16  ;;  %v3734_v58 = vor.u32 %v4678_v14, %v3731_v43  ;;  %v3795_v45 = vld [vmem:[%s7429_s1 + $0x2a8] sm:$0xf0]  ;;  %v1132_v0 = vor.u32 %v1131_v9, %v1128_v7  ;;  %v3851_v51 = vld [vmem:[%s7429_s1 + $0x318] sm:$0xf0]  ;;  %v1159_v10 = vrot.slane %v1157_v20, 5  ;;  %v7488_v20 = vunpack.c.h.b16 %v6035_v48 }
  0xc0   : > { %1701 = vmatmul.bf16.gmra.mxu2 %v6006_v40  ;;  %v3798_v53 = vor.u32 %v4694_v1, %v3795_v45  ;;  %v230_v9 = vld [vmem:[%s5164_s11 + $0xd0] sm:$0x11]  ;;  %v3915_v14 = vld [vmem:[%s7429_s1 + $0x398] sm:$0xf0]  ;;  %v1142_v1 = vrot.slane %v1140_v12, 4  ;;  %v1173_v7 = vrot.slane %v1171_v8, 5 }
  0xc1   : > { %1730 = vmatmul.bf16.gmra.mxu3 %v6027_v55  ;;  %1751 = vmatpush.bf16.msrb.mxu0 %v3734_v58  ;;  %v232_v58 = vld [vmem:[%s5164_s11 + $0xf0] sm:$0x11]  ;;  %v6085_v45 = vld [vmem:[%s5164_s11 + $0xd8] sm:$0x11]  ;;  %v3918_v41 = vor.u32 %v4724_v56, %v3915_v14  ;;  %v1135_v24 = vshll.u32 %v230_v9, 16  ;;  %v7491_v56 = vunpack.c.l.b16 %v6056_v2 }
  0xc2   : > { %1780 = vmatpush.bf16.msrb.mxu1 %v3798_v53  ;;  %v233_v43 = vld [vmem:[%s5164_s11 + $0xf8] sm:$0x11]  ;;  %v1170_v53 = vrot.slane %v1168_v18, 4  ;;  %v4676_v50 = vld [vmem:[%s7429_s1 + $0x214] sm:$0xf] }
  0xc3   : > { %v778_v52 = vpop.f32.mrf.mxu2  ;;  %v722_v38 = vpop.f32.mrf.mxu0  ;;  %1839 = vmatpush.bf16.msrb.mxu3 %v3918_v41  ;;  %v3723_v41 = vld [vmem:[%s7429_s1 + $0x218] sm:$0xf0] }
  0xc4   : > { %v779_v62 = vadd.f32 %v778_v52, %v750_v63  ;;  %v751_v47 = vpop.f32.mrf.mxu1  ;;  %v3854_v63 = vor.u32 %v4708_v23, %v3851_v51  ;;  %v6087_v23 = vrot.slane %v1132_v0, 4  ;;  %v1156_v51 = vrot.slane %v1154_v42, 4 }
  0xc5   : > { %v752_v44 = vadd.f32 %v751_v47, %v722_v38  ;;  %v807_v47 = vpop.f32.mrf.mxu3  ;;  %v1163_v52 = vshll.u32 %v232_v58, 16  ;;  %v1149_v38 = vshll.u32 %v6085_v45, 16  ;;  %v7487_v0 = vunpack.c.l.b16 %v6039_v16 }
  0xc6   : > { %1810 = vmatpush.bf16.msrb.mxu2 %v3854_v63  ;;  %v6089_v4 = vadd.f32 %v807_v47, %v779_v62  ;;  %v7489_v62 = vunpack.c.h.b16 %v6039_v16  ;;  %v7490_v63 = vunpack.c.l.b16 %v6052_v29  ;;  %v1160_v45 = vor.u32 %v1159_v10, %v1156_v51  ;;  %v4722_v10 = vld [vmem:[%s7429_s1 + $0x384] sm:$0xf]  ;;  %v3907_v51 = vld [vmem:[%s7429_s1 + $0x388] sm:$0xf0] }
  0xc7   : > { %v6097_v42 = vpack.c.b16 %v7487_v0, %v7486_v19  ;;  %v4692_v19 = vld [vmem:[%s7429_s1 + $0x294] sm:$0xf]  ;;  %v3726_v47 = vor.u32 %v4676_v50, %v3723_v41  ;;  %v3787_v0 = vld [vmem:[%s7429_s1 + $0x298] sm:$0xf0]  ;;  %v1174_v41 = vor.u32 %v1173_v7, %v1170_v53  ;;  %v1177_v58 = vshll.u32 %v233_v43, 16 }
  0xc8   : > { %v6103_v9 = vpack.c.b16 %v7489_v62, %v7488_v20  ;;  %v6119_v14 = vpack.c.b16 %v7491_v56, %v7490_v63  ;;  %v4706_v20 = vld [vmem:[%s7429_s1 + $0x304] sm:$0xf]  ;;  %v3843_v62 = vld [vmem:[%s7429_s1 + $0x308] sm:$0xf0]  ;;  %v1146_v63 = vor.u32 %v1145_v26, %v1142_v1  ;;  %v3790_v56 = vor.u32 %v4692_v19, %v3787_v0 }
  0xc9   : > { %v3846_v48 = vor.u32 %v4706_v20, %v3843_v62  ;;  %1752 = vmatpush.bf16.msrb.mxu0 %v3726_v47  ;;  %v3910_v39 = vor.u32 %v4722_v10, %v3907_v51  ;;  %v3715_v26 = vld [vmem:[%s7429_s1 + $0x208] sm:$0xf0]  ;;  %v4690_v1 = vld [vmem:[%s7429_s1 + $0x284] sm:$0xf]  ;;  %v1137_v7 = vrot.slane %v1135_v24, 5  ;;  %v1161_v43 = vrot.slane %v1160_v45, 4 }
  0xca   : > { %1781 = vmatpush.bf16.msrb.mxu1 %v3790_v56  ;;  %v1165_v53 = vrot.slane %v1163_v52, 5  ;;  %v7492_v47 = vunpack.c.h.b16 %v6052_v29  ;;  %v7493_v0 = vunpack.c.h.b16 %v6056_v2  ;;  %v1147_v45 = vrot.slane %v1146_v63, 4 }
  0xcb   : > { %v780_v18 = vpop.f32.mrf.mxu2  ;;  %v725_v8 = vpop.f32.mrf.mxu0  ;;  %1811 = vmatpush.bf16.msrb.mxu2 %v3846_v48  ;;  %1840 = vmatpush.bf16.msrb.mxu3 %v3910_v39  ;;  %v1151_v52 = vrot.slane %v1149_v38, 5  ;;  %v1175_v48 = vrot.slane %v1174_v41, 4  ;;  %v1179_v62 = vrot.slane %v1177_v58, 5  ;;  %v4217_v38 = vld [vmem:[%s7429_s1 + $0x570] sm:$0xf] }
  0xcc   : > { %v781_v12 = vadd.f32 %v780_v18, %v752_v44  ;;  %v754_v16 = vpop.f32.mrf.mxu1  ;;  %v4674_v44 = vld [vmem:[%s7429_s1 + $0x204] sm:$0xf]  ;;  %v3779_v18 = vld [vmem:[%s7429_s1 + $0x288] sm:$0xf0]  ;;  %v6158_v20 = vpack.c.b16 %v7493_v0, %v7492_v47  ;;  %v6167_v51 = vsel %vm5738_vm2, %v1161_v43, %v1165_v53  ;;  %v4785_v58 = vld [vmem:[%s7429_s1 + $0x574] sm:$0xf0] }
  0xcd   : > { %v755_v50 = vadd.f32 %v754_v16, %v725_v8  ;;  %v809_v16 = vpop.f32.mrf.mxu3  ;;  %v3718_v19 = vor.u32 %v4674_v44, %v3715_v26  ;;  %v3782_v24 = vor.u32 %v4690_v1, %v3779_v18  ;;  %7494 = vst [vmem:[#allocation6_spill] sm:$0xff] %v6167_v51  ;;  %v6181_v44 = vsel %vm5738_vm2, %v1147_v45, %v1151_v52  ;;  %v4801_v1 = vld [vmem:[%s7429_s1 + $0x5f4] sm:$0xf0]  ;;  %v4089_v52 = vld [vmem:[%s7429_s1 + $0x470] sm:$0xf] }
  0xce   : > { %1648 = vmatmul.bf16.gmra.mxu0 %v6097_v42  ;;  %v6151_v8 = vadd.f32 %v809_v16, %v781_v12  ;;  %v6163_v12 = vsel %vm5738_vm2, %v6087_v23, %v1137_v7  ;;  %v4281_v23 = vld [vmem:[%s7429_s1 + $0x5f0] sm:$0xf]  ;;  %v4218_v26 = vor.u32 %v4785_v58, %v4217_v38  ;;  %v7466_v7 = vunpack.c.l.b16 %v6167_v51 }
  0xcf   : > { %1677 = vmatmul.bf16.gmra.mxu1 %v6103_v9  ;;  %1753 = vmatpush.bf16.msrb.mxu0 %v3718_v19  ;;  %v7468_v16 = vunpack.c.l.b16 %v6163_v12  ;;  %v4282_v43 = vor.u32 %v4801_v1, %v4281_v23  ;;  %v7467_v19 = vunpack.c.h.b16 %v6163_v12  ;;  %v7465_v18 = vunpack.c.h.b16 %v6167_v51  ;;  %v4769_v23 = vld [vmem:[%s7429_s1 + $0x4f4] sm:$0xf0]  ;;  %v4783_v1 = vld [vmem:[%s7429_s1 + $0x564] sm:$0xf0] }
  0xd0   : > { %1706 = vmatmul.bf16.gmra.mxu2 %v6119_v14  ;;  %1782 = vmatpush.bf16.msrb.mxu1 %v3782_v24  ;;  %v7472_v0 = vunpack.c.l.b16 %v6181_v44 }
  0xd1   : > { %1735 = vmatmul.bf16.gmra.mxu3 %v6158_v20  ;;  %2359 = vmatpush.bf16.msra.mxu2 %v4218_v26  ;;  %v6202_v45 = vpack.c.b16 %v7466_v7, %v7468_v16  ;;  %v4209_v26 = vld [vmem:[%s7429_s1 + $0x560] sm:$0xf] }
  0xd2   : > { %2388 = vmatpush.bf16.msra.mxu3 %v4282_v43  ;;  %v4273_v7 = vld [vmem:[%s7429_s1 + $0x5e0] sm:$0xf] }
  0xd3   : > { %v783_v56 = vpop.f32.mrf.mxu2  ;;  %v727_v10 = vpop.f32.mrf.mxu0 }
  0xd4   : > { %v784_v39 = vadd.f32 %v783_v56, %v755_v50  ;;  %v756_v63 = vpop.f32.mrf.mxu1  ;;  %v6185_v50 = vsel %vm5738_vm2, %v1175_v48, %v1179_v62  ;;  %v4753_v48 = vld [vmem:[%s7429_s1 + $0x474] sm:$0xf0]  ;;  %v4153_v62 = vld [vmem:[%s7429_s1 + $0x4f0] sm:$0xf] }
  0xd5   : > { %v757_v41 = vadd.f32 %v756_v63, %v727_v10  ;;  %7495 = vst [vmem:[#allocation7_spill] sm:$0xff] %v6185_v50  ;;  %v812_v53 = vpop.f32.mrf.mxu3  ;;  %v7470_v24 = vunpack.c.l.b16 %v6185_v50  ;;  %v7471_v63 = vunpack.c.h.b16 %v6181_v44  ;;  %v7469_v38 = vunpack.c.h.b16 %v6185_v50 }
  0xd6   : > { %v6194_v47 = vadd.f32 %v812_v53, %v784_v39  ;;  %v6217_v39 = vpack.c.b16 %v7465_v18, %v7467_v19  ;;  %v4090_v58 = vor.u32 %v4753_v48, %v4089_v52  ;;  %v4154_v52 = vor.u32 %v4769_v23, %v4153_v62  ;;  %v4799_v19 = vld [vmem:[%s7429_s1 + $0x5e4] sm:$0xf0] }
  0xd7   : > { %v6234_v18 = vpack.c.b16 %v7470_v24, %v7472_v0  ;;  %v4210_v48 = vor.u32 %v4783_v1, %v4209_v26  ;;  %v6251_v23 = vpack.c.b16 %v7469_v38, %v7471_v63  ;;  %v4073_v24 = vld [vmem:[%s7429_s1 + $0x450] sm:$0xf] }
  0xd8   : > { %2301 = vmatpush.bf16.msra.mxu0 %v4090_v58  ;;  %2330 = vmatpush.bf16.msra.mxu1 %v4154_v52 }
  0xd9   : > { %2360 = vmatpush.bf16.msra.mxu2 %v4210_v48 }
  0xdb   : > { %v785_v56 = vpop.f32.mrf.mxu2  ;;  %v730_v10 = vpop.f32.mrf.mxu0 }
  0xdc   : > { %v786_v43 = vadd.f32 %v785_v56, %v757_v41  ;;  %v759_v53 = vpop.f32.mrf.mxu1  ;;  %v4274_v41 = vor.u32 %v4799_v19, %v4273_v7  ;;  %v4081_v7 = vld [vmem:[%s7429_s1 + $0x460] sm:$0xf]  ;;  %v4751_v19 = vld [vmem:[%s7429_s1 + $0x464] sm:$0xf0] }
  0xdd   : > { %v760_v16 = vadd.f32 %v759_v53, %v730_v10  ;;  %v814_v56 = vpop.f32.mrf.mxu3  ;;  %v4145_v10 = vld [vmem:[%s7429_s1 + $0x4e0] sm:$0xf]  ;;  %v4082_v1 = vor.u32 %v4751_v19, %v4081_v7  ;;  %v4265_v7 = vld [vmem:[%s7429_s1 + $0x5d0] sm:$0xf] }
  0xde   : > { %1653 = vmatmul.bf16.gmra.mxu0 %v6202_v45  ;;  %v6244_v62 = vadd.f32 %v814_v56, %v786_v43  ;;  %2389 = vmatpush.bf16.msra.mxu3 %v4274_v41  ;;  %v4767_v43 = vld [vmem:[%s7429_s1 + $0x4e4] sm:$0xf0]  ;;  %v4201_v41 = vld [vmem:[%s7429_s1 + $0x550] sm:$0xf]  ;;  %v4781_v56 = vld [vmem:[%s7429_s1 + $0x554] sm:$0xf0] }
  0xdf   : > { %1682 = vmatmul.bf16.gmra.mxu1 %v6217_v39  ;;  %v4146_v48 = vor.u32 %v4767_v43, %v4145_v10  ;;  %2302 = vmatpush.bf16.msra.mxu0 %v4082_v1  ;;  %v4202_v38 = vor.u32 %v4781_v56, %v4201_v41  ;;  %v4137_v1 = vld [vmem:[%s7429_s1 + $0x4d0] sm:$0xf]  ;;  %v4779_v56 = vld [vmem:[%s7429_s1 + $0x544] sm:$0xf0] }
  0xe0   : > { %1711 = vmatmul.bf16.gmra.mxu2 %v6234_v18 }
  0xe1   : > { %1740 = vmatmul.bf16.gmra.mxu3 %v6251_v23  ;;  %2331 = vmatpush.bf16.msra.mxu1 %v4146_v48 }
  0xe2   : > { %2361 = vmatpush.bf16.msra.mxu2 %v4202_v38  ;;  %v4765_v38 = vld [vmem:[%s7429_s1 + $0x4d4] sm:$0xf0] }
  0xe3   : > { %v788_v58 = vpop.f32.mrf.mxu2  ;;  %v732_v26 = vpop.f32.mrf.mxu0 }
  0xe4   : > { %v789_v53 = vadd.f32 %v788_v58, %v760_v16  ;;  %v761_v52 = vpop.f32.mrf.mxu1  ;;  %v4797_v16 = vld [vmem:[%s7429_s1 + $0x5d4] sm:$0xf0] }
  0xe5   : > { %v762_v19 = vadd.f32 %v761_v52, %v732_v26  ;;  %v4266_v10 = vor.u32 %v4797_v16, %v4265_v7  ;;  %v817_v58 = vpop.f32.mrf.mxu3  ;;  %v4749_v26 = vld [vmem:[%s7429_s1 + $0x454] sm:$0xf0] }
  0xe6   : > { %v6278_v43 = vadd.f32 %v817_v58, %v789_v53  ;;  %v4074_v41 = vor.u32 %v4749_v26, %v4073_v24  ;;  %v4193_v53 = vld [vmem:[%s7429_s1 + $0x540] sm:$0xf]  ;;  %v4795_v26 = vld [vmem:[%s7429_s1 + $0x5c4] sm:$0xf0] }
  0xe7   : > { %2390 = vmatpush.bf16.msra.mxu3 %v4266_v10  ;;  %v4138_v10 = vor.u32 %v4765_v38, %v4137_v1  ;;  %v4194_v58 = vor.u32 %v4779_v56, %v4193_v53  ;;  %v4257_v24 = vld [vmem:[%s7429_s1 + $0x5c0] sm:$0xf]  ;;  %v4185_v53 = vld [vmem:[%s7429_s1 + $0x530] sm:$0xf]  ;;  %v4777_v56 = vld [vmem:[%s7429_s1 + $0x534] sm:$0xf0] }
  0xe8   : > { %2303 = vmatpush.bf16.msra.mxu0 %v4074_v41  ;;  %v4258_v0 = vor.u32 %v4795_v26, %v4257_v24  ;;  %v4065_v1 = vld [vmem:[%s7429_s1 + $0x440] sm:$0xf]  ;;  %v4057_v26 = vld [vmem:[%s7429_s1 + $0x430] sm:$0xf] }
  0xe9   : > { %2332 = vmatpush.bf16.msra.mxu1 %v4138_v10  ;;  %2362 = vmatpush.bf16.msra.mxu2 %v4194_v58  ;;  %v4186_v10 = vor.u32 %v4777_v56, %v4185_v53 }
  0xeb   : > { %v790_v52 = vpop.f32.mrf.mxu2  ;;  %v831_v48 = vpop.f32.mrf.mxu0  ;;  %2391 = vmatpush.bf16.msra.mxu3 %v4258_v0 }
  0xec   : > { %v791_v7 = vadd.f32 %v790_v52, %v762_v19  ;;  %v860_v16 = vpop.f32.mrf.mxu1  ;;  %v4747_v52 = vld [vmem:[%s7429_s1 + $0x444] sm:$0xf0] }
  0xed   : > { %v861_v63 = vadd.f32 %v860_v16, %v831_v48  ;;  %v819_v50 = vpop.f32.mrf.mxu3  ;;  %v4066_v41 = vor.u32 %v4747_v52, %v4065_v1  ;;  %2363 = vmatpush.bf16.msra.mxu2 %v4186_v10  ;;  %v4745_v1 = vld [vmem:[%s7429_s1 + $0x434] sm:$0xf0]  ;;  %v4121_v52 = vld [vmem:[%s7429_s1 + $0x4b0] sm:$0xf]  ;;  %v4791_v10 = vld [vmem:[%s7429_s1 + $0x5a4] sm:$0xf0] }
  0xee   : > { %1754 = vmatmul.bf16.vlgmr.msrb.gmra.mxu0 %v5760_v54  ;;  %v6306_v19 = vadd.f32 %v819_v50, %v791_v7  ;;  %v4129_v54 = vld [vmem:[%s7429_s1 + $0x4c0] sm:$0xf]  ;;  %v4249_v7 = vld [vmem:[%s7429_s1 + $0x5b0] sm:$0xf] }
  0xef   : > { %1783 = vmatmul.bf16.vlgmr.msrb.gmra.mxu1 %v5764_v21  ;;  %2304 = vmatpush.bf16.msra.mxu0 %v4066_v41  ;;  %v4761_v41 = vld [vmem:[%s7429_s1 + $0x4b4] sm:$0xf0] }
  0xf0   : > { %1812 = vmatmul.bf16.vlgmr.msrb.gmra.mxu2 %v5771_v57  ;;  %v4763_v57 = vld [vmem:[%s7429_s1 + $0x4c4] sm:$0xf0]  ;;  %v4122_v53 = vor.u32 %v4761_v41, %v4121_v52 }
  0xf1   : > { %1841 = vmatmul.bf16.vlgmr.msrb.gmra.mxu3 %v5786_v3  ;;  %v4130_v38 = vor.u32 %v4763_v57, %v4129_v54  ;;  %v4793_v3 = vld [vmem:[%s7429_s1 + $0x5b4] sm:$0xf0]  ;;  %v4177_v57 = vld [vmem:[%s7429_s1 + $0x520] sm:$0xf] }
  0xf3   : > { %v889_v48 = vpop.f32.mrf.mxu2  ;;  %v833_v21 = vpop.f32.mrf.mxu0  ;;  %2333 = vmatpush.bf16.msra.mxu1 %v4130_v38 }
  0xf4   : > { %v890_v50 = vadd.f32 %v889_v48, %v861_v63  ;;  %v862_v0 = vpop.f32.mrf.mxu1  ;;  %v4250_v63 = vor.u32 %v4793_v3, %v4249_v7  ;;  %v4241_v7 = vld [vmem:[%s7429_s1 + $0x5a0] sm:$0xf] }
  0xf5   : > { %v863_v16 = vadd.f32 %v862_v0, %v833_v21  ;;  %v918_v58 = vpop.f32.mrf.mxu3  ;;  %v4058_v21 = vor.u32 %v4745_v1, %v4057_v26  ;;  %v4049_v26 = vld [vmem:[%s7429_s1 + $0x420] sm:$0xf]  ;;  %v4743_v1 = vld [vmem:[%s7429_s1 + $0x424] sm:$0xf0] }
  0xf6   : > { %v6334_v24 = vadd.f32 %v918_v58, %v890_v50  ;;  %2392 = vmatpush.bf16.msra.mxu3 %v4250_v63  ;;  %v4775_v50 = vld [vmem:[%s7429_s1 + $0x524] sm:$0xf0]  ;;  %v4242_v63 = vor.u32 %v4791_v10, %v4241_v7 }
  0xf7   : > { %v4178_v56 = vor.u32 %v4775_v50, %v4177_v57  ;;  %2305 = vmatpush.bf16.msra.mxu0 %v4058_v21  ;;  %2334 = vmatpush.bf16.msra.mxu1 %v4122_v53  ;;  %v4169_v57 = vld [vmem:[%s7429_s1 + $0x510] sm:$0xf]  ;;  %v4773_v50 = vld [vmem:[%s7429_s1 + $0x514] sm:$0xf0] }
  0xf8   : > { %v4170_v53 = vor.u32 %v4773_v50, %v4169_v57  ;;  %v4225_v57 = vld [vmem:[%s7429_s1 + $0x580] sm:$0xf]  ;;  %v4787_v50 = vld [vmem:[%s7429_s1 + $0x584] sm:$0xf0] }
  0xf9   : > { %2364 = vmatpush.bf16.msra.mxu2 %v4178_v56 }
  0xfa   : > { %2393 = vmatpush.bf16.msra.mxu3 %v4242_v63  ;;  %v4741_v63 = vld [vmem:[%s7429_s1 + $0x414] sm:$0xf0] }
  0xfb   : > { %v891_v54 = vpop.f32.mrf.mxu2  ;;  %v836_v48 = vpop.f32.mrf.mxu0 }
  0xfc   : > { %v892_v0 = vadd.f32 %v891_v54, %v863_v16  ;;  %v865_v38 = vpop.f32.mrf.mxu1  ;;  %v4050_v54 = vor.u32 %v4743_v1, %v4049_v26 }
  0xfd   : > { %v866_v3 = vadd.f32 %v865_v38, %v836_v48  ;;  %v920_v58 = vpop.f32.mrf.mxu3  ;;  %2365 = vmatpush.bf16.msra.mxu2 %v4170_v53  ;;  %v4226_v53 = vor.u32 %v4787_v50, %v4225_v57  ;;  %v4752_v57 = vld [vmem:[%s7429_s1 + $0x474] sm:$0xf]  ;;  %v4091_v50 = vld [vmem:[%s7429_s1 + $0x478] sm:$0xf0] }
  0xfe   : > { %1759 = vmatmul.bf16.gmra.mxu0 %v5975_v61  ;;  %v6362_v16 = vadd.f32 %v920_v58, %v892_v0  ;;  %v4113_v61 = vld [vmem:[%s7429_s1 + $0x4a0] sm:$0xf]  ;;  %v4233_v0 = vld [vmem:[%s7429_s1 + $0x590] sm:$0xf] }
  0xff   : > { %1788 = vmatmul.bf16.gmra.mxu1 %v5990_v17  ;;  %2306 = vmatpush.bf16.msra.mxu0 %v4050_v54  ;;  %v4105_v58 = vld [vmem:[%s7429_s1 + $0x490] sm:$0xf]  ;;  %v4771_v54 = vld [vmem:[%s7429_s1 + $0x504] sm:$0xf0] }
 0x100   : > { %1817 = vmatmul.bf16.gmra.mxu2 %v6006_v40  ;;  %v4759_v40 = vld [vmem:[%s7429_s1 + $0x4a4] sm:$0xf0] }
 0x101   : > { %1846 = vmatmul.bf16.gmra.mxu3 %v6027_v55  ;;  %v4114_v41 = vor.u32 %v4759_v40, %v4113_v61  ;;  %v4789_v55 = vld [vmem:[%s7429_s1 + $0x594] sm:$0xf0] }
 0x102   : > { %v4234_v56 = vor.u32 %v4789_v55, %v4233_v0  ;;  %v4739_v55 = vld [vmem:[%s7429_s1 + $0x404] sm:$0xf0] }
 0x103   : > { %v894_v52 = vpop.f32.mrf.mxu2  ;;  %v838_v17 = vpop.f32.mrf.mxu0  ;;  %2335 = vmatpush.bf16.msra.mxu1 %v4114_v41 }
 0x104   : > { %v895_v48 = vadd.f32 %v894_v52, %v866_v3  ;;  %v867_v21 = vpop.f32.mrf.mxu1  ;;  %2394 = vmatpush.bf16.msra.mxu3 %v4234_v56  ;;  %v4041_v3 = vld [vmem:[%s7429_s1 + $0x410] sm:$0xf]  ;;  %v4757_v52 = vld [vmem:[%s7429_s1 + $0x494] sm:$0xf0]  ;;  %v4097_v56 = vld [vmem:[%s7429_s1 + $0x480] sm:$0xf] }
 0x105   : > { %v868_v38 = vadd.f32 %v867_v21, %v838_v17  ;;  %v923_v7 = vpop.f32.mrf.mxu3  ;;  %v4042_v61 = vor.u32 %v4741_v63, %v4041_v3  ;;  %v4161_v17 = vld [vmem:[%s7429_s1 + $0x500] sm:$0xf]  ;;  %v4106_v21 = vor.u32 %v4757_v52, %v4105_v58  ;;  %v4784_v52 = vld [vmem:[%s7429_s1 + $0x574] sm:$0xf] }
 0x106   : > { %v6390_v10 = vadd.f32 %v923_v7, %v895_v48  ;;  %v4162_v41 = vor.u32 %v4771_v54, %v4161_v17  ;;  %v4219_v17 = vld [vmem:[%s7429_s1 + $0x578] sm:$0xf0] }
 0x107   : > { %2307 = vmatpush.bf16.msra.mxu0 %v4042_v61  ;;  %2336 = vmatpush.bf16.msra.mxu1 %v4106_v21 }
 0x108   : > { %2366 = vmatpush.bf16.msra.mxu2 %v4162_v41  ;;  %2395 = vmatpush.bf16.msra.mxu3 %v4226_v53 }
 0x10b   : > { %v896_v26 = vpop.f32.mrf.mxu2  ;;  %v841_v1 = vpop.f32.mrf.mxu0 }
 0x10c   : > { %v897_v40 = vadd.f32 %v896_v26, %v868_v38  ;;  %v870_v48 = vpop.f32.mrf.mxu1  ;;  %v4033_v38 = vld [vmem:[%s7429_s1 + $0x400] sm:$0xf] }
 0x10d   : > { %v871_v0 = vadd.f32 %v870_v48, %v841_v1  ;;  %v925_v7 = vpop.f32.mrf.mxu3  ;;  %v4034_v3 = vor.u32 %v4739_v55, %v4033_v38  ;;  %v4094_v55 = vor.u32 %v4752_v57, %v4091_v50 }
 0x10e   : > { %1764 = vmatmul.bf16.gmra.mxu0 %v6097_v42  ;;  %v4755_v42 = vld [vmem:[%s7429_s1 + $0x484] sm:$0xf0]  ;;  %v6430_v63 = vadd.f32 %v925_v7, %v897_v40  ;;  %v4222_v40 = vor.u32 %v4784_v52, %v4219_v17  ;;  %v4782_v7 = vld [vmem:[%s7429_s1 + $0x564] sm:$0xf] }
 0x10f   : > { %1793 = vmatmul.bf16.gmra.mxu1 %v6103_v9  ;;  %v4098_v58 = vor.u32 %v4755_v42, %v4097_v56  ;;  %2308 = vmatpush.bf16.msra.mxu0 %v4034_v3  ;;  %v4155_v56 = vld [vmem:[%s7429_s1 + $0x4f8] sm:$0xf0]  ;;  %v4211_v3 = vld [vmem:[%s7429_s1 + $0x568] sm:$0xf0] }
 0x110   : > { %1822 = vmatmul.bf16.gmra.mxu2 %v6119_v14  ;;  %v4800_v14 = vld [vmem:[%s7429_s1 + $0x5f4] sm:$0xf] }
 0x111   : > { %2337 = vmatpush.bf16.msra.mxu1 %v4098_v58  ;;  %1851 = vmatmul.bf16.gmra.mxu3 %v6158_v20  ;;  %v4283_v20 = vld [vmem:[%s7429_s1 + $0x5f8] sm:$0xf0] }
 0x112   : > { %v4286_v48 = vor.u32 %v4800_v14, %v4283_v20  ;;  %2475 = vmatpush.bf16.msrb.mxu2 %v4222_v40  ;;  %v4750_v40 = vld [vmem:[%s7429_s1 + $0x464] sm:$0xf]  ;;  %v4083_v20 = vld [vmem:[%s7429_s1 + $0x468] sm:$0xf0] }
 0x113   : > { %v899_v26 = vpop.f32.mrf.mxu2  ;;  %v843_v1 = vpop.f32.mrf.mxu0  ;;  %2417 = vmatpush.bf16.msrb.mxu0 %v4094_v55  ;;  %v4796_v55 = vld [vmem:[%s7429_s1 + $0x5d4] sm:$0xf] }
 0x114   : > { %v900_v61 = vadd.f32 %v899_v26, %v871_v0  ;;  %v872_v9 = vpop.f32.mrf.mxu1  ;;  %2504 = vmatpush.bf16.msrb.mxu3 %v4286_v48  ;;  %v4768_v0 = vld [vmem:[%s7429_s1 + $0x4f4] sm:$0xf] }
 0x115   : > { %v873_v54 = vadd.f32 %v872_v9, %v843_v1  ;;  %v928_v21 = vpop.f32.mrf.mxu3  ;;  %v4158_v26 = vor.u32 %v4768_v0, %v4155_v56  ;;  %v4214_v1 = vor.u32 %v4782_v7, %v4211_v3  ;;  %v4275_v9 = vld [vmem:[%s7429_s1 + $0x5e8] sm:$0xf0] }
 0x116   : > { %v6446_v41 = vadd.f32 %v928_v21, %v900_v61  ;;  %v4798_v61 = vld [vmem:[%s7429_s1 + $0x5e4] sm:$0xf]  ;;  %v4086_v21 = vor.u32 %v4750_v40, %v4083_v20  ;;  %v4195_v20 = vld [vmem:[%s7429_s1 + $0x548] sm:$0xf0] }
 0x117   : > { %v4278_v17 = vor.u32 %v4798_v61, %v4275_v9  ;;  %2446 = vmatpush.bf16.msrb.mxu1 %v4158_v26  ;;  %2476 = vmatpush.bf16.msrb.mxu2 %v4214_v1  ;;  %v4748_v26 = vld [vmem:[%s7429_s1 + $0x454] sm:$0xf]  ;;  %v4075_v1 = vld [vmem:[%s7429_s1 + $0x458] sm:$0xf0]  ;;  %v4778_v40 = vld [vmem:[%s7429_s1 + $0x544] sm:$0xf] }
 0x118   : > { %2418 = vmatpush.bf16.msrb.mxu0 %v4086_v21  ;;  %v4764_v61 = vld [vmem:[%s7429_s1 + $0x4d4] sm:$0xf]  ;;  %v4198_v21 = vor.u32 %v4778_v40, %v4195_v20  ;;  %v4187_v40 = vld [vmem:[%s7429_s1 + $0x538] sm:$0xf0] }
 0x119   : > { %2505 = vmatpush.bf16.msrb.mxu3 %v4278_v17  ;;  %v4078_v17 = vor.u32 %v4748_v26, %v4075_v1  ;;  %v4792_v20 = vld [vmem:[%s7429_s1 + $0x5b4] sm:$0xf] }
 0x11b   : > { %v901_v53 = vpop.f32.mrf.mxu2  ;;  %v846_v38 = vpop.f32.mrf.mxu0 }
 0x11c   : > { %v902_v42 = vadd.f32 %v901_v53, %v873_v54  ;;  %v875_v58 = vpop.f32.mrf.mxu1  ;;  %v4780_v53 = vld [vmem:[%s7429_s1 + $0x554] sm:$0xf]  ;;  %2419 = vmatpush.bf16.msrb.mxu0 %v4078_v17 }
 0x11d   : > { %v876_v52 = vadd.f32 %v875_v58, %v846_v38  ;;  %v930_v14 = vpop.f32.mrf.mxu3  ;;  %v4203_v38 = vld [vmem:[%s7429_s1 + $0x558] sm:$0xf0] }
 0x11e   : > { %1769 = vmatmul.bf16.gmra.mxu0 %v6202_v45  ;;  %v6474_v54 = vadd.f32 %v930_v14, %v902_v42  ;;  %v4766_v45 = vld [vmem:[%s7429_s1 + $0x4e4] sm:$0xf]  ;;  %v4206_v7 = vor.u32 %v4780_v53, %v4203_v38  ;;  %v4139_v14 = vld [vmem:[%s7429_s1 + $0x4d8] sm:$0xf0]  ;;  %v6533_v38 = vld [vmem:[%s7430_s2] sm:$0x3] }
 0x11f   : > { %1798 = vmatmul.bf16.gmra.mxu1 %v6217_v39 }
 0x120   : > { %1827 = vmatmul.bf16.gmra.mxu2 %v6234_v18  ;;  %v4147_v18 = vld [vmem:[%s7429_s1 + $0x4e8] sm:$0xf0] }
 0x121   : > { %1856 = vmatmul.bf16.gmra.mxu3 %v6251_v23  ;;  %v4150_v0 = vor.u32 %v4766_v45, %v4147_v18  ;;  %v4267_v23 = vld [vmem:[%s7429_s1 + $0x5d8] sm:$0xf0]  ;;  %2477 = vmatpush.bf16.msrb.mxu2 %v4206_v7  ;;  %v4794_v18 = vld [vmem:[%s7429_s1 + $0x5c4] sm:$0xf]  ;;  %v4067_v7 = vld [vmem:[%s7429_s1 + $0x448] sm:$0xf0] }
 0x122   : > { %v4270_v3 = vor.u32 %v4796_v55, %v4267_v23  ;;  %v4762_v23 = vld [vmem:[%s7429_s1 + $0x4c4] sm:$0xf] }
 0x123   : > { %v904_v48 = vpop.f32.mrf.mxu2  ;;  %v848_v39 = vpop.f32.mrf.mxu0  ;;  %2447 = vmatpush.bf16.msrb.mxu1 %v4150_v0 }
 0x124   : > { %v905_v57 = vadd.f32 %v904_v48, %v876_v52  ;;  %v877_v50 = vpop.f32.mrf.mxu1  ;;  %2506 = vmatpush.bf16.msrb.mxu3 %v4270_v3  ;;  %v6548_v3 = vperm.slane %v6533_v38, 0 }
 0x125   : > { %v878_v56 = vadd.f32 %v877_v50, %v848_v39  ;;  %v933_v42 = vpop.f32.mrf.mxu3  ;;  %v4142_v39 = vor.u32 %v4764_v61, %v4139_v14  ;;  %2478 = vmatpush.bf16.msrb.mxu2 %v4198_v21  ;;  %v4131_v61 = vld [vmem:[%s7429_s1 + $0x4c8] sm:$0xf0]  ;;  %v4776_v14 = vld [vmem:[%s7429_s1 + $0x534] sm:$0xf] }
 0x126   : > { %v6502_v58 = vadd.f32 %v933_v42, %v905_v57  ;;  %v4259_v57 = vld [vmem:[%s7429_s1 + $0x5c8] sm:$0xf0]  ;;  %v4134_v17 = vor.u32 %v4762_v23, %v4131_v61  ;;  %v4744_v23 = vld [vmem:[%s7429_s1 + $0x434] sm:$0xf]  ;;  %v7498_v61 = vunpack.c.h.b16 %v5244_v11 }
 0x127   : > { %v4262_v0 = vor.u32 %v4794_v18, %v4259_v57  ;;  %2448 = vmatpush.bf16.msrb.mxu1 %v4142_v39  ;;  %v4251_v39 = vld [vmem:[%s7429_s1 + $0x5b8] sm:$0xf0]  ;;  %v938_v57 = vadd.f32 %v5967_v31, %v6548_v3  ;;  %v4760_v31 = vld [vmem:[%s7429_s1 + $0x4b4] sm:$0xf] }
 0x128   : > { %v4254_v21 = vor.u32 %v4792_v20, %v4251_v39  ;;  %v4179_v20 = vld [vmem:[%s7429_s1 + $0x528] sm:$0xf0] }
 0x129   : > { %2507 = vmatpush.bf16.msrb.mxu3 %v4262_v0 }
 0x12b   : > { %v906_v9 = vpop.f32.mrf.mxu2  ;;  %v1639_v52 = vpop.f32.mrf.mxu0  ;;  %2449 = vmatpush.bf16.msrb.mxu1 %v4134_v17 }
 0x12c   : > { %v907_v45 = vadd.f32 %v906_v9, %v878_v56  ;;  %v1668_v48 = vpop.f32.mrf.mxu1  ;;  %v4746_v56 = vld [vmem:[%s7429_s1 + $0x444] sm:$0xf] }
 0x12d   : > { %v1669_v50 = vadd.f32 %v1668_v48, %v1639_v52  ;;  %v935_v53 = vpop.f32.mrf.mxu3  ;;  %v4070_v1 = vor.u32 %v4746_v56, %v4067_v7  ;;  %v4190_v48 = vor.u32 %v4776_v14, %v4187_v40  ;;  %2508 = vmatpush.bf16.msrb.mxu3 %v4254_v21  ;;  %v7497_v56 = vunpack.c.l.b16 %v5381_v25  ;;  %v4123_v14 = vld [vmem:[%s7429_s1 + $0x4b8] sm:$0xf0]  ;;  %v4774_v40 = vld [vmem:[%s7429_s1 + $0x524] sm:$0xf] }
 0x12e   : > { %2309 = vmatmul.bf16.vlgmr.msra.gmra.mxu0 %v5249_v13  ;;  %v6535_v55 = vadd.f32 %v935_v53, %v907_v45  ;;  %v7496_v53 = vunpack.c.l.b16 %v5244_v11  ;;  %v7500_v11 = vunpack.c.l.b16 %v5253_v15 }
 0x12f   : > { %2338 = vmatmul.bf16.vlgmr.msra.gmra.mxu1 %v5272_v22  ;;  %2420 = vmatpush.bf16.msrb.mxu0 %v4070_v1 }
 0x130   : > { %2367 = vmatmul.bf16.vlgmr.msra.gmra.mxu2 %v5284_v27  ;;  %v6574_v7 = vpack.c.b16 %v7497_v56, %v7496_v53  ;;  %v4243_v53 = vld [vmem:[%s7429_s1 + $0x5a8] sm:$0xf0] }
 0x131   : > { %2396 = vmatmul.bf16.vlgmr.msra.gmra.mxu3 %v5310_v46  ;;  %2479 = vmatpush.bf16.msrb.mxu2 %v4190_v48 }
 0x133   : > { %v1697_v42 = vpop.f32.mrf.mxu2  ;;  %v1641_v26 = vpop.f32.mrf.mxu0 }
 0x134   : > { %v1698_v9 = vadd.f32 %v1697_v42, %v1669_v50  ;;  %v1670_v52 = vpop.f32.mrf.mxu1  ;;  %v4059_v42 = vld [vmem:[%s7429_s1 + $0x438] sm:$0xf0] }
 0x135   : > { %v1671_v45 = vadd.f32 %v1670_v52, %v1641_v26  ;;  %v1726_v18 = vpop.f32.mrf.mxu3  ;;  %v4062_v17 = vor.u32 %v4744_v23, %v4059_v42  ;;  %v940_v42 = vadd.f32 %v6020_v59, %v6548_v3  ;;  %v4051_v59 = vld [vmem:[%s7429_s1 + $0x428] sm:$0xf0] }
 0x136   : > { %v1727_v50 = vadd.f32 %v1726_v18, %v1698_v9  ;;  %v7499_v9 = vunpack.c.h.b16 %v5381_v25  ;;  %v7501_v25 = vunpack.c.l.b16 %v5388_v30  ;;  %v4126_v18 = vor.u32 %v4760_v31, %v4123_v14  ;;  %v4758_v14 = vld [vmem:[%s7429_s1 + $0x4a4] sm:$0xf] }
 0x137   : > { %2421 = vmatpush.bf16.msrb.mxu0 %v4062_v17  ;;  %v4742_v17 = vld [vmem:[%s7429_s1 + $0x424] sm:$0xf] }
 0x138   : > { %v6568_v0 = vadd.f32 %v1727_v50, %v938_v57  ;;  %v6589_v52 = vpack.c.b16 %v7499_v9, %v7498_v61  ;;  %v6604_v21 = vpack.c.b16 %v7501_v25, %v7500_v11  ;;  %v4182_v57 = vor.u32 %v4774_v40, %v4179_v20  ;;  %v4790_v50 = vld [vmem:[%s7429_s1 + $0x5a4] sm:$0xf]  ;;  %2450 = vmatpush.bf16.msrb.mxu1 %v4126_v18  ;;  %v4115_v20 = vld [vmem:[%s7429_s1 + $0x4a8] sm:$0xf0]  ;;  %v4772_v25 = vld [vmem:[%s7429_s1 + $0x514] sm:$0xf] }
 0x139   : > { %v7503_v61 = vunpack.c.h.b16 %v5388_v30  ;;  %v4054_v30 = vor.u32 %v4742_v17, %v4051_v59  ;;  %v4118_v11 = vor.u32 %v4758_v14, %v4115_v20  ;;  %v4171_v18 = vld [vmem:[%s7429_s1 + $0x518] sm:$0xf0]  ;;  %v7505_v17 = vunpack.c.l.b16 %v5477_v33  ;;  %v4740_v14 = vld [vmem:[%s7429_s1 + $0x414] sm:$0xf] }
 0x13a   : > { %2480 = vmatpush.bf16.msrb.mxu2 %v4182_v57  ;;  %v7506_v20 = vunpack.c.h.b16 %v5384_v28 }
 0x13b   : > { %v1699_v26 = vpop.f32.mrf.mxu2  ;;  %v1644_v1 = vpop.f32.mrf.mxu0  ;;  %2422 = vmatpush.bf16.msrb.mxu0 %v4054_v30 }
 0x13c   : > { %v1700_v48 = vadd.f32 %v1699_v26, %v1671_v45  ;;  %v1673_v39 = vpop.f32.mrf.mxu1  ;;  %v4246_v45 = vor.u32 %v4790_v50, %v4243_v53  ;;  %v7502_v26 = vunpack.c.h.b16 %v5253_v15  ;;  %v4174_v50 = vor.u32 %v4772_v25, %v4171_v18  ;;  %v4788_v53 = vld [vmem:[%s7429_s1 + $0x594] sm:$0xf]  ;;  %2451 = vmatpush.bf16.msrb.mxu1 %v4118_v11  ;;  %v4107_v25 = vld [vmem:[%s7429_s1 + $0x498] sm:$0xf0]  ;;  %v4770_v18 = vld [vmem:[%s7429_s1 + $0x504] sm:$0xf] }
 0x13d   : > { %v1674_v56 = vadd.f32 %v1673_v39, %v1644_v1  ;;  %v1728_v23 = vpop.f32.mrf.mxu3 }
 0x13e   : > { %2314 = vmatmul.bf16.gmra.mxu0 %v6574_v7  ;;  %v1729_v31 = vadd.f32 %v1728_v23, %v1700_v48  ;;  %v6621_v1 = vpack.c.b16 %v7503_v61, %v7502_v26  ;;  %2509 = vmatpush.bf16.msrb.mxu3 %v4246_v45  ;;  %v7504_v61 = vunpack.c.l.b16 %v5384_v28  ;;  %v7508_v28 = vunpack.c.l.b16 %v5391_v32 }
 0x13f   : > { %2343 = vmatmul.bf16.gmra.mxu1 %v6589_v52  ;;  %2481 = vmatpush.bf16.msrb.mxu2 %v4174_v50  ;;  %v4163_v50 = vld [vmem:[%s7429_s1 + $0x508] sm:$0xf0] }
 0x140   : > { %2372 = vmatmul.bf16.gmra.mxu2 %v6604_v21  ;;  %v6623_v9 = vadd.f32 %v1729_v31, %v940_v42  ;;  %v942_v42 = vadd.f32 %v6089_v4, %v6548_v3  ;;  %v6658_v59 = vpack.c.b16 %v7505_v17, %v7504_v61  ;;  %v4756_v4 = vld [vmem:[%s7429_s1 + $0x494] sm:$0xf]  ;;  %v4227_v61 = vld [vmem:[%s7429_s1 + $0x588] sm:$0xf0] }
 0x141   : > { %2401 = vmatmul.bf16.gmra.mxu3 %v6621_v1 }
 0x143   : > { %v1702_v15 = vpop.f32.mrf.mxu2  ;;  %v1646_v40 = vpop.f32.mrf.mxu0 }
 0x144   : > { %v1703_v48 = vadd.f32 %v1702_v15, %v1674_v56  ;;  %v1675_v39 = vpop.f32.mrf.mxu1  ;;  %v4235_v56 = vld [vmem:[%s7429_s1 + $0x598] sm:$0xf0] }
 0x145   : > { %v1676_v57 = vadd.f32 %v1675_v39, %v1646_v40  ;;  %v4238_v45 = vor.u32 %v4788_v53, %v4235_v56  ;;  %v1731_v23 = vpop.f32.mrf.mxu3  ;;  %v4043_v15 = vld [vmem:[%s7429_s1 + $0x418] sm:$0xf0] }
 0x146   : > { %v1732_v31 = vadd.f32 %v1731_v23, %v1703_v48  ;;  %v7507_v48 = vunpack.c.h.b16 %v5477_v33  ;;  %v4046_v11 = vor.u32 %v4740_v14, %v4043_v15  ;;  %v7509_v33 = vunpack.c.l.b16 %v5483_v35  ;;  %v4738_v14 = vld [vmem:[%s7429_s1 + $0x404] sm:$0xf]  ;;  %v4035_v15 = vld [vmem:[%s7429_s1 + $0x408] sm:$0xf0] }
 0x147   : > { %2510 = vmatpush.bf16.msrb.mxu3 %v4238_v45  ;;  %v4110_v23 = vor.u32 %v4756_v4, %v4107_v25  ;;  %v4754_v4 = vld [vmem:[%s7429_s1 + $0x484] sm:$0xf]  ;;  %v7510_v25 = vunpack.c.h.b16 %v5391_v32  ;;  %v4537_v32 = vld [vmem:[%s7429_s1 + $0x770] sm:$0xf] }
 0x148   : > { %v6652_v26 = vadd.f32 %v1732_v31, %v942_v42  ;;  %v6673_v39 = vpack.c.b16 %v7507_v48, %v7506_v20  ;;  %v6688_v45 = vpack.c.b16 %v7509_v33, %v7508_v28  ;;  %v4166_v42 = vor.u32 %v4770_v18, %v4163_v50  ;;  %v4786_v31 = vld [vmem:[%s7429_s1 + $0x584] sm:$0xf]  ;;  %2423 = vmatpush.bf16.msrb.mxu0 %v4046_v11  ;;  %v4099_v48 = vld [vmem:[%s7429_s1 + $0x488] sm:$0xf0] }
 0x149   : > { %2452 = vmatpush.bf16.msrb.mxu1 %v4110_v23  ;;  %v4038_v20 = vor.u32 %v4738_v14, %v4035_v15  ;;  %v7511_v18 = vunpack.c.h.b16 %v5483_v35  ;;  %v6722_v23 = vld [vmem:[%s5164_s11 + $0x100] sm:$0xff]  ;;  %v4849_v35 = vld [vmem:[%s7429_s1 + $0x774] sm:$0xf0] }
 0x14a   : > { %2482 = vmatpush.bf16.msrb.mxu2 %v4166_v42  ;;  %v4538_v14 = vor.u32 %v4849_v35, %v4537_v32  ;;  %v1945_v15 = vunpack.c.l.b16 %v6722_v23  ;;  %v7513_v32 = vunpack.c.h.b16 %v5480_v34 }
 0x14b   : > { %v1704_v40 = vpop.f32.mrf.mxu2  ;;  %v1649_v30 = vpop.f32.mrf.mxu0  ;;  %v6717_v50 = vpack.c.b16 %v7511_v18, %v7510_v25  ;;  %v7512_v18 = vunpack.c.l.b16 %v5480_v34  ;;  %v7514_v34 = vunpack.c.l.b16 %v5486_v36 }
 0x14c   : > { %v1705_v53 = vadd.f32 %v1704_v40, %v1676_v57  ;;  %v1678_v56 = vpop.f32.mrf.mxu1  ;;  %v4230_v57 = vor.u32 %v4786_v31, %v4227_v61  ;;  %v944_v40 = vadd.f32 %v6151_v8, %v6548_v3  ;;  %v4102_v8 = vor.u32 %v4754_v4, %v4099_v48  ;;  %2424 = vmatpush.bf16.msrb.mxu0 %v4038_v20  ;;  %v4601_v31 = vld [vmem:[%s7429_s1 + $0x7f0] sm:$0xf] }
 0x14d   : > { %v1679_v17 = vadd.f32 %v1678_v56, %v1649_v30  ;;  %v1733_v30 = vpop.f32.mrf.mxu3  ;;  %v946_v20 = vadd.f32 %v6194_v47, %v6548_v3  ;;  %v4473_v47 = vld [vmem:[%s7429_s1 + $0x6f0] sm:$0xf] }
 0x14e   : > { %2319 = vmatmul.bf16.gmra.mxu0 %v6658_v59  ;;  %v1734_v11 = vadd.f32 %v1733_v30, %v1705_v53  ;;  %2511 = vmatpush.bf16.msrb.mxu3 %v4230_v57  ;;  %v6735_v57 = vld [vmem:[%s5164_s11 + $0x108] sm:$0xff]  ;;  %v1946_v30 = vunpack.c.h.b16 %v6722_v23 }
 0x14f   : > { %2348 = vmatmul.bf16.gmra.mxu1 %v6673_v39  ;;  %3056 = vmatpush.bf16.msra.mxu2 %v4538_v14 }
 0x150   : > { %2377 = vmatmul.bf16.gmra.mxu2 %v6688_v45  ;;  %v6719_v56 = vadd.f32 %v1734_v11, %v944_v40  ;;  %2453 = vmatpush.bf16.msrb.mxu1 %v4102_v8  ;;  %v1947_v11 = vunpack.c.l.b16 %v6735_v57  ;;  %v6749_v8 = vpack.c.b16 %v1945_v15, %v7512_v18  ;;  %v6762_v35 = vpack.c.b16 %v1946_v30, %v7513_v32  ;;  %v4529_v15 = vld [vmem:[%s7429_s1 + $0x760] sm:$0xf] }
 0x151   : > { %2406 = vmatmul.bf16.gmra.mxu3 %v6717_v50 }
 0x152   : > { %v6776_v30 = vpack.c.b16 %v1947_v11, %v7514_v34  ;;  %v948_v11 = vadd.f32 %v6244_v62, %v6548_v3  ;;  %v4465_v62 = vld [vmem:[%s7429_s1 + $0x6e0] sm:$0xf] }
 0x153   : > { %v1707_v28 = vpop.f32.mrf.mxu2  ;;  %v1651_v33 = vpop.f32.mrf.mxu0 }
 0x154   : > { %v1708_v53 = vadd.f32 %v1707_v28, %v1679_v17  ;;  %v1680_v42 = vpop.f32.mrf.mxu1  ;;  %v4865_v17 = vld [vmem:[%s7429_s1 + $0x7f4] sm:$0xf0]  ;;  %v4409_v28 = vld [vmem:[%s7429_s1 + $0x670] sm:$0xf] }
 0x155   : > { %v1681_v61 = vadd.f32 %v1680_v42, %v1651_v33  ;;  %v4602_v4 = vor.u32 %v4865_v17, %v4601_v31  ;;  %v1736_v40 = vpop.f32.mrf.mxu3  ;;  %v4817_v33 = vld [vmem:[%s7429_s1 + $0x674] sm:$0xf0]  ;;  %v1948_v31 = vunpack.c.h.b16 %v6735_v57 }
 0x156   : > { %v1737_v48 = vadd.f32 %v1736_v40, %v1708_v53  ;;  %v4410_v14 = vor.u32 %v4817_v33, %v4409_v28  ;;  %v4833_v17 = vld [vmem:[%s7429_s1 + $0x6f4] sm:$0xf0]  ;;  %v4593_v28 = vld [vmem:[%s7429_s1 + $0x7e0] sm:$0xf]  ;;  %v4863_v33 = vld [vmem:[%s7429_s1 + $0x7e4] sm:$0xf0] }
 0x157   : > { %3085 = vmatpush.bf16.msra.mxu3 %v4602_v4  ;;  %v4847_v4 = vld [vmem:[%s7429_s1 + $0x764] sm:$0xf0]  ;;  %v4594_v51 = vor.u32 %v4863_v33, %v4593_v28  ;;  %v4585_v28 = vld [vmem:[%s7429_s1 + $0x7d0] sm:$0xf] }
 0x158   : > { %v6745_v25 = vadd.f32 %v1737_v48, %v946_v20  ;;  %v4474_v48 = vor.u32 %v4833_v17, %v4473_v47  ;;  %v4530_v18 = vor.u32 %v4847_v4, %v4529_v15  ;;  %2998 = vmatpush.bf16.msra.mxu0 %v4410_v14  ;;  %v4401_v14 = vld [vmem:[%s7429_s1 + $0x660] sm:$0xf]  ;;  %v4815_v15 = vld [vmem:[%s7429_s1 + $0x664] sm:$0xf0] }
 0x15a   : > { %3027 = vmatpush.bf16.msra.mxu1 %v4474_v48  ;;  %3057 = vmatpush.bf16.msra.mxu2 %v4530_v18  ;;  %v4521_v48 = vld [vmem:[%s7429_s1 + $0x750] sm:$0xf]  ;;  %v4845_v18 = vld [vmem:[%s7429_s1 + $0x754] sm:$0xf0] }
 0x15b   : > { %v1709_v53 = vpop.f32.mrf.mxu2  ;;  %v1654_v42 = vpop.f32.mrf.mxu0  ;;  %3086 = vmatpush.bf16.msra.mxu3 %v4594_v51  ;;  %v4831_v51 = vld [vmem:[%s7429_s1 + $0x6e4] sm:$0xf0] }
 0x15c   : > { %v1710_v40 = vadd.f32 %v1709_v53, %v1681_v61  ;;  %v1683_v20 = vpop.f32.mrf.mxu1  ;;  %v7515_v53 = vunpack.c.h.b16 %v5486_v36  ;;  %v4402_v36 = vor.u32 %v4815_v15, %v4401_v14  ;;  %v4466_v34 = vor.u32 %v4831_v51, %v4465_v62  ;;  %v4393_v62 = vld [vmem:[%s7429_s1 + $0x650] sm:$0xf] }
 0x15d   : > { %v1684_v32 = vadd.f32 %v1683_v20, %v1654_v42  ;;  %v1738_v61 = vpop.f32.mrf.mxu3 }
 0x15e   : > { %2324 = vmatmul.bf16.gmra.mxu0 %v6749_v8  ;;  %v1739_v47 = vadd.f32 %v1738_v61, %v1710_v40  ;;  %v6791_v17 = vpack.c.b16 %v1948_v31, %v7515_v53  ;;  %v4522_v61 = vor.u32 %v4845_v18, %v4521_v48  ;;  %3028 = vmatpush.bf16.msra.mxu1 %v4466_v34  ;;  %v4843_v34 = vld [vmem:[%s7429_s1 + $0x744] sm:$0xf0] }
 0x15f   : > { %2353 = vmatmul.bf16.gmra.mxu1 %v6762_v35  ;;  %2999 = vmatpush.bf16.msra.mxu0 %v4402_v36  ;;  %v950_v53 = vadd.f32 %v6278_v43, %v6548_v3  ;;  %v4829_v43 = vld [vmem:[%s7429_s1 + $0x6d4] sm:$0xf0] }
 0x160   : > { %2382 = vmatmul.bf16.gmra.mxu2 %v6776_v30  ;;  %v6793_v42 = vadd.f32 %v1739_v47, %v948_v11 }
 0x161   : > { %2411 = vmatmul.bf16.gmra.mxu3 %v6791_v17  ;;  %3058 = vmatpush.bf16.msra.mxu2 %v4522_v61 }
 0x163   : > { %v1712_v4 = vpop.f32.mrf.mxu2  ;;  %v1656_v40 = vpop.f32.mrf.mxu0 }
 0x164   : > { %v1713_v31 = vadd.f32 %v1712_v4, %v1684_v32  ;;  %v1685_v20 = vpop.f32.mrf.mxu1  ;;  %v4861_v32 = vld [vmem:[%s7429_s1 + $0x7d4] sm:$0xf0] }
 0x165   : > { %v1686_v33 = vadd.f32 %v1685_v20, %v1656_v40  ;;  %v4586_v11 = vor.u32 %v4861_v32, %v4585_v28  ;;  %v1741_v47 = vpop.f32.mrf.mxu3  ;;  %v4813_v4 = vld [vmem:[%s7429_s1 + $0x654] sm:$0xf0]  ;;  %v4457_v40 = vld [vmem:[%s7429_s1 + $0x6d0] sm:$0xf]  ;;  %v4577_v32 = vld [vmem:[%s7429_s1 + $0x7c0] sm:$0xf] }
 0x166   : > { %v1742_v14 = vadd.f32 %v1741_v47, %v1713_v31  ;;  %v4394_v20 = vor.u32 %v4813_v4, %v4393_v62  ;;  %v4513_v31 = vld [vmem:[%s7429_s1 + $0x740] sm:$0xf]  ;;  %v4458_v28 = vor.u32 %v4829_v43, %v4457_v40 }
 0x167   : > { %3087 = vmatpush.bf16.msra.mxu3 %v4586_v11  ;;  %v4514_v61 = vor.u32 %v4843_v34, %v4513_v31  ;;  %v4859_v11 = vld [vmem:[%s7429_s1 + $0x7c4] sm:$0xf0]  ;;  %v4385_v40 = vld [vmem:[%s7429_s1 + $0x640] sm:$0xf]  ;;  %v4505_v34 = vld [vmem:[%s7429_s1 + $0x730] sm:$0xf] }
 0x168   : > { %v6822_v15 = vadd.f32 %v1742_v14, %v950_v53  ;;  %3000 = vmatpush.bf16.msra.mxu0 %v4394_v20  ;;  %v4578_v53 = vor.u32 %v4859_v11, %v4577_v32  ;;  %3029 = vmatpush.bf16.msra.mxu1 %v4458_v28 }
 0x169   : > { %3059 = vmatpush.bf16.msra.mxu2 %v4514_v61 }
 0x16b   : > { %v1714_v36 = vpop.f32.mrf.mxu2  ;;  %v1755_v51 = vpop.f32.mrf.mxu0  ;;  %3088 = vmatpush.bf16.msra.mxu3 %v4578_v53 }
 0x16c   : > { %v1715_v48 = vadd.f32 %v1714_v36, %v1686_v33  ;;  %v1784_v18 = vpop.f32.mrf.mxu1  ;;  %v952_v33 = vadd.f32 %v6306_v19, %v6548_v3  ;;  %v6865_v19 = vperm.slane %v6533_v38, 1  ;;  %v4841_v38 = vld [vmem:[%s7429_s1 + $0x734] sm:$0xf0] }
 0x16d   : > { %v1785_v47 = vadd.f32 %v1784_v18, %v1755_v51  ;;  %v1743_v14 = vpop.f32.mrf.mxu3  ;;  %v4827_v51 = vld [vmem:[%s7429_s1 + $0x6c4] sm:$0xf0]  ;;  %v4506_v28 = vor.u32 %v4841_v38, %v4505_v34 }
 0x16e   : > { %2425 = vmatmul.bf16.vlgmr.msrb.gmra.mxu0 %v5249_v13  ;;  %v1744_v62 = vadd.f32 %v1743_v14, %v1715_v48  ;;  %v4811_v13 = vld [vmem:[%s7429_s1 + $0x644] sm:$0xf0]  ;;  %v4569_v48 = vld [vmem:[%s7429_s1 + $0x7b0] sm:$0xf]  ;;  %v939_v11 = vadd.f32 %v6334_v24, %v6865_v19  ;;  %v4825_v24 = vld [vmem:[%s7429_s1 + $0x6b4] sm:$0xf0] }
 0x16f   : > { %2454 = vmatmul.bf16.vlgmr.msrb.gmra.mxu1 %v5272_v22  ;;  %v4449_v22 = vld [vmem:[%s7429_s1 + $0x6c0] sm:$0xf]  ;;  %v4386_v36 = vor.u32 %v4811_v13, %v4385_v40  ;;  %3060 = vmatpush.bf16.msra.mxu2 %v4506_v28  ;;  %v4377_v14 = vld [vmem:[%s7429_s1 + $0x630] sm:$0xf]  ;;  %v4855_v34 = vld [vmem:[%s7429_s1 + $0x7a4] sm:$0xf0] }
 0x170   : > { %2483 = vmatmul.bf16.vlgmr.msrb.gmra.mxu2 %v5284_v27  ;;  %v6853_v4 = vadd.f32 %v1744_v62, %v952_v33  ;;  %v4450_v31 = vor.u32 %v4827_v51, %v4449_v22  ;;  %v4809_v33 = vld [vmem:[%s7429_s1 + $0x634] sm:$0xf0]  ;;  %v4441_v62 = vld [vmem:[%s7429_s1 + $0x6b0] sm:$0xf] }
 0x171   : > { %2512 = vmatmul.bf16.vlgmr.msrb.gmra.mxu3 %v5310_v46  ;;  %3001 = vmatpush.bf16.msra.mxu0 %v4386_v36  ;;  %v4857_v46 = vld [vmem:[%s7429_s1 + $0x7b4] sm:$0xf0]  ;;  %v4378_v22 = vor.u32 %v4809_v33, %v4377_v14 }
 0x172   : > { %3030 = vmatpush.bf16.msra.mxu1 %v4450_v31  ;;  %v4570_v61 = vor.u32 %v4857_v46, %v4569_v48  ;;  %v4561_v31 = vld [vmem:[%s7429_s1 + $0x7a0] sm:$0xf] }
 0x173   : > { %v1813_v3 = vpop.f32.mrf.mxu2  ;;  %v1757_v27 = vpop.f32.mrf.mxu0  ;;  %v4562_v48 = vor.u32 %v4855_v34, %v4561_v31  ;;  %v4361_v31 = vld [vmem:[%s7429_s1 + $0x610] sm:$0xf]  ;;  %v4805_v34 = vld [vmem:[%s7429_s1 + $0x614] sm:$0xf0] }
 0x174   : > { %v1814_v20 = vadd.f32 %v1813_v3, %v1785_v47  ;;  %v1786_v43 = vpop.f32.mrf.mxu1  ;;  %3089 = vmatpush.bf16.msra.mxu3 %v4570_v61  ;;  %v4497_v3 = vld [vmem:[%s7429_s1 + $0x720] sm:$0xf] }
 0x175   : > { %v1787_v18 = vadd.f32 %v1786_v43, %v1757_v27  ;;  %v1842_v32 = vpop.f32.mrf.mxu3  ;;  %v4839_v27 = vld [vmem:[%s7429_s1 + $0x724] sm:$0xf0]  ;;  %3002 = vmatpush.bf16.msra.mxu0 %v4378_v22  ;;  %v4553_v22 = vld [vmem:[%s7429_s1 + $0x790] sm:$0xf] }
 0x176   : > { %v1843_v47 = vadd.f32 %v1842_v32, %v1814_v20  ;;  %v4442_v20 = vor.u32 %v4825_v24, %v4441_v62  ;;  %v4498_v43 = vor.u32 %v4839_v27, %v4497_v3  ;;  %v4369_v32 = vld [vmem:[%s7429_s1 + $0x620] sm:$0xf] }
 0x178   : > { %v6885_v53 = vadd.f32 %v1843_v47, %v939_v11  ;;  %3031 = vmatpush.bf16.msra.mxu1 %v4442_v20  ;;  %3061 = vmatpush.bf16.msra.mxu2 %v4498_v43 }
 0x179   : > { %3090 = vmatpush.bf16.msra.mxu3 %v4562_v48 }
 0x17b   : > { %v1815_v40 = vpop.f32.mrf.mxu2  ;;  %v1760_v13 = vpop.f32.mrf.mxu0 }
 0x17c   : > { %v1816_v36 = vadd.f32 %v1815_v40, %v1787_v18  ;;  %v1789_v51 = vpop.f32.mrf.mxu1  ;;  %v941_v18 = vadd.f32 %v6362_v16, %v6865_v19  ;;  %v4489_v40 = vld [vmem:[%s7429_s1 + $0x710] sm:$0xf] }
 0x17d   : > { %v1790_v38 = vadd.f32 %v1789_v51, %v1760_v13  ;;  %v1844_v28 = vpop.f32.mrf.mxu3  ;;  %v4837_v13 = vld [vmem:[%s7429_s1 + $0x714] sm:$0xf0]  ;;  %v943_v51 = vadd.f32 %v6390_v10, %v6865_v19 }
 0x17e   : > { %2430 = vmatmul.bf16.gmra.mxu0 %v6574_v7  ;;  %v1845_v46 = vadd.f32 %v1844_v28, %v1816_v36  ;;  %v4807_v7 = vld [vmem:[%s7429_s1 + $0x624] sm:$0xf0]  ;;  %v4490_v3 = vor.u32 %v4837_v13, %v4489_v40  ;;  %v4821_v10 = vld [vmem:[%s7429_s1 + $0x694] sm:$0xf0]  ;;  %v4417_v13 = vld [vmem:[%s7429_s1 + $0x680] sm:$0xf] }
 0x17f   : > { %2459 = vmatmul.bf16.gmra.mxu1 %v6589_v52  ;;  %v4433_v52 = vld [vmem:[%s7429_s1 + $0x6a0] sm:$0xf]  ;;  %v4370_v47 = vor.u32 %v4807_v7, %v4369_v32  ;;  %v4835_v32 = vld [vmem:[%s7429_s1 + $0x704] sm:$0xf0] }
 0x180   : > { %2488 = vmatmul.bf16.gmra.mxu2 %v6604_v21  ;;  %v6916_v61 = vadd.f32 %v1845_v46, %v941_v18  ;;  %v4823_v21 = vld [vmem:[%s7429_s1 + $0x6a4] sm:$0xf0]  ;;  %v4362_v18 = vor.u32 %v4805_v34, %v4361_v31  ;;  %v4481_v46 = vld [vmem:[%s7429_s1 + $0x700] sm:$0xf]  ;;  %v4848_v34 = vld [vmem:[%s7429_s1 + $0x774] sm:$0xf] }
 0x181   : > { %2517 = vmatmul.bf16.gmra.mxu3 %v6621_v1  ;;  %v4434_v62 = vor.u32 %v4823_v21, %v4433_v52  ;;  %3003 = vmatpush.bf16.msra.mxu0 %v4370_v47  ;;  %v4853_v1 = vld [vmem:[%s7429_s1 + $0x794] sm:$0xf0]  ;;  %v4545_v47 = vld [vmem:[%s7429_s1 + $0x780] sm:$0xf]  ;;  %v4851_v21 = vld [vmem:[%s7429_s1 + $0x784] sm:$0xf0] }
 0x182   : > { %v4554_v27 = vor.u32 %v4853_v1, %v4553_v22  ;;  %3062 = vmatpush.bf16.msra.mxu2 %v4490_v3  ;;  %v4803_v40 = vld [vmem:[%s7429_s1 + $0x604] sm:$0xf0]  ;;  %v945_v3 = vadd.f32 %v6430_v63, %v6865_v19  ;;  %v4539_v63 = vld [vmem:[%s7429_s1 + $0x778] sm:$0xf0] }
 0x183   : > { %v1818_v11 = vpop.f32.mrf.mxu2  ;;  %v1762_v16 = vpop.f32.mrf.mxu0  ;;  %3032 = vmatpush.bf16.msra.mxu1 %v4434_v62  ;;  %v4353_v62 = vld [vmem:[%s7429_s1 + $0x600] sm:$0xf] }
 0x184   : > { %v1819_v14 = vadd.f32 %v1818_v11, %v1790_v38  ;;  %v1791_v33 = vpop.f32.mrf.mxu1  ;;  %3091 = vmatpush.bf16.msra.mxu3 %v4554_v27  ;;  %v4425_v38 = vld [vmem:[%s7429_s1 + $0x690] sm:$0xf] }
 0x185   : > { %v1792_v24 = vadd.f32 %v1791_v33, %v1762_v16  ;;  %v1847_v36 = vpop.f32.mrf.mxu3  ;;  %v4426_v11 = vor.u32 %v4821_v10, %v4425_v38  ;;  %v4482_v16 = vor.u32 %v4835_v32, %v4481_v46  ;;  %3004 = vmatpush.bf16.msra.mxu0 %v4362_v18  ;;  %v4546_v33 = vor.u32 %v4851_v21, %v4545_v47 }
 0x186   : > { %v1848_v20 = vadd.f32 %v1847_v36, %v1819_v14  ;;  %v947_v10 = vadd.f32 %v6446_v41, %v6865_v19  ;;  %v4475_v41 = vld [vmem:[%s7429_s1 + $0x6f8] sm:$0xf0] }
 0x187   : > { %3033 = vmatpush.bf16.msra.mxu1 %v4426_v11  ;;  %3063 = vmatpush.bf16.msra.mxu2 %v4482_v16  ;;  %v4832_v11 = vld [vmem:[%s7429_s1 + $0x6f4] sm:$0xf] }
 0x188   : > { %v6945_v43 = vadd.f32 %v1848_v20, %v943_v51  ;;  %3092 = vmatpush.bf16.msra.mxu3 %v4546_v33  ;;  %v4531_v33 = vld [vmem:[%s7429_s1 + $0x768] sm:$0xf0] }
 0x18b   : > { %v1820_v48 = vpop.f32.mrf.mxu2  ;;  %v1765_v28 = vpop.f32.mrf.mxu0 }
 0x18c   : > { %v1821_v7 = vadd.f32 %v1820_v48, %v1792_v24  ;;  %v1794_v52 = vpop.f32.mrf.mxu1  ;;  %v4354_v24 = vor.u32 %v4803_v40, %v4353_v62  ;;  %v4542_v48 = vor.u32 %v4848_v34, %v4539_v63 }
 0x18d   : > { %v1795_v14 = vadd.f32 %v1794_v52, %v1765_v28  ;;  %v1849_v22 = vpop.f32.mrf.mxu3  ;;  %v4411_v52 = vld [vmem:[%s7429_s1 + $0x678] sm:$0xf0] }
 0x18e   : > { %2435 = vmatmul.bf16.gmra.mxu0 %v6658_v59  ;;  %v4819_v59 = vld [vmem:[%s7429_s1 + $0x684] sm:$0xf0]  ;;  %v1850_v1 = vadd.f32 %v1849_v22, %v1821_v7  ;;  %3172 = vmatpush.bf16.msrb.mxu2 %v4542_v48  ;;  %v4816_v7 = vld [vmem:[%s7429_s1 + $0x674] sm:$0xf] }
 0x18f   : > { %2464 = vmatmul.bf16.gmra.mxu1 %v6673_v39  ;;  %v4418_v27 = vor.u32 %v4819_v59, %v4417_v13  ;;  %3005 = vmatpush.bf16.msra.mxu0 %v4354_v24  ;;  %v4414_v21 = vor.u32 %v4816_v7, %v4411_v52  ;;  %v4478_v13 = vor.u32 %v4832_v11, %v4475_v41  ;;  %v4862_v24 = vld [vmem:[%s7429_s1 + $0x7e4] sm:$0xf]  ;;  %v4595_v59 = vld [vmem:[%s7429_s1 + $0x7e8] sm:$0xf0]  ;;  %v4395_v41 = vld [vmem:[%s7429_s1 + $0x658] sm:$0xf0] }
 0x190   : > { %2493 = vmatmul.bf16.gmra.mxu2 %v6688_v45  ;;  %v6988_v36 = vadd.f32 %v1850_v1, %v945_v3  ;;  %v4864_v45 = vld [vmem:[%s7429_s1 + $0x7f4] sm:$0xf]  ;;  %v4598_v1 = vor.u32 %v4862_v24, %v4595_v59  ;;  %v951_v11 = vadd.f32 %v6502_v58, %v6865_v19  ;;  %v4459_v58 = vld [vmem:[%s7429_s1 + $0x6d8] sm:$0xf0] }
 0x191   : > { %3034 = vmatpush.bf16.msra.mxu1 %v4418_v27  ;;  %2522 = vmatmul.bf16.gmra.mxu3 %v6717_v50  ;;  %v4603_v50 = vld [vmem:[%s7429_s1 + $0x7f8] sm:$0xf0] }
 0x192   : > { %v4606_v28 = vor.u32 %v4864_v45, %v4603_v50  ;;  %v4844_v50 = vld [vmem:[%s7429_s1 + $0x754] sm:$0xf] }
 0x193   : > { %v1823_v51 = vpop.f32.mrf.mxu2  ;;  %v1767_v39 = vpop.f32.mrf.mxu0  ;;  %3114 = vmatpush.bf16.msrb.mxu0 %v4414_v21  ;;  %v4812_v21 = vld [vmem:[%s7429_s1 + $0x654] sm:$0xf] }
 0x194   : > { %v1824_v20 = vadd.f32 %v1823_v51, %v1795_v14  ;;  %v1796_v31 = vpop.f32.mrf.mxu1  ;;  %3201 = vmatpush.bf16.msrb.mxu3 %v4606_v28  ;;  %v4846_v14 = vld [vmem:[%s7429_s1 + $0x764] sm:$0xf]  ;;  %v949_v51 = vadd.f32 %v6474_v54, %v6865_v19  ;;  %v4523_v28 = vld [vmem:[%s7429_s1 + $0x758] sm:$0xf0] }
 0x195   : > { %v1797_v38 = vadd.f32 %v1796_v31, %v1767_v39  ;;  %v1852_v18 = vpop.f32.mrf.mxu3  ;;  %v4534_v22 = vor.u32 %v4846_v14, %v4531_v33  ;;  %3143 = vmatpush.bf16.msrb.mxu1 %v4478_v13  ;;  %v4814_v31 = vld [vmem:[%s7429_s1 + $0x664] sm:$0xf]  ;;  %v4828_v14 = vld [vmem:[%s7429_s1 + $0x6d4] sm:$0xf] }
 0x196   : > { %v1853_v46 = vadd.f32 %v1852_v18, %v1824_v20  ;;  %v4860_v18 = vld [vmem:[%s7429_s1 + $0x7d4] sm:$0xf]  ;;  %v4842_v13 = vld [vmem:[%s7429_s1 + $0x744] sm:$0xf] }
 0x197   : > { %3173 = vmatpush.bf16.msrb.mxu2 %v4534_v22  ;;  %v4515_v22 = vld [vmem:[%s7429_s1 + $0x748] sm:$0xf0] }
 0x198   : > { %v7005_v32 = vadd.f32 %v1853_v46, %v947_v10  ;;  %3202 = vmatpush.bf16.msrb.mxu3 %v4598_v1  ;;  %v4526_v46 = vor.u32 %v4844_v50, %v4523_v28  ;;  %v4518_v1 = vor.u32 %v4842_v13, %v4515_v22  ;;  %v4808_v22 = vld [vmem:[%s7429_s1 + $0x634] sm:$0xf] }
 0x19b   : > { %v1825_v16 = vpop.f32.mrf.mxu2  ;;  %v1770_v47 = vpop.f32.mrf.mxu0  ;;  %3174 = vmatpush.bf16.msrb.mxu2 %v4526_v46  ;;  %v4507_v46 = vld [vmem:[%s7429_s1 + $0x738] sm:$0xf0] }
 0x19c   : > { %v1826_v62 = vadd.f32 %v1825_v16, %v1797_v38  ;;  %v1799_v40 = vpop.f32.mrf.mxu1 }
 0x19d   : > { %v1800_v3 = vadd.f32 %v1799_v40, %v1770_v47  ;;  %v1854_v27 = vpop.f32.mrf.mxu3  ;;  %v4398_v40 = vor.u32 %v4812_v21, %v4395_v41 }
 0x19e   : > { %2440 = vmatmul.bf16.gmra.mxu0 %v6749_v8  ;;  %v1855_v39 = vadd.f32 %v1854_v27, %v1826_v62  ;;  %v4403_v8 = vld [vmem:[%s7429_s1 + $0x668] sm:$0xf0]  ;;  %v4858_v27 = vld [vmem:[%s7429_s1 + $0x7c4] sm:$0xf] }
 0x19f   : > { %2469 = vmatmul.bf16.gmra.mxu1 %v6762_v35  ;;  %v4830_v35 = vld [vmem:[%s7429_s1 + $0x6e4] sm:$0xf]  ;;  %v4406_v63 = vor.u32 %v4814_v31, %v4403_v8  ;;  %3175 = vmatpush.bf16.msrb.mxu2 %v4518_v1 }
 0x1a0   : > { %2498 = vmatmul.bf16.gmra.mxu2 %v6776_v30  ;;  %v7036_v20 = vadd.f32 %v1855_v39, %v949_v51  ;;  %v4467_v30 = vld [vmem:[%s7429_s1 + $0x6e8] sm:$0xf0] }
 0x1a1   : > { %2527 = vmatmul.bf16.gmra.mxu3 %v6791_v17  ;;  %v4470_v48 = vor.u32 %v4830_v35, %v4467_v30  ;;  %3115 = vmatpush.bf16.msrb.mxu0 %v4406_v63  ;;  %v4587_v17 = vld [vmem:[%s7429_s1 + $0x7d8] sm:$0xf0]  ;;  %v4579_v51 = vld [vmem:[%s7429_s1 + $0x7c8] sm:$0xf0]  ;;  %v953_v35 = vadd.f32 %v6535_v55, %v6865_v19  ;;  %v4810_v63 = vld [vmem:[%s7429_s1 + $0x644] sm:$0xf] }
 0x1a2   : > { %v4590_v7 = vor.u32 %v4860_v18, %v4587_v17  ;;  %v4582_v31 = vor.u32 %v4858_v27, %v4579_v51  ;;  %v4387_v30 = vld [vmem:[%s7429_s1 + $0x648] sm:$0xf0]  ;;  %v4856_v17 = vld [vmem:[%s7429_s1 + $0x7b4] sm:$0xf] }
 0x1a3   : > { %v1828_v34 = vpop.f32.mrf.mxu2  ;;  %v1772_v54 = vpop.f32.mrf.mxu0  ;;  %3144 = vmatpush.bf16.msrb.mxu1 %v4470_v48  ;;  %v4390_v19 = vor.u32 %v4810_v63, %v4387_v30  ;;  %v4451_v48 = vld [vmem:[%s7429_s1 + $0x6c8] sm:$0xf0] }
 0x1a4   : > { %v1829_v45 = vadd.f32 %v1828_v34, %v1800_v3  ;;  %v1801_v38 = vpop.f32.mrf.mxu1  ;;  %3203 = vmatpush.bf16.msrb.mxu3 %v4590_v7  ;;  %v4462_v3 = vor.u32 %v4828_v14, %v4459_v58  ;;  %v7522_v30 = vld [vmem:[#allocation3_spill] sm:$0xff] }
 0x1a5   : > { %v1802_v10 = vadd.f32 %v1801_v38, %v1772_v54  ;;  %v1857_v52 = vpop.f32.mrf.mxu3  ;;  %3116 = vmatpush.bf16.msrb.mxu0 %v4398_v40  ;;  %v7518_v40 = vld [vmem:[#allocation4_spill] sm:$0xff] }
 0x1a6   : > { %v1858_v16 = vadd.f32 %v1857_v52, %v1829_v45  ;;  %v4826_v45 = vld [vmem:[%s7429_s1 + $0x6c4] sm:$0xf]  ;;  %v7519_v58 = vunpack.c.l.b16 %v7518_v40  ;;  %v7521_v27 = vunpack.c.h.b16 %v7518_v40 }
 0x1a7   : > { %3145 = vmatpush.bf16.msrb.mxu1 %v4462_v3  ;;  %v4454_v18 = vor.u32 %v4826_v45, %v4451_v48  ;;  %v7523_v45 = vunpack.c.l.b16 %v7522_v30 }
 0x1a8   : > { %v7065_v47 = vadd.f32 %v1858_v16, %v951_v11  ;;  %3204 = vmatpush.bf16.msrb.mxu3 %v4582_v31  ;;  %v4571_v11 = vld [vmem:[%s7429_s1 + $0x7b8] sm:$0xf0] }
 0x1a9   : > { %3117 = vmatpush.bf16.msrb.mxu0 %v4390_v19  ;;  %v4574_v16 = vor.u32 %v4856_v17, %v4571_v11  ;;  %v4443_v31 = vld [vmem:[%s7429_s1 + $0x6b8] sm:$0xf0] }
 0x1ab   : > { %v1830_v33 = vpop.f32.mrf.mxu2  ;;  %v2310_v62 = vpop.f32.mrf.mxu0  ;;  %3146 = vmatpush.bf16.msrb.mxu1 %v4454_v18 }
 0x1ac   : > { %v1831_v24 = vadd.f32 %v1830_v33, %v1802_v10  ;;  %v2339_v59 = vpop.f32.mrf.mxu1  ;;  %v4840_v10 = vld [vmem:[%s7429_s1 + $0x734] sm:$0xf]  ;;  %3205 = vmatpush.bf16.msrb.mxu3 %v4574_v16  ;;  %v7516_v33 = vld [vmem:[#allocation2_spill] sm:$0xff] }
 0x1ad   : > { %v2340_v39 = vadd.f32 %v2339_v59, %v2310_v62  ;;  %v1859_v8 = vpop.f32.mrf.mxu3  ;;  %v4510_v52 = vor.u32 %v4840_v10, %v4507_v46  ;;  %v7517_v62 = vunpack.c.l.b16 %v7516_v33  ;;  %v4824_v59 = vld [vmem:[%s7429_s1 + $0x6b4] sm:$0xf]  ;;  %v7520_v1 = vunpack.c.h.b16 %v7516_v33  ;;  %v4822_v33 = vld [vmem:[%s7429_s1 + $0x6a4] sm:$0xf] }
 0x1ae   : > { %3006 = vmatmul.bf16.vlgmr.msra.gmra.mxu0 %v5849_v37  ;;  %v1860_v34 = vadd.f32 %v1859_v8, %v1831_v24  ;;  %v4379_v24 = vld [vmem:[%s7429_s1 + $0x638] sm:$0xf0]  ;;  %v4838_v8 = vld [vmem:[%s7429_s1 + $0x724] sm:$0xf]  ;;  %v4446_v19 = vor.u32 %v4824_v59, %v4443_v31 }
 0x1af   : > { %3035 = vmatmul.bf16.vlgmr.msra.gmra.mxu1 %v5855_v60  ;;  %3176 = vmatpush.bf16.msrb.mxu2 %v4510_v52  ;;  %v7130_v13 = vpack.c.b16 %v7519_v58, %v7517_v62  ;;  %v7145_v51 = vpack.c.b16 %v7521_v27, %v7520_v1  ;;  %v7526_v52 = vunpack.c.h.b16 %v6052_v29  ;;  %v2553_v62 = vshll.u32 %v6722_v23, 16  ;;  %v4852_v1 = vld [vmem:[%s7429_s1 + $0x794] sm:$0xf] }
 0x1b0   : > { %3064 = vmatmul.bf16.vlgmr.msra.gmra.mxu2 %v5880_v49  ;;  %v7096_v54 = vadd.f32 %v1860_v34, %v953_v35  ;;  %v4499_v35 = vld [vmem:[%s7429_s1 + $0x728] sm:$0xf0]  ;;  %3147 = vmatpush.bf16.msrb.mxu1 %v4446_v19  ;;  %v2564_v27 = vshrl.u32 %v6735_v57, 16 }
 0x1b1   : > { %3093 = vmatmul.bf16.vlgmr.msra.gmra.mxu3 %v5886_v6  ;;  %v4502_v48 = vor.u32 %v4838_v8, %v4499_v35  ;;  %v4555_v35 = vld [vmem:[%s7429_s1 + $0x798] sm:$0xf0] }
 0x1b3   : > { %v2368_v38 = vpop.f32.mrf.mxu2  ;;  %v2312_v55 = vpop.f32.mrf.mxu0  ;;  %3177 = vmatpush.bf16.msrb.mxu2 %v4502_v48 }
 0x1b4   : > { %v2369_v50 = vadd.f32 %v2368_v38, %v2340_v39  ;;  %v2341_v28 = vpop.f32.mrf.mxu1  ;;  %v4382_v39 = vor.u32 %v4808_v22, %v4379_v24  ;;  %v7524_v38 = vunpack.c.l.b16 %v6052_v29  ;;  %v2550_v29 = vshrl.u32 %v6722_v23, 16  ;;  %v4435_v22 = vld [vmem:[%s7429_s1 + $0x6a8] sm:$0xf0]  ;;  %v4491_v23 = vld [vmem:[%s7429_s1 + $0x718] sm:$0xf0] }
 0x1b5   : > { %v2342_v7 = vadd.f32 %v2341_v28, %v2312_v55  ;;  %v2397_v21 = vpop.f32.mrf.mxu3  ;;  %v4563_v28 = vld [vmem:[%s7429_s1 + $0x7a8] sm:$0xf0] }
 0x1b6   : > { %v2398_v41 = vadd.f32 %v2397_v21, %v2369_v50  ;;  %v7160_v55 = vpack.c.b16 %v7524_v38, %v7523_v45  ;;  %v4854_v50 = vld [vmem:[%s7429_s1 + $0x7a4] sm:$0xf]  ;;  %3118 = vmatpush.bf16.msrb.mxu0 %v4382_v39  ;;  %v2567_v39 = vshll.u32 %v6735_v57, 16  ;;  %v2552_v45 = vrot.slane %v2550_v29, 4 }
 0x1b7   : > { %v4566_v10 = vor.u32 %v4854_v50, %v4563_v28  ;;  %v4806_v21 = vld [vmem:[%s7429_s1 + $0x624] sm:$0xf]  ;;  %v2555_v38 = vrot.slane %v2553_v62, 5  ;;  %v235_v50 = vld [vmem:[%s5164_s11 + $0x118] sm:$0x11]  ;;  %v2566_v28 = vrot.slane %v2564_v27, 4  ;;  %v7531_v62 = vunpack.c.h.b16 %v6163_v12 }
 0x1b8   : > { %v7124_v14 = vadd.f32 %v2398_v41, %v6568_v0  ;;  %v4371_v41 = vld [vmem:[%s7429_s1 + $0x628] sm:$0xf0]  ;;  %v2569_v57 = vrot.slane %v2567_v39, 5 }
 0x1b9   : > { %3206 = vmatpush.bf16.msrb.mxu3 %v4566_v10  ;;  %v7527_v10 = vld [vmem:[#allocation5_spill] sm:$0xff] }
 0x1ba   : > { %v7530_v29 = vunpack.c.h.b16 %v7527_v10 }
 0x1bb   : > { %v2370_v0 = vpop.f32.mrf.mxu2  ;;  %v2315_v3 = vpop.f32.mrf.mxu0 }
 0x1bc   : > { %v2371_v34 = vadd.f32 %v2370_v0, %v2342_v7  ;;  %v2344_v63 = vpop.f32.mrf.mxu1  ;;  %v7525_v7 = vunpack.c.h.b16 %v7522_v30  ;;  %v4438_v0 = vor.u32 %v4822_v33, %v4435_v22  ;;  %v4427_v22 = vld [vmem:[%s7429_s1 + $0x698] sm:$0xf0] }
 0x1bd   : > { %v2345_v18 = vadd.f32 %v2344_v63, %v2315_v3  ;;  %v2399_v46 = vpop.f32.mrf.mxu3  ;;  %v4836_v3 = vld [vmem:[%s7429_s1 + $0x714] sm:$0xf]  ;;  %v4558_v63 = vor.u32 %v4852_v1, %v4555_v35  ;;  %v4547_v35 = vld [vmem:[%s7429_s1 + $0x788] sm:$0xf0] }
 0x1be   : > { %3011 = vmatmul.bf16.gmra.mxu0 %v7130_v13  ;;  %v2400_v17 = vadd.f32 %v2399_v46, %v2371_v34  ;;  %v7175_v11 = vpack.c.b16 %v7526_v52, %v7525_v7  ;;  %v4494_v8 = vor.u32 %v4836_v3, %v4491_v23  ;;  %3148 = vmatpush.bf16.msrb.mxu1 %v4438_v0  ;;  %v234_v34 = vld [vmem:[%s5164_s11 + $0x110] sm:$0x11]  ;;  %v7528_v46 = vunpack.c.l.b16 %v7527_v10  ;;  %s7388_s11 = scalar_lea.vmem %s7431_s3, %s4609_s27 }
 0x1bf   : > { %3040 = vmatmul.bf16.gmra.mxu1 %v7145_v51  ;;  %3207 = vmatpush.bf16.msrb.mxu3 %v4558_v63  ;;  %v2559_v48 = vshll.u32 %v234_v34, 16  ;;  %v4804_v52 = vld [vmem:[%s7429_s1 + $0x614] sm:$0xf]  ;;  %v7533_v23 = vunpack.c.l.b16 %v6181_v44  ;;  %v2570_v63 = vor.u32 %v2569_v57, %v2566_v28 }
 0x1c0   : > { %3069 = vmatmul.bf16.gmra.mxu2 %v7160_v55  ;;  %v7178_v16 = vadd.f32 %v2400_v17, %v6623_v9  ;;  %v4374_v9 = vor.u32 %v4806_v21, %v4371_v41  ;;  %v7529_v17 = vunpack.c.l.b16 %v6163_v12  ;;  %v4363_v21 = vld [vmem:[%s7429_s1 + $0x618] sm:$0xf0]  ;;  %v4820_v41 = vld [vmem:[%s7429_s1 + $0x694] sm:$0xf]  ;;  %v7532_v12 = vunpack.c.l.b16 %v6056_v2 }
 0x1c1   : > { %3098 = vmatmul.bf16.gmra.mxu3 %v7175_v11  ;;  %3178 = vmatpush.bf16.msrb.mxu2 %v4494_v8  ;;  %v4430_v27 = vor.u32 %v4820_v41, %v4427_v22  ;;  %v4850_v8 = vld [vmem:[%s7429_s1 + $0x784] sm:$0xf]  ;;  %v2561_v28 = vrot.slane %v2559_v48, 5 }
 0x1c2   : > { %3119 = vmatpush.bf16.msrb.mxu0 %v4374_v9  ;;  %v7218_v7 = vpack.c.b16 %v7529_v17, %v7528_v46  ;;  %v4366_v9 = vor.u32 %v4804_v52, %v4363_v21  ;;  %v7248_v1 = vpack.c.b16 %v7533_v23, %v7532_v12  ;;  %v4419_v46 = vld [vmem:[%s7429_s1 + $0x688] sm:$0xf0]  ;;  %v7534_v52 = vunpack.c.h.b16 %v6056_v2 }
 0x1c3   : > { %v2373_v40 = vpop.f32.mrf.mxu2  ;;  %v2317_v58 = vpop.f32.mrf.mxu0  ;;  %3149 = vmatpush.bf16.msrb.mxu1 %v4430_v27  ;;  %v7535_v21 = vunpack.c.h.b16 %v6181_v44  ;;  %v7536_v27 = vld [vmem:[#allocation6_spill] sm:$0xff] }
 0x1c4   : > { %v2374_v24 = vadd.f32 %v2373_v40, %v2345_v18  ;;  %v2346_v59 = vpop.f32.mrf.mxu1  ;;  %v7233_v40 = vpack.c.b16 %v7531_v62, %v7530_v29 }
 0x1c5   : > { %v2347_v31 = vadd.f32 %v2346_v59, %v2317_v58  ;;  %v2402_v30 = vpop.f32.mrf.mxu3  ;;  %v2556_v58 = vor.u32 %v2555_v38, %v2552_v45  ;;  %v4483_v59 = vld [vmem:[%s7429_s1 + $0x708] sm:$0xf0]  ;;  %v4802_v45 = vld [vmem:[%s7429_s1 + $0x604] sm:$0xf]  ;;  %v7275_v41 = vpack.c.b16 %v7535_v21, %v7534_v52 }
 0x1c6   : > { %v2403_v19 = vadd.f32 %v2402_v30, %v2374_v24  ;;  %v4834_v24 = vld [vmem:[%s7429_s1 + $0x704] sm:$0xf]  ;;  %3120 = vmatpush.bf16.msrb.mxu0 %v4366_v9  ;;  %v4550_v30 = vor.u32 %v4850_v8, %v4547_v35  ;;  %v4355_v38 = vld [vmem:[%s7429_s1 + $0x608] sm:$0xf0] }
 0x1c7   : > { %v4486_v39 = vor.u32 %v4834_v24, %v4483_v59  ;;  %v4358_v57 = vor.u32 %v4802_v45, %v4355_v38  ;;  %v7539_v45 = vld [vmem:[#allocation7_spill] sm:$0xff] }
 0x1c8   : > { %v7212_v18 = vadd.f32 %v2403_v19, %v6652_v26  ;;  %v4818_v19 = vld [vmem:[%s7429_s1 + $0x684] sm:$0xf]  ;;  %3208 = vmatpush.bf16.msrb.mxu3 %v4550_v30  ;;  %v7540_v38 = vunpack.c.l.b16 %v7539_v45 }
 0x1c9   : > { %3179 = vmatpush.bf16.msrb.mxu2 %v4486_v39  ;;  %v7537_v39 = vunpack.c.l.b16 %v7536_v27 }
 0x1ca   : > { %3121 = vmatpush.bf16.msrb.mxu0 %v4358_v57  ;;  %v7541_v57 = vunpack.c.h.b16 %v7539_v45 }
 0x1cb   : > { %v2375_v26 = vpop.f32.mrf.mxu2  ;;  %v2320_v33 = vpop.f32.mrf.mxu0 }
 0x1cc   : > { %v2376_v0 = vadd.f32 %v2375_v26, %v2347_v31  ;;  %v2349_v3 = vpop.f32.mrf.mxu1  ;;  %v2573_v31 = vshll.u32 %v235_v50, 16  ;;  %v2557_v50 = vrot.slane %v2556_v58, 4  ;;  %v4422_v26 = vor.u32 %v4818_v19, %v4419_v46 }
 0x1cd   : > { %v2350_v34 = vadd.f32 %v2349_v3, %v2320_v33  ;;  %v2404_v10 = vpop.f32.mrf.mxu3  ;;  %v2571_v33 = vrot.slane %v2570_v63, 4 }
 0x1ce   : > { %3016 = vmatmul.bf16.gmra.mxu0 %v7218_v7  ;;  %v2405_v17 = vadd.f32 %v2404_v10, %v2376_v0  ;;  %v2575_v29 = vrot.slane %v2573_v31, 5  ;;  %3150 = vmatpush.bf16.msrb.mxu1 %v4422_v26  ;;  %v2562_v9 = vsel %vm5738_vm2, %v2557_v50, %v2561_v28 }
 0x1cf   : > { %3045 = vmatmul.bf16.gmra.mxu1 %v7233_v40  ;;  %v2642_v59 = vunpack.c.l.b16 %v2562_v9  ;;  %v2643_v3 = vunpack.c.h.b16 %v2562_v9 }
 0x1d0   : > { %3074 = vmatmul.bf16.gmra.mxu2 %v7248_v1  ;;  %v7278_v48 = vadd.f32 %v2405_v17, %v6719_v56  ;;  %v2576_v24 = vsel %vm5738_vm2, %v2571_v33, %v2575_v29 }
 0x1d1   : > { %3103 = vmatmul.bf16.gmra.mxu3 %v7275_v41  ;;  %v2644_v56 = vunpack.c.l.b16 %v2576_v24  ;;  %v7290_v8 = vpack.c.b16 %v2642_v59, %v7537_v39  ;;  %v2645_v10 = vunpack.c.h.b16 %v2576_v24 }
 0x1d3   : > { %v2378_v62 = vpop.f32.mrf.mxu2  ;;  %v2322_v58 = vpop.f32.mrf.mxu0  ;;  %v7298_v19 = vpack.c.b16 %v2644_v56, %v7540_v38  ;;  %v7305_v46 = vpack.c.b16 %v2645_v10, %v7541_v57 }
 0x1d4   : > { %v2379_v2 = vadd.f32 %v2378_v62, %v2350_v34  ;;  %v2351_v44 = vpop.f32.mrf.mxu1  ;;  %v7538_v34 = vunpack.c.h.b16 %v7536_v27 }
 0x1d5   : > { %v2352_v22 = vadd.f32 %v2351_v44, %v2322_v58  ;;  %v2407_v0 = vpop.f32.mrf.mxu3 }
 0x1d6   : > { %v2408_v12 = vadd.f32 %v2407_v0, %v2379_v2  ;;  %v7294_v31 = vpack.c.b16 %v2643_v3, %v7538_v34 }
 0x1d8   : > { %v7286_v23 = vadd.f32 %v2408_v12, %v6745_v25 }
 0x1db   : > { %v2380_v35 = vpop.f32.mrf.mxu2  ;;  %v2325_v63 = vpop.f32.mrf.mxu0 }
 0x1dc   : > { %v2381_v5 = vadd.f32 %v2380_v35, %v2352_v22  ;;  %v2354_v30 = vpop.f32.mrf.mxu1 }
 0x1dd   : > { %v2355_v50 = vadd.f32 %v2354_v30, %v2325_v63  ;;  %v2409_v25 = vpop.f32.mrf.mxu3 }
 0x1de   : > { %3021 = vmatmul.bf16.gmra.mxu0 %v7290_v8  ;;  %v2410_v28 = vadd.f32 %v2409_v25, %v2381_v5 }
 0x1df   : > { %3050 = vmatmul.bf16.gmra.mxu1 %v7294_v31 }
 0x1e0   : > { %3079 = vmatmul.bf16.gmra.mxu2 %v7298_v19  ;;  %v7308_v17 = vadd.f32 %v2410_v28, %v6793_v42 }
 0x1e1   : > { %3108 = vmatmul.bf16.gmra.mxu3 %v7305_v46 }
 0x1e3   : > { %v2383_v52 = vpop.f32.mrf.mxu2  ;;  %v2327_v21 = vpop.f32.mrf.mxu0 }
 0x1e4   : > { %v2384_v26 = vadd.f32 %v2383_v52, %v2355_v50  ;;  %v2356_v33 = vpop.f32.mrf.mxu1 }
 0x1e5   : > { %v2357_v29 = vadd.f32 %v2356_v33, %v2327_v21  ;;  %v2412_v62 = vpop.f32.mrf.mxu3 }
 0x1e6   : > { %v2413_v58 = vadd.f32 %v2412_v62, %v2384_v26 }
 0x1e8   : > { %v7312_v9 = vadd.f32 %v2413_v58, %v6822_v15 }
 0x1eb   : > { %v2385_v2 = vpop.f32.mrf.mxu2  ;;  %v2426_v44 = vpop.f32.mrf.mxu0 }
 0x1ec   : > { %v2386_v22 = vadd.f32 %v2385_v2, %v2357_v29  ;;  %v2455_v24 = vpop.f32.mrf.mxu1 }
 0x1ed   : > { %v2456_v59 = vadd.f32 %v2455_v24, %v2426_v44  ;;  %v2414_v42 = vpop.f32.mrf.mxu3 }
 0x1ee   : > { %3122 = vmatmul.bf16.vlgmr.msrb.gmra.mxu0 %v5849_v37  ;;  %v2415_v0 = vadd.f32 %v2414_v42, %v2386_v22 }
 0x1ef   : > { %3151 = vmatmul.bf16.vlgmr.msrb.gmra.mxu1 %v5855_v60 }
 0x1f0   : > { %3180 = vmatmul.bf16.vlgmr.msrb.gmra.mxu2 %v5880_v49  ;;  %v7318_v3 = vadd.f32 %v2415_v0, %v6853_v4 }
 0x1f1   : > { %3209 = vmatmul.bf16.vlgmr.msrb.gmra.mxu3 %v5886_v6 }
 0x1f3   : > { %v2484_v12 = vpop.f32.mrf.mxu2  ;;  %v2428_v56 = vpop.f32.mrf.mxu0 }
 0x1f4   : > { %v2485_v15 = vadd.f32 %v2484_v12, %v2456_v59  ;;  %v2457_v27 = vpop.f32.mrf.mxu1 }
 0x1f5   : > { %v2458_v39 = vadd.f32 %v2457_v27, %v2428_v56  ;;  %v2513_v35 = vpop.f32.mrf.mxu3 }
 0x1f6   : > { %v2514_v63 = vadd.f32 %v2513_v35, %v2485_v15 }
 0x1f8   : > { %v7322_v37 = vadd.f32 %v2514_v63, %v6885_v53 }
 0x1fb   : > { %v2486_v34 = vpop.f32.mrf.mxu2  ;;  %v2431_v60 = vpop.f32.mrf.mxu0 }
 0x1fc   : > { %v2487_v5 = vadd.f32 %v2486_v34, %v2458_v39  ;;  %v2460_v30 = vpop.f32.mrf.mxu1 }
 0x1fd   : > { %v2461_v49 = vadd.f32 %v2460_v30, %v2431_v60  ;;  %v2515_v4 = vpop.f32.mrf.mxu3 }
 0x1fe   : > { %3127 = vmatmul.bf16.gmra.mxu0 %v7130_v13  ;;  %v2516_v45 = vadd.f32 %v2515_v4, %v2487_v5 }
 0x1ff   : > { %3156 = vmatmul.bf16.gmra.mxu1 %v7145_v51 }
 0x200   : > { %3185 = vmatmul.bf16.gmra.mxu2 %v7160_v55  ;;  %v7328_v6 = vadd.f32 %v2516_v45, %v6916_v61 }
 0x201   : > { %3214 = vmatmul.bf16.gmra.mxu3 %v7175_v11 }
 0x203   : > { %v2489_v38 = vpop.f32.mrf.mxu2  ;;  %v2433_v10 = vpop.f32.mrf.mxu0 }
 0x204   : > { %v2490_v53 = vadd.f32 %v2489_v38, %v2461_v49  ;;  %v2462_v50 = vpop.f32.mrf.mxu1 }
 0x205   : > { %v2463_v25 = vadd.f32 %v2462_v50, %v2433_v10  ;;  %v2518_v28 = vpop.f32.mrf.mxu3 }
 0x206   : > { %v2519_v57 = vadd.f32 %v2518_v28, %v2490_v53 }
 0x208   : > { %v7332_v13 = vadd.f32 %v2519_v57, %v6945_v43 }
 0x20b   : > { %v2491_v52 = vpop.f32.mrf.mxu2  ;;  %v2436_v51 = vpop.f32.mrf.mxu0 }
 0x20c   : > { %v2492_v21 = vadd.f32 %v2491_v52, %v2463_v25  ;;  %v2465_v26 = vpop.f32.mrf.mxu1 }
 0x20d   : > { %v2466_v55 = vadd.f32 %v2465_v26, %v2436_v51  ;;  %v2520_v61 = vpop.f32.mrf.mxu3 }
 0x20e   : > { %3132 = vmatmul.bf16.gmra.mxu0 %v7218_v7  ;;  %v2521_v33 = vadd.f32 %v2520_v61, %v2492_v21 }
 0x20f   : > { %3161 = vmatmul.bf16.gmra.mxu1 %v7233_v40 }
 0x210   : > { %3190 = vmatmul.bf16.gmra.mxu2 %v7248_v1  ;;  %v7338_v11 = vadd.f32 %v2521_v33, %v6988_v36 }
 0x211   : > { %3219 = vmatmul.bf16.gmra.mxu3 %v7275_v41 }
 0x213   : > { %v2494_v29 = vpop.f32.mrf.mxu2  ;;  %v2438_v62 = vpop.f32.mrf.mxu0 }
 0x214   : > { %v2495_v43 = vadd.f32 %v2494_v29, %v2466_v55  ;;  %v2467_v58 = vpop.f32.mrf.mxu1 }
 0x215   : > { %v2468_v2 = vadd.f32 %v2467_v58, %v2438_v62  ;;  %v2523_v44 = vpop.f32.mrf.mxu3 }
 0x216   : > { %v2524_v22 = vadd.f32 %v2523_v44, %v2495_v43 }
 0x218   : > { %v7342_v7 = vadd.f32 %v2524_v22, %v7005_v32 }
 0x21b   : > { %v2496_v24 = vpop.f32.mrf.mxu2  ;;  %v2441_v40 = vpop.f32.mrf.mxu0 }
 0x21c   : > { %v2497_v59 = vadd.f32 %v2496_v24, %v2468_v2  ;;  %v2470_v42 = vpop.f32.mrf.mxu1 }
 0x21d   : > { %v2471_v1 = vadd.f32 %v2470_v42, %v2441_v40  ;;  %v2525_v36 = vpop.f32.mrf.mxu3 }
 0x21e   : > { %3137 = vmatmul.bf16.gmra.mxu0 %v7290_v8  ;;  %v2526_v0 = vadd.f32 %v2525_v36, %v2497_v59 }
 0x21f   : > { %3166 = vmatmul.bf16.gmra.mxu1 %v7294_v31 }
 0x220   : > { %3195 = vmatmul.bf16.gmra.mxu2 %v7298_v19  ;;  %v7348_v41 = vadd.f32 %v2526_v0, %v7036_v20 }
 0x221   : > { %3224 = vmatmul.bf16.gmra.mxu3 %v7305_v46 }
 0x223   : > { %v2499_v12 = vpop.f32.mrf.mxu2  ;;  %v2443_v56 = vpop.f32.mrf.mxu0 }
 0x224   : > { %v2500_v32 = vadd.f32 %v2499_v12, %v2471_v1  ;;  %v2472_v15 = vpop.f32.mrf.mxu1 }
 0x225   : > { %v2473_v27 = vadd.f32 %v2472_v15, %v2443_v56  ;;  %v2528_v39 = vpop.f32.mrf.mxu3 }
 0x226   : > { %v2529_v35 = vadd.f32 %v2528_v39, %v2500_v32 }
 0x228   : > { %v7352_v8 = vadd.f32 %v2529_v35, %v7065_v47 }
 0x22b   : > { %v2501_v63 = vpop.f32.mrf.mxu2  ;;  %v3007_v31 = vpop.f32.mrf.mxu0 }
 0x22c   : > { %v2502_v34 = vadd.f32 %v2501_v63, %v2473_v27  ;;  %v3036_v60 = vpop.f32.mrf.mxu1 }
 0x22d   : > { %v3037_v19 = vadd.f32 %v3036_v60, %v3007_v31  ;;  %v2530_v5 = vpop.f32.mrf.mxu3 }
 0x22e   : > { %v2531_v20 = vadd.f32 %v2530_v5, %v2502_v34 }
 0x230   : > { %v7355_v30 = vadd.f32 %v2531_v20, %v7096_v54 }
 0x233   : > { %v3065_v49 = vpop.f32.mrf.mxu2  ;;  %v3009_v46 = vpop.f32.mrf.mxu0 }
 0x234   : > { %v3066_v4 = vadd.f32 %v3065_v49, %v3037_v19  ;;  %v3038_v45 = vpop.f32.mrf.mxu1 }
 0x235   : > { %v3039_v38 = vadd.f32 %v3038_v45, %v3009_v46  ;;  %v3094_v10 = vpop.f32.mrf.mxu3 }
 0x236   : > { %v3095_v53 = vadd.f32 %v3094_v10, %v3066_v4 }
 0x238   : > { %v7358_v47 = vadd.f32 %v3095_v53, %v7124_v14 }
 0x23b   : > { %v3067_v50 = vpop.f32.mrf.mxu2  ;;  %v3012_v25 = vpop.f32.mrf.mxu0 }
 0x23c   : > { %v3068_v28 = vadd.f32 %v3067_v50, %v3039_v38  ;;  %v3041_v57 = vpop.f32.mrf.mxu1 }
 0x23d   : > { %v3042_v52 = vadd.f32 %v3041_v57, %v3012_v25  ;;  %v3096_v51 = vpop.f32.mrf.mxu3 }
 0x23e   : > { %v3097_v21 = vadd.f32 %v3096_v51, %v3068_v28 }
 0x240   : > { %v7361_v54 = vadd.f32 %v3097_v21, %v7178_v16 }
 0x243   : > { %v3070_v26 = vpop.f32.mrf.mxu2  ;;  %v3014_v55 = vpop.f32.mrf.mxu0 }
 0x244   : > { %v3071_v61 = vadd.f32 %v3070_v26, %v3042_v52  ;;  %v3043_v33 = vpop.f32.mrf.mxu1 }
 0x245   : > { %v3044_v29 = vadd.f32 %v3043_v33, %v3014_v55  ;;  %v3099_v62 = vpop.f32.mrf.mxu3 }
 0x246   : > { %v3100_v43 = vadd.f32 %v3099_v62, %v3071_v61 }
 0x248   : > { %v7364_v14 = vadd.f32 %v3100_v43, %v7212_v18 }
 0x24b   : > { %v3072_v58 = vpop.f32.mrf.mxu2  ;;  %v3017_v2 = vpop.f32.mrf.mxu0 }
 0x24c   : > { %v3073_v44 = vadd.f32 %v3072_v58, %v3044_v29  ;;  %v3046_v22 = vpop.f32.mrf.mxu1 }
 0x24d   : > { %v3047_v24 = vadd.f32 %v3046_v22, %v3017_v2  ;;  %v3101_v40 = vpop.f32.mrf.mxu3 }
 0x24e   : > { %v3102_v59 = vadd.f32 %v3101_v40, %v3073_v44 }
 0x250   : > { %v7367_v16 = vadd.f32 %v3102_v59, %v7278_v48  ;;  %v3248_v59 = vmul.f32 0.2, %v7361_v54 }
 0x253   : > { %v3075_v42 = vpop.f32.mrf.mxu2  ;;  %v3019_v1 = vpop.f32.mrf.mxu0 }
 0x254   : > { %v3076_v36 = vadd.f32 %v3075_v42, %v3047_v24  ;;  %v3048_v0 = vpop.f32.mrf.mxu1 }
 0x255   : > { %v3049_v12 = vadd.f32 %v3048_v0, %v3019_v1  ;;  %v3104_v56 = vpop.f32.mrf.mxu3 }
 0x256   : > { %v3105_v32 = vadd.f32 %v3104_v56, %v3076_v36  ;;  %v3264_v56 = vmax.f32 %v7361_v54, %v3248_v59 }
 0x258   : > { %v7370_v18 = vadd.f32 %v3105_v32, %v7286_v23 }
 0x25b   : > { %v3077_v15 = vpop.f32.mrf.mxu2  ;;  %v3022_v27 = vpop.f32.mrf.mxu0 }
 0x25c   : > { %v3078_v39 = vadd.f32 %v3077_v15, %v3049_v12  ;;  %v3051_v35 = vpop.f32.mrf.mxu1 }
 0x25d   : > { %v3052_v63 = vadd.f32 %v3051_v35, %v3022_v27  ;;  %v3106_v31 = vpop.f32.mrf.mxu3  ;;  %v3250_v35 = vmul.f32 0.2, %v7364_v14 }
 0x25e   : > { %v3107_v34 = vadd.f32 %v3106_v31, %v3078_v39 }
 0x260   : > { %v7373_v48 = vadd.f32 %v3107_v34, %v7308_v17 }
 0x263   : > { %v3080_v60 = vpop.f32.mrf.mxu2  ;;  %v3024_v19 = vpop.f32.mrf.mxu0 }
 0x264   : > { %v3081_v5 = vadd.f32 %v3080_v60, %v3052_v63  ;;  %v3053_v20 = vpop.f32.mrf.mxu1 }
 0x265   : > { %v3054_v49 = vadd.f32 %v3053_v20, %v3024_v19  ;;  %v3109_v46 = vpop.f32.mrf.mxu3  ;;  %v3266_v20 = vmax.f32 %v7364_v14, %v3250_v35 }
 0x266   : > { %v3110_v4 = vadd.f32 %v3109_v46, %v3081_v5 }
 0x268   : > { %v7376_v23 = vadd.f32 %v3110_v4, %v7312_v9  ;;  %v3246_v9 = vmul.f32 0.2, %v7358_v47 }
 0x26b   : > { %v3082_v45 = vpop.f32.mrf.mxu2  ;;  %v3123_v38 = vpop.f32.mrf.mxu0 }
 0x26c   : > { %v3083_v10 = vadd.f32 %v3082_v45, %v3054_v49  ;;  %v3152_v53 = vpop.f32.mrf.mxu1 }
 0x26d   : > { %v3111_v50 = vpop.f32.mrf.mxu3  ;;  %v3153_v28 = vadd.f32 %v3152_v53, %v3123_v38  ;;  %v3252_v38 = vmul.f32 0.2, %v7367_v16 }
 0x26e   : > { %v3112_v25 = vadd.f32 %v3111_v50, %v3083_v10 }
 0x270   : > { %v7379_v17 = vadd.f32 %v3112_v25, %v7318_v3  ;;  %v3262_v3 = vmax.f32 %v7358_v47, %v3246_v9 }
 0x273   : > { %v3181_v57 = vpop.f32.mrf.mxu2  ;;  %v3125_v52 = vpop.f32.mrf.mxu0 }
 0x274   : > { %v3182_v51 = vadd.f32 %v3181_v57, %v3153_v28  ;;  %v3154_v21 = vpop.f32.mrf.mxu1  ;;  %v3268_v57 = vmax.f32 %v7367_v16, %v3252_v38 }
 0x275   : > { %v3210_v26 = vpop.f32.mrf.mxu3  ;;  %v3155_v33 = vadd.f32 %v3154_v21, %v3125_v52 }
 0x276   : > { %v3211_v55 = vadd.f32 %v3210_v26, %v3182_v51  ;;  %v3254_v26 = vmul.f32 0.2, %v7370_v18 }
 0x278   : > { %v3231_v61 = vadd.f32 %v3211_v55, %v7322_v37 }
 0x27a   : > { %v3247_v43 = vmul.f32 0.2, %v3231_v61 }
 0x27b   : > { %v3183_v29 = vpop.f32.mrf.mxu2  ;;  %v3128_v62 = vpop.f32.mrf.mxu0 }
 0x27c   : > { %v3184_v58 = vadd.f32 %v3183_v29, %v3155_v33  ;;  %v3157_v2 = vpop.f32.mrf.mxu1  ;;  %v3263_v44 = vmax.f32 %v3231_v61, %v3247_v43  ;;  %v3270_v43 = vmax.f32 %v7370_v18, %v3254_v26 }
 0x27d   : > { %v3212_v22 = vpop.f32.mrf.mxu3  ;;  %v3158_v37 = vadd.f32 %v3157_v2, %v3128_v62 }
 0x27e   : > { %v3278_v24 = vpack.c.bf16 %v3263_v44, %v3262_v3  ;;  %v3213_v40 = vadd.f32 %v3212_v22, %v3184_v58  ;;  %v3256_v22 = vmul.f32 0.2, %v7373_v48 }
 0x280   : > { %3286 = vst [vmem:[%s7388_s11] sm:$0xff] %v3278_v24  ;;  %v3233_v42 = vadd.f32 %v3213_v40, %v7328_v6  ;;  %v3272_v59 = vmax.f32 %v7373_v48, %v3256_v22 }
 0x282   : > { %v3249_v47 = vmul.f32 0.2, %v3233_v42 }
 0x283   : > { %v3186_v1 = vpop.f32.mrf.mxu2  ;;  %v3130_v36 = vpop.f32.mrf.mxu0 }
 0x284   : > { %v3187_v0 = vadd.f32 %v3186_v1, %v3158_v37  ;;  %v3159_v12 = vpop.f32.mrf.mxu1  ;;  %v3265_v32 = vmax.f32 %v3233_v42, %v3249_v47 }
 0x285   : > { %v3215_v15 = vpop.f32.mrf.mxu3  ;;  %v3160_v31 = vadd.f32 %v3159_v12, %v3130_v36  ;;  %v3258_v12 = vmul.f32 0.2, %v7376_v23 }
 0x286   : > { %v3279_v27 = vpack.c.bf16 %v3265_v32, %v3264_v56  ;;  %v3216_v39 = vadd.f32 %v3215_v15, %v3187_v0 }
 0x288   : > { %3287 = vst [vmem:[%s7388_s11 + $0x8] sm:$0xff] %v3279_v27  ;;  %v3235_v63 = vadd.f32 %v3216_v39, %v7332_v13  ;;  %v3274_v39 = vmax.f32 %v7376_v23, %v3258_v12 }
 0x28a   : > { %v3251_v60 = vmul.f32 0.2, %v3235_v63 }
 0x28b   : > { %v3188_v34 = vpop.f32.mrf.mxu2  ;;  %v3133_v6 = vpop.f32.mrf.mxu0 }
 0x28c   : > { %v3189_v19 = vadd.f32 %v3188_v34, %v3160_v31  ;;  %v3162_v5 = vpop.f32.mrf.mxu1  ;;  %v3267_v49 = vmax.f32 %v3235_v63, %v3251_v60  ;;  %v3260_v34 = vmul.f32 0.2, %v7379_v17 }
 0x28d   : > { %v3217_v54 = vpop.f32.mrf.mxu3  ;;  %v3163_v45 = vadd.f32 %v3162_v5, %v3133_v6 }
 0x28e   : > { %v3280_v46 = vpack.c.bf16 %v3267_v49, %v3266_v20  ;;  %v3218_v4 = vadd.f32 %v3217_v54, %v3189_v19  ;;  %v3276_v19 = vmax.f32 %v7379_v17, %v3260_v34 }
 0x290   : > { %3288 = vst [vmem:[%s7388_s11 + $0x10] sm:$0xff] %v3280_v46  ;;  %v3237_v10 = vadd.f32 %v3218_v4, %v7338_v11 }
 0x292   : > { %v3253_v50 = vmul.f32 0.2, %v3237_v10 }
 0x293   : > { %v3191_v13 = vpop.f32.mrf.mxu2  ;;  %v3135_v53 = vpop.f32.mrf.mxu0 }
 0x294   : > { %v3192_v25 = vadd.f32 %v3191_v13, %v3163_v45  ;;  %v3164_v28 = vpop.f32.mrf.mxu1  ;;  %v3269_v52 = vmax.f32 %v3237_v10, %v3253_v50 }
 0x295   : > { %v3220_v14 = vpop.f32.mrf.mxu3  ;;  %v3165_v9 = vadd.f32 %v3164_v28, %v3135_v53 }
 0x296   : > { %v3281_v51 = vpack.c.bf16 %v3269_v52, %v3268_v57  ;;  %v3221_v21 = vadd.f32 %v3220_v14, %v3192_v25 }
 0x298   : > { %3289 = vst [vmem:[%s7388_s11 + $0x18] sm:$0xff] %v3281_v51  ;;  %v3239_v55 = vadd.f32 %v3221_v21, %v7342_v7 }
 0x29a   : > { %v3255_v11 = vmul.f32 0.2, %v3239_v55 }
 0x29b   : > { %v3193_v61 = vpop.f32.mrf.mxu2  ;;  %v3138_v29 = vpop.f32.mrf.mxu0 }
 0x29c   : > { %v3194_v33 = vadd.f32 %v3193_v61, %v3165_v9  ;;  %v3167_v62 = vpop.f32.mrf.mxu1  ;;  %v3271_v58 = vmax.f32 %v3239_v55, %v3255_v11 }
 0x29d   : > { %v3222_v16 = vpop.f32.mrf.mxu3  ;;  %v3168_v44 = vadd.f32 %v3167_v62, %v3138_v29 }
 0x29e   : > { %v3282_v2 = vpack.c.bf16 %v3271_v58, %v3270_v43  ;;  %v3223_v3 = vadd.f32 %v3222_v16, %v3194_v33 }
 0x2a0   : > { %3290 = vst [vmem:[%s7388_s11 + $0x20] sm:$0xff] %v3282_v2  ;;  %v3241_v24 = vadd.f32 %v3223_v3, %v7348_v41 }
 0x2a2   : > { %v3257_v40 = vmul.f32 0.2, %v3241_v24 }
 0x2a3   : > { %v3196_v7 = vpop.f32.mrf.mxu2  ;;  %v3140_v1 = vpop.f32.mrf.mxu0 }
 0x2a4   : > { %v3197_v37 = vadd.f32 %v3196_v7, %v3168_v44  ;;  %v3273_v42 = vmax.f32 %v3241_v24, %v3257_v40  ;;  %v3169_v18 = vpop.f32.mrf.mxu1 }
 0x2a5   : > { %v3225_v36 = vpop.f32.mrf.mxu3  ;;  %v3170_v32 = vadd.f32 %v3169_v18, %v3140_v1 }
 0x2a6   : > { %v3283_v47 = vpack.c.bf16 %v3273_v42, %v3272_v59  ;;  %v3226_v0 = vadd.f32 %v3225_v36, %v3197_v37 }
 0x2a8   : > { %3291 = vst [vmem:[%s7388_s11 + $0x28] sm:$0xff] %v3283_v47  ;;  %v3243_v56 = vadd.f32 %v3226_v0, %v7352_v8 }
 0x2aa   : > { %v3259_v15 = vmul.f32 0.2, %v3243_v56 }
 0x2ab   : > { %v3198_v41 = vpop.f32.mrf.mxu2 }
 0x2ac   : > { %v3199_v27 = vadd.f32 %v3198_v41, %v3170_v32  ;;  %v3275_v48 = vmax.f32 %v3243_v56, %v3259_v15 }
 0x2ad   : > { %v3227_v35 = vpop.f32.mrf.mxu3 }
 0x2ae   : > { %v3284_v63 = vpack.c.bf16 %v3275_v48, %v3274_v39  ;;  %v3228_v31 = vadd.f32 %v3227_v35, %v3199_v27 }
 0x2b0   : > { %3292 = vst [vmem:[%s7388_s11 + $0x30] sm:$0xff] %v3284_v63  ;;  %v3245_v6 = vadd.f32 %v3228_v31, %v7355_v30 }
 0x2b2   : > { %v3261_v60 = vmul.f32 0.2, %v3245_v6 }
 0x2b4   : > { %v3277_v8 = vmax.f32 %v3245_v6, %v3261_v60 }
 0x2b6   : > { %v3285_v5 = vpack.c.bf16 %v3277_v8, %v3276_v19 }
 0x2b8   : > { %3293 = vst [vmem:[%s7388_s11 + $0x38] sm:$0xff] %v3285_v5 }
 0x2b9 PF: > { %s13_s14 = sadd.s32 1, %s4913_s14   ;;  %s7542_s12 = smov %s4909_s13 }
 0x2ba   : > { %p10_p5 = scmp.ge.s32.totalorder %s13_s14, 4   ;;  %s7543_s13 = smov %s7545_s15 }
 0x2bc   :  { %12 = sbr.rel (!%p10_p5) target bundleno = 2 (0x2), region = 66 }

// kernel: feat_map_forward.5
= control target key start
LH: loop header
LB: loop body
LE: loop exit
PB: predicated region body
PF: predicated region fallthrough
CT: control target
= control target key end

     0   :  { %8 = vsyncpa [#allocation3], 0  ;;  %s2248_s12 = smov 0   ;;  %s2411_s0 = inlined_call_operand.vmem [shape: bf16[2,16384], index: 0, kind: input, shape index: {}]   ;;  %s2412_s1 = inlined_call_operand.vmem [shape: bf16[16384,32], index: 1, kind: input, shape index: {}]   ;;  %s2413_s2 = inlined_call_operand.vmem [shape: f32[1,32], index: 2, kind: input, shape index: {}]   ;;  %s2414_s3 = inlined_call_operand.hbm [shape: f32[2,32], index: 3, kind: output, shape index: {}]  }
   0x1 LB: > { %s2254_s13 = sadd.s32 4294967295, %s2225_s12   ;;  %p1522_p0 = scmp.ge.s32.totalorder %s2225_s12, 1  ;;  %s2225_s12 = sphi %s2248_s12, %s14_s12  }
   0x2   : > { %p144_p1 = scmp.lt.s32.totalorder %s2225_s12, 9 }
   0x4   : > { %p145_p2 = pnand %p1522_p0, %p144_p1 }
   0x5   : > { %s1523_s14 = sshll.u32 (!%p145_p2), %s2254_s13, 4  ;;  %s1524_s15 = sshll.u32 (!%p145_p2), %s2254_s13, 8 }
   0x6   : > { %148 = sbr.rel (%p145_p2) target bundleno = 293 (0x125), region = 32  ;;  %p168_p3 = scmp.lt.s32.totalorder (!%p145_p2), %s1523_s14, 127 }
   0x7   : > { %p173_p4 = scmp.lt.s32.totalorder (!%p145_p2), %s1524_s15, 2047  ;;  %p1526_p5 = scmp.ne.s32.totalorder (!%p145_p2), %s2254_s13, 0 }
   0xb   : > { %s2416_s14 = smov (!%p168_p3, %s1523_s14), 127  ;;  %s2418_s15 = smov (!%p173_p4, %s1524_s15), 2047 }
   0xc   : > { %s2263_s18 = scalar_lea.vmem %s2411_s0, %s2416_s14  ;;  %s1525_s19 = sshll.u32 %s2418_s15, 2 }
   0xd   : > { %s2268_s22 = scalar_lea.vmem %s2412_s1, %s1525_s19  ;;  %181 = sbr.rel (%p1526_p5) target bundleno = 20 (0x14), region = 36 }
  0x12   : > { %v2186_v0 = vld [vmem:[%s2413_s2] ss:$0 sm:$0xff]  ;;  %vm186_vm0 = vcmask 254976  }
  0x13   : > { %187 = vst.msk [vmem:[#allocation2] sm:$0x3] %vm186_vm0, %v2186_v0 }
  0x14 PF: > { %v2050_v1 = vld [vmem:[%s2268_s22 + $0x38] sm:$0xff]  ;;  %v2049_v5 = vld [vmem:[%s2268_s22 + $0x30] sm:$0xff]  ;;  %v2048_v9 = vld [vmem:[%s2268_s22 + $0x28] sm:$0xff]  ;;  %s2227_s25 = smov [#allocation2]   ;;  %s1470_s29 = sshll.u32 %s2414_s3, 4  ;;  %vm1460_vm1 = vcmask 254976   ;;  %s1471_s29 = int_to_ptr.hbm [resolvable:$true] %s1470_s29 }
  0x15   : > { %v2058_v2 = vld [vmem:[%s2268_s22 + $0x78] sm:$0xff]  ;;  %1251 = vmatpush.bf16.msra.mxu0 %v2050_v1  ;;  %v2057_v6 = vld [vmem:[%s2268_s22 + $0x70] sm:$0xff]  ;;  %v2056_v10 = vld [vmem:[%s2268_s22 + $0x68] sm:$0xff]  ;;  %s1468_s26 = sshll.u32 %s2227_s25, 4  ;;  %p2175_p6 = scmp.eq.s32.totalorder %s2254_s13, 7  ;;  %s1469_s26 = int_to_ptr.vmem [resolvable:$true] %s1468_s26 }
  0x16   : > { %v2066_v3 = vld [vmem:[%s2268_s22 + $0xb8] sm:$0xff]  ;;  %1264 = vmatpush.bf16.msra.mxu1 %v2058_v2  ;;  %v2065_v7 = vld [vmem:[%s2268_s22 + $0xb0] sm:$0xff]  ;;  %v2064_v11 = vld [vmem:[%s2268_s22 + $0xa8] sm:$0xff] }
  0x17   : > { %v2074_v4 = vld [vmem:[%s2268_s22 + $0xf8] sm:$0xff]  ;;  %1277 = vmatpush.bf16.msra.mxu2 %v2066_v3  ;;  %v2073_v8 = vld [vmem:[%s2268_s22 + $0xf0] sm:$0xff]  ;;  %v2072_v12 = vld [vmem:[%s2268_s22 + $0xe8] sm:$0xff] }
  0x18   : > { %1290 = vmatpush.bf16.msra.mxu3 %v2074_v4  ;;  %v2047_v13 = vld [vmem:[%s2268_s22 + $0x20] sm:$0xff]  ;;  %v2046_v17 = vld [vmem:[%s2268_s22 + $0x18] sm:$0xff]  ;;  %v2045_v22 = vld [vmem:[%s2268_s22 + $0x10] sm:$0xff] }
  0x19   : > { %1252 = vmatpush.bf16.msra.mxu0 %v2049_v5  ;;  %v2055_v14 = vld [vmem:[%s2268_s22 + $0x60] sm:$0xff]  ;;  %v2054_v18 = vld [vmem:[%s2268_s22 + $0x58] sm:$0xff]  ;;  %v2053_v23 = vld [vmem:[%s2268_s22 + $0x50] sm:$0xff] }
  0x1a   : > { %1265 = vmatpush.bf16.msra.mxu1 %v2057_v6  ;;  %v2063_v15 = vld [vmem:[%s2268_s22 + $0xa0] sm:$0xff]  ;;  %v2062_v19 = vld [vmem:[%s2268_s22 + $0x98] sm:$0xff]  ;;  %v2061_v24 = vld [vmem:[%s2268_s22 + $0x90] sm:$0xff] }
  0x1b   : > { %1278 = vmatpush.bf16.msra.mxu2 %v2065_v7  ;;  %v2071_v16 = vld [vmem:[%s2268_s22 + $0xe0] sm:$0xff]  ;;  %v2070_v20 = vld [vmem:[%s2268_s22 + $0xd8] sm:$0xff]  ;;  %v2069_v25 = vld [vmem:[%s2268_s22 + $0xd0] sm:$0xff] }
  0x1c   : > { %1291 = vmatpush.bf16.msra.mxu3 %v2073_v8  ;;  %v189_v21 = vld [vmem:[%s2263_s18] sm:$0xff]  ;;  %v2044_v26 = vld [vmem:[%s2268_s22 + $0x8] sm:$0xff]  ;;  %v2082_v34 = vld [vmem:[%s2268_s22 + $0x138] sm:$0xff] }
  0x1d   : > { %1253 = vmatpush.bf16.msra.mxu0 %v2048_v9  ;;  %448 = vst [vmem:[#allocation1] ss:$9 sm:$0xff] %v189_v21  ;;  %v2052_v27 = vld [vmem:[%s2268_s22 + $0x48] sm:$0xff]  ;;  %v2043_v30 = vld [vmem:[%s2268_s22] sm:$0xff]  ;;  %v2090_v35 = vld [vmem:[%s2268_s22 + $0x178] sm:$0xff] }
  0x1e   : > { %1266 = vmatpush.bf16.msra.mxu1 %v2056_v10  ;;  %v2060_v28 = vld [vmem:[%s2268_s22 + $0x88] sm:$0xff]  ;;  %v2051_v31 = vld [vmem:[%s2268_s22 + $0x40] sm:$0xff]  ;;  %v2098_v36 = vld [vmem:[%s2268_s22 + $0x1b8] sm:$0xff] }
  0x1f   : > { %1279 = vmatpush.bf16.msra.mxu2 %v2064_v11  ;;  %v2068_v29 = vld [vmem:[%s2268_s22 + $0xc8] sm:$0xff]  ;;  %v2059_v32 = vld [vmem:[%s2268_s22 + $0x80] sm:$0xff]  ;;  %v2106_v37 = vld [vmem:[%s2268_s22 + $0x1f8] sm:$0xff] }
  0x20   : > { %1292 = vmatpush.bf16.msra.mxu3 %v2072_v12  ;;  %v2067_v33 = vld [vmem:[%s2268_s22 + $0xc0] sm:$0xff]  ;;  %v2081_v38 = vld [vmem:[%s2268_s22 + $0x130] sm:$0xff]  ;;  %v2080_v46 = vld [vmem:[%s2268_s22 + $0x128] sm:$0xff] }
  0x21   : > { %1254 = vmatpush.bf16.msra.mxu0 %v2047_v13  ;;  %v2089_v41 = vld [vmem:[%s2268_s22 + $0x170] sm:$0xff]  ;;  %v2088_v47 = vld [vmem:[%s2268_s22 + $0x168] sm:$0xff]  ;;  %v2079_v55 = vld [vmem:[%s2268_s22 + $0x120] sm:$0xff] }
  0x22   : > { %1267 = vmatpush.bf16.msra.mxu1 %v2055_v14  ;;  %v2097_v44 = vld [vmem:[%s2268_s22 + $0x1b0] sm:$0xff]  ;;  %v2096_v48 = vld [vmem:[%s2268_s22 + $0x1a8] sm:$0xff]  ;;  %v2087_v56 = vld [vmem:[%s2268_s22 + $0x160] sm:$0xff] }
  0x23   : > { %1280 = vmatpush.bf16.msra.mxu2 %v2063_v15  ;;  %v2105_v45 = vld [vmem:[%s2268_s22 + $0x1f0] sm:$0xff]  ;;  %v2104_v49 = vld [vmem:[%s2268_s22 + $0x1e8] sm:$0xff]  ;;  %v2095_v57 = vld [vmem:[%s2268_s22 + $0x1a0] sm:$0xff] }
  0x24   : > { %1293 = vmatpush.bf16.msra.mxu3 %v2071_v16  ;;  %v451_v39 = vld [vmem:[#allocation1 + $0x12] sm:$0xff]  ;;  %v449_v40 = vld [vmem:[#allocation1] sm:$0xff]  ;;  %v450_v43 = vld [vmem:[#allocation1 + $0x9] sm:$0xff] }
  0x25   : > { %1255 = vmatpush.bf16.msra.mxu0 %v2046_v17  ;;  %v452_v42 = vld [vmem:[#allocation1 + $0x1b] sm:$0xff]  ;;  %v453_v51 = vld [vmem:[#allocation1 + $0x24] sm:$0xff]  ;;  %v454_v54 = vld [vmem:[#allocation1 + $0x2d] sm:$0xff] }
  0x26   : > { %1268 = vmatpush.bf16.msra.mxu1 %v2054_v18  ;;  %v455_v50 = vld [vmem:[#allocation1 + $0x36] sm:$0xff]  ;;  %v456_v52 = vld [vmem:[#allocation1 + $0x3f] sm:$0xff]  ;;  %v190_v53 = vld [vmem:[%s2263_s18 + $0x8] sm:$0xff] }
  0x27   : > { %1281 = vmatpush.bf16.msra.mxu2 %v2062_v19  ;;  %458 = vst [vmem:[#allocation1] ss:$9 sm:$0xff] %v190_v53  ;;  %v2103_v58 = vld [vmem:[%s2268_s22 + $0x1e0] sm:$0xff]  ;;  %v2078_v59 = vld [vmem:[%s2268_s22 + $0x118] sm:$0xff]  ;;  %v2077_v63 = vld [vmem:[%s2268_s22 + $0x110] sm:$0xff] }
  0x28   : > { %1294 = vmatpush.bf16.msra.mxu3 %v2070_v20  ;;  %v2086_v60 = vld [vmem:[%s2268_s22 + $0x158] sm:$0xff]  ;;  %v2085_v0 = vld [vmem:[%s2268_s22 + $0x150] sm:$0xff]  ;;  %v2076_v3 = vld [vmem:[%s2268_s22 + $0x108] sm:$0xff] }
  0x29   : > { %1256 = vmatpush.bf16.msra.mxu0 %v2045_v22  ;;  %v2094_v61 = vld [vmem:[%s2268_s22 + $0x198] sm:$0xff]  ;;  %v2093_v1 = vld [vmem:[%s2268_s22 + $0x190] sm:$0xff]  ;;  %v2084_v4 = vld [vmem:[%s2268_s22 + $0x148] sm:$0xff] }
  0x2a   : > { %1269 = vmatpush.bf16.msra.mxu1 %v2053_v23  ;;  %v2102_v62 = vld [vmem:[%s2268_s22 + $0x1d8] sm:$0xff]  ;;  %v2101_v2 = vld [vmem:[%s2268_s22 + $0x1d0] sm:$0xff]  ;;  %v2092_v5 = vld [vmem:[%s2268_s22 + $0x188] sm:$0xff] }
  0x2b   : > { %1282 = vmatpush.bf16.msra.mxu2 %v2061_v24  ;;  %v2100_v6 = vld [vmem:[%s2268_s22 + $0x1c8] sm:$0xff]  ;;  %v2075_v7 = vld [vmem:[%s2268_s22 + $0x100] sm:$0xff]  ;;  %v2114_v11 = vld [vmem:[%s2268_s22 + $0x238] sm:$0xff] }
  0x2c   : > { %1295 = vmatpush.bf16.msra.mxu3 %v2069_v25  ;;  %v2083_v8 = vld [vmem:[%s2268_s22 + $0x140] sm:$0xff]  ;;  %v2122_v12 = vld [vmem:[%s2268_s22 + $0x278] sm:$0xff]  ;;  %v2113_v15 = vld [vmem:[%s2268_s22 + $0x230] sm:$0xff] }
  0x2d   : > { %1257 = vmatpush.bf16.msra.mxu0 %v2044_v26  ;;  %v2091_v9 = vld [vmem:[%s2268_s22 + $0x180] sm:$0xff]  ;;  %v2130_v13 = vld [vmem:[%s2268_s22 + $0x2b8] sm:$0xff]  ;;  %v2121_v16 = vld [vmem:[%s2268_s22 + $0x270] sm:$0xff] }
  0x2e   : > { %1270 = vmatpush.bf16.msra.mxu1 %v2052_v27  ;;  %v2099_v10 = vld [vmem:[%s2268_s22 + $0x1c0] sm:$0xff]  ;;  %v2138_v14 = vld [vmem:[%s2268_s22 + $0x2f8] sm:$0xff]  ;;  %v2129_v17 = vld [vmem:[%s2268_s22 + $0x2b0] sm:$0xff] }
  0x2f   : > { %1283 = vmatpush.bf16.msra.mxu2 %v2060_v28  ;;  %v2137_v18 = vld [vmem:[%s2268_s22 + $0x2f0] sm:$0xff]  ;;  %v2112_v19 = vld [vmem:[%s2268_s22 + $0x228] sm:$0xff]  ;;  %v2111_v23 = vld [vmem:[%s2268_s22 + $0x220] sm:$0xff] }
  0x30   : > { %1296 = vmatpush.bf16.msra.mxu3 %v2068_v29  ;;  %v2120_v20 = vld [vmem:[%s2268_s22 + $0x268] sm:$0xff]  ;;  %v2119_v24 = vld [vmem:[%s2268_s22 + $0x260] sm:$0xff]  ;;  %v2110_v27 = vld [vmem:[%s2268_s22 + $0x218] sm:$0xff] }
  0x31   : > { %1258 = vmatpush.bf16.msra.mxu0 %v2043_v30  ;;  %v2128_v21 = vld [vmem:[%s2268_s22 + $0x2a8] sm:$0xff]  ;;  %v2127_v25 = vld [vmem:[%s2268_s22 + $0x2a0] sm:$0xff]  ;;  %v2118_v28 = vld [vmem:[%s2268_s22 + $0x258] sm:$0xff] }
  0x32   : > { %1271 = vmatpush.bf16.msra.mxu1 %v2051_v31  ;;  %v2136_v22 = vld [vmem:[%s2268_s22 + $0x2e8] sm:$0xff]  ;;  %v2135_v26 = vld [vmem:[%s2268_s22 + $0x2e0] sm:$0xff]  ;;  %v2126_v29 = vld [vmem:[%s2268_s22 + $0x298] sm:$0xff] }
  0x33   : > { %1284 = vmatpush.bf16.msra.mxu2 %v2059_v32  ;;  %v2134_v30 = vld [vmem:[%s2268_s22 + $0x2d8] sm:$0xff]  ;;  %v2109_v31 = vld [vmem:[%s2268_s22 + $0x210] sm:$0xff] }
  0x34   : > { %1297 = vmatpush.bf16.msra.mxu3 %v2067_v33  ;;  %1259 = vmatmul.bf16.vlgmr.msra.gmra.mxu0 %v449_v40  ;;  %v2117_v32 = vld [vmem:[%s2268_s22 + $0x250] sm:$0xff]  ;;  %v2115_v40 = vld [vmem:[%s2268_s22 + $0x240] sm:$0xff] }
  0x35   : > { %1303 = vmatpush.bf16.msrb.mxu0 %v2082_v34  ;;  %1272 = vmatmul.bf16.vlgmr.msra.gmra.mxu1 %v450_v43  ;;  %v2125_v33 = vld [vmem:[%s2268_s22 + $0x290] sm:$0xff]  ;;  %v2146_v43 = vld [vmem:[%s2268_s22 + $0x338] sm:$0xff] }
  0x36   : > { %1316 = vmatpush.bf16.msrb.mxu1 %v2090_v35  ;;  %1285 = vmatmul.bf16.vlgmr.msra.gmra.mxu2 %v451_v39  ;;  %v2133_v34 = vld [vmem:[%s2268_s22 + $0x2d0] sm:$0xff]  ;;  %v2108_v35 = vld [vmem:[%s2268_s22 + $0x208] sm:$0xff]  ;;  %v2107_v39 = vld [vmem:[%s2268_s22 + $0x200] sm:$0xff] }
  0x37   : > { %1329 = vmatpush.bf16.msrb.mxu2 %v2098_v36  ;;  %1298 = vmatmul.bf16.vlgmr.msra.gmra.mxu3 %v452_v42  ;;  %v2116_v36 = vld [vmem:[%s2268_s22 + $0x248] sm:$0xff]  ;;  %v2131_v42 = vld [vmem:[%s2268_s22 + $0x2c0] sm:$0xff]  ;;  %v2161_v53 = vld [vmem:[%s2268_s22 + $0x3b0] sm:$0xff] }
  0x38   : > { %1342 = vmatpush.bf16.msrb.mxu3 %v2106_v37  ;;  %v2124_v37 = vld [vmem:[%s2268_s22 + $0x288] sm:$0xff] }
  0x39   : > { %1304 = vmatpush.bf16.msrb.mxu0 %v2081_v38  ;;  %v2132_v38 = vld [vmem:[%s2268_s22 + $0x2c8] sm:$0xff] }
  0x3a   : > { %1317 = vmatpush.bf16.msrb.mxu1 %v2089_v41  ;;  %v2123_v41 = vld [vmem:[%s2268_s22 + $0x280] sm:$0xff] }
  0x3b   : > { %1330 = vmatpush.bf16.msrb.mxu2 %v2097_v44  ;;  %v2154_v44 = vld [vmem:[%s2268_s22 + $0x378] sm:$0xff] }
  0x3c   : > { %1343 = vmatpush.bf16.msrb.mxu3 %v2105_v45  ;;  %v2162_v45 = vld [vmem:[%s2268_s22 + $0x3b8] sm:$0xff] }
  0x3d   : > { %1305 = vmatpush.bf16.msrb.mxu0 %v2080_v46  ;;  %v2170_v46 = vld [vmem:[%s2268_s22 + $0x3f8] sm:$0xff] }
  0x3e   : > { %1318 = vmatpush.bf16.msrb.mxu1 %v2088_v47  ;;  %v459_v47 = vld [vmem:[#allocation1] sm:$0xff] }
  0x3f   : > { %1331 = vmatpush.bf16.msrb.mxu2 %v2096_v48  ;;  %v461_v48 = vld [vmem:[#allocation1 + $0x12] sm:$0xff] }
  0x40   : > { %1344 = vmatpush.bf16.msrb.mxu3 %v2104_v49  ;;  %v460_v49 = vld [vmem:[#allocation1 + $0x9] sm:$0xff] }
  0x41   : > { %1306 = vmatpush.bf16.msrb.mxu0 %v2079_v55  ;;  %v2144_v55 = vld [vmem:[%s2268_s22 + $0x328] sm:$0xff] }
  0x42   : > { %1319 = vmatpush.bf16.msrb.mxu1 %v2087_v56  ;;  %v2152_v56 = vld [vmem:[%s2268_s22 + $0x368] sm:$0xff] }
  0x43   : > { %1332 = vmatpush.bf16.msrb.mxu2 %v2095_v57  ;;  %v2160_v57 = vld [vmem:[%s2268_s22 + $0x3a8] sm:$0xff] }
  0x44   : > { %1345 = vmatpush.bf16.msrb.mxu3 %v2103_v58  ;;  %v2168_v58 = vld [vmem:[%s2268_s22 + $0x3e8] sm:$0xff] }
  0x45   : > { %1307 = vmatpush.bf16.msrb.mxu0 %v2078_v59  ;;  %v2143_v59 = vld [vmem:[%s2268_s22 + $0x320] sm:$0xff] }
  0x46   : > { %1320 = vmatpush.bf16.msrb.mxu1 %v2086_v60  ;;  %v2151_v60 = vld [vmem:[%s2268_s22 + $0x360] sm:$0xff] }
  0x47   : > { %1333 = vmatpush.bf16.msrb.mxu2 %v2094_v61  ;;  %v2159_v61 = vld [vmem:[%s2268_s22 + $0x3a0] sm:$0xff] }
  0x48   : > { %1346 = vmatpush.bf16.msrb.mxu3 %v2102_v62  ;;  %v2167_v62 = vld [vmem:[%s2268_s22 + $0x3e0] sm:$0xff] }
  0x49   : > { %1308 = vmatpush.bf16.msrb.mxu0 %v2077_v63  ;;  %v2142_v63 = vld [vmem:[%s2268_s22 + $0x318] sm:$0xff] }
  0x4a   : > { %1321 = vmatpush.bf16.msrb.mxu1 %v2085_v0  ;;  %v2150_v0 = vld [vmem:[%s2268_s22 + $0x358] sm:$0xff] }
  0x4b   : > { %1334 = vmatpush.bf16.msrb.mxu2 %v2093_v1  ;;  %v2158_v1 = vld [vmem:[%s2268_s22 + $0x398] sm:$0xff] }
  0x4c   : > { %1347 = vmatpush.bf16.msrb.mxu3 %v2101_v2  ;;  %v2166_v2 = vld [vmem:[%s2268_s22 + $0x3d8] sm:$0xff] }
  0x4d   : > { %1309 = vmatpush.bf16.msrb.mxu0 %v2076_v3  ;;  %v2141_v3 = vld [vmem:[%s2268_s22 + $0x310] sm:$0xff] }
  0x4e   : > { %1322 = vmatpush.bf16.msrb.mxu1 %v2084_v4  ;;  %v2149_v4 = vld [vmem:[%s2268_s22 + $0x350] sm:$0xff] }
  0x4f   : > { %1335 = vmatpush.bf16.msrb.mxu2 %v2092_v5  ;;  %v2157_v5 = vld [vmem:[%s2268_s22 + $0x390] sm:$0xff] }
  0x50   : > { %1348 = vmatpush.bf16.msrb.mxu3 %v2100_v6  ;;  %v2165_v6 = vld [vmem:[%s2268_s22 + $0x3d0] sm:$0xff] }
  0x51   : > { %1310 = vmatpush.bf16.msrb.mxu0 %v2075_v7  ;;  %v2140_v7 = vld [vmem:[%s2268_s22 + $0x308] sm:$0xff] }
  0x52   : > { %1323 = vmatpush.bf16.msrb.mxu1 %v2083_v8  ;;  %v2148_v8 = vld [vmem:[%s2268_s22 + $0x348] sm:$0xff] }
  0x53   : > { %1336 = vmatpush.bf16.msrb.mxu2 %v2091_v9  ;;  %v2156_v9 = vld [vmem:[%s2268_s22 + $0x388] sm:$0xff] }
  0x54   : > { %1349 = vmatpush.bf16.msrb.mxu3 %v2099_v10  ;;  %1311 = vmatmul.bf16.vlgmr.msrb.gmra.mxu0 %v453_v51  ;;  %v2145_v51 = vld [vmem:[%s2268_s22 + $0x330] sm:$0xff]  ;;  %v2164_v10 = vld [vmem:[%s2268_s22 + $0x3c8] sm:$0xff] }
  0x55   : > { %1355 = vmatpush.bf16.msra.mxu0 %v2114_v11  ;;  %1324 = vmatmul.bf16.vlgmr.msrb.gmra.mxu1 %v454_v54  ;;  %v2169_v54 = vld [vmem:[%s2268_s22 + $0x3f0] sm:$0xff]  ;;  %v2139_v11 = vld [vmem:[%s2268_s22 + $0x300] sm:$0xff] }
  0x56   : > { %1368 = vmatpush.bf16.msra.mxu1 %v2122_v12  ;;  %1337 = vmatmul.bf16.vlgmr.msrb.gmra.mxu2 %v455_v50  ;;  %v462_v50 = vld [vmem:[#allocation1 + $0x1b] sm:$0xff] }
  0x57   : > { %1381 = vmatpush.bf16.msra.mxu2 %v2130_v13  ;;  %1350 = vmatmul.bf16.vlgmr.msrb.gmra.mxu3 %v456_v52  ;;  %v2153_v52 = vld [vmem:[%s2268_s22 + $0x370] sm:$0xff]  ;;  %v2147_v12 = vld [vmem:[%s2268_s22 + $0x340] sm:$0xff] }
  0x58   : > { %1394 = vmatpush.bf16.msra.mxu3 %v2138_v14  ;;  %v2155_v13 = vld [vmem:[%s2268_s22 + $0x380] sm:$0xff] }
  0x59   : > { %1356 = vmatpush.bf16.msra.mxu0 %v2113_v15  ;;  %v2163_v14 = vld [vmem:[%s2268_s22 + $0x3c0] sm:$0xff] }
  0x5a   : > { %1369 = vmatpush.bf16.msra.mxu1 %v2121_v16  ;;  %v463_v15 = vld [vmem:[#allocation1 + $0x24] sm:$0xff]  ;;  %v464_v16 = vld [vmem:[#allocation1 + $0x2d] sm:$0xff] }
  0x5b   : > { %1382 = vmatpush.bf16.msra.mxu2 %v2129_v17  ;;  %v465_v17 = vld [vmem:[#allocation1 + $0x36] sm:$0xff] }
  0x5c   : > { %1395 = vmatpush.bf16.msra.mxu3 %v2137_v18  ;;  %v466_v18 = vld [vmem:[#allocation1 + $0x3f] sm:$0xff] }
  0x5d   : > { %1357 = vmatpush.bf16.msra.mxu0 %v2112_v19 }
  0x5e   : > { %1370 = vmatpush.bf16.msra.mxu1 %v2120_v20 }
  0x5f   : > { %1383 = vmatpush.bf16.msra.mxu2 %v2128_v21 }
  0x60   : > { %1396 = vmatpush.bf16.msra.mxu3 %v2136_v22 }
  0x61   : > { %1358 = vmatpush.bf16.msra.mxu0 %v2111_v23 }
  0x62   : > { %1371 = vmatpush.bf16.msra.mxu1 %v2119_v24 }
  0x63   : > { %1384 = vmatpush.bf16.msra.mxu2 %v2127_v25 }
  0x64   : > { %1397 = vmatpush.bf16.msra.mxu3 %v2135_v26 }
  0x65   : > { %1359 = vmatpush.bf16.msra.mxu0 %v2110_v27 }
  0x66   : > { %1372 = vmatpush.bf16.msra.mxu1 %v2118_v28 }
  0x67   : > { %1385 = vmatpush.bf16.msra.mxu2 %v2126_v29 }
  0x68   : > { %1398 = vmatpush.bf16.msra.mxu3 %v2134_v30 }
  0x69   : > { %1360 = vmatpush.bf16.msra.mxu0 %v2109_v31 }
  0x6a   : > { %1373 = vmatpush.bf16.msra.mxu1 %v2117_v32 }
  0x6b   : > { %1386 = vmatpush.bf16.msra.mxu2 %v2125_v33 }
  0x6c   : > { %1399 = vmatpush.bf16.msra.mxu3 %v2133_v34 }
  0x6d   : > { %1361 = vmatpush.bf16.msra.mxu0 %v2108_v35 }
  0x6e   : > { %1374 = vmatpush.bf16.msra.mxu1 %v2116_v36 }
  0x6f   : > { %1387 = vmatpush.bf16.msra.mxu2 %v2124_v37 }
  0x70   : > { %1400 = vmatpush.bf16.msra.mxu3 %v2132_v38 }
  0x71   : > { %1362 = vmatpush.bf16.msra.mxu0 %v2107_v39 }
  0x72   : > { %1375 = vmatpush.bf16.msra.mxu1 %v2115_v40 }
  0x73   : > { %1388 = vmatpush.bf16.msra.mxu2 %v2123_v41 }
  0x74   : > { %1401 = vmatpush.bf16.msra.mxu3 %v2131_v42  ;;  %1363 = vmatmul.bf16.vlgmr.msra.gmra.mxu0 %v459_v47 }
  0x75   : > { %1407 = vmatpush.bf16.msrb.mxu0 %v2146_v43  ;;  %1376 = vmatmul.bf16.vlgmr.msra.gmra.mxu1 %v460_v49 }
  0x76   : > { %1420 = vmatpush.bf16.msrb.mxu1 %v2154_v44  ;;  %1389 = vmatmul.bf16.vlgmr.msra.gmra.mxu2 %v461_v48 }
  0x77   : > { %1433 = vmatpush.bf16.msrb.mxu2 %v2162_v45  ;;  %1402 = vmatmul.bf16.vlgmr.msra.gmra.mxu3 %v462_v50 }
  0x78   : > { %1446 = vmatpush.bf16.msrb.mxu3 %v2170_v46 }
  0x79   : > { %1408 = vmatpush.bf16.msrb.mxu0 %v2145_v51 }
  0x7a   : > { %1421 = vmatpush.bf16.msrb.mxu1 %v2153_v52 }
  0x7b   : > { %1434 = vmatpush.bf16.msrb.mxu2 %v2161_v53 }
  0x7c   : > { %1447 = vmatpush.bf16.msrb.mxu3 %v2169_v54 }
  0x7d   : > { %1409 = vmatpush.bf16.msrb.mxu0 %v2144_v55 }
  0x7e   : > { %1422 = vmatpush.bf16.msrb.mxu1 %v2152_v56 }
  0x7f   : > { %1435 = vmatpush.bf16.msrb.mxu2 %v2160_v57 }
  0x80   : > { %1448 = vmatpush.bf16.msrb.mxu3 %v2168_v58 }
  0x81   : > { %1410 = vmatpush.bf16.msrb.mxu0 %v2143_v59 }
  0x82   : > { %1423 = vmatpush.bf16.msrb.mxu1 %v2151_v60 }
  0x83   : > { %1436 = vmatpush.bf16.msrb.mxu2 %v2159_v61 }
  0x84   : > { %1449 = vmatpush.bf16.msrb.mxu3 %v2167_v62 }
  0x85   : > { %1411 = vmatpush.bf16.msrb.mxu0 %v2142_v63  ;;  %v188_v63 = vld [vmem:[#allocation2] sm:$0x3] }
  0x86   : > { %1424 = vmatpush.bf16.msrb.mxu1 %v2150_v0 }
  0x87   : > { %1437 = vmatpush.bf16.msrb.mxu2 %v2158_v1 }
  0x88   : > { %1450 = vmatpush.bf16.msrb.mxu3 %v2166_v2 }
  0x89   : > { %1412 = vmatpush.bf16.msrb.mxu0 %v2141_v3 }
  0x8a   : > { %1425 = vmatpush.bf16.msrb.mxu1 %v2149_v4 }
  0x8b   : > { %1438 = vmatpush.bf16.msrb.mxu2 %v2157_v5 }
  0x8c   : > { %1451 = vmatpush.bf16.msrb.mxu3 %v2165_v6 }
  0x8d   : > { %1413 = vmatpush.bf16.msrb.mxu0 %v2140_v7 }
  0x8e   : > { %1426 = vmatpush.bf16.msrb.mxu1 %v2148_v8 }
  0x8f   : > { %1439 = vmatpush.bf16.msrb.mxu2 %v2156_v9 }
  0x90   : > { %1452 = vmatpush.bf16.msrb.mxu3 %v2164_v10 }
  0x91   : > { %1414 = vmatpush.bf16.msrb.mxu0 %v2139_v11 }
  0x92   : > { %1427 = vmatpush.bf16.msrb.mxu1 %v2147_v12 }
  0x93   : > { %1440 = vmatpush.bf16.msrb.mxu2 %v2155_v13 }
  0x94   : > { %1453 = vmatpush.bf16.msrb.mxu3 %v2163_v14  ;;  %1415 = vmatmul.bf16.vlgmr.msrb.gmra.mxu0 %v463_v15 }
  0x95   : > { %1428 = vmatmul.bf16.vlgmr.msrb.gmra.mxu1 %v464_v16 }
  0x96   : > { %1441 = vmatmul.bf16.vlgmr.msrb.gmra.mxu2 %v465_v17 }
  0x97   : > { %1454 = vmatmul.bf16.vlgmr.msrb.gmra.mxu3 %v466_v18 }
  0xb1   : > { %v1260_v19 = vpop.f32.mrf.mxu0 }
  0xb2   : > { %v1273_v20 = vpop.f32.mrf.mxu1 }
  0xb3   : > { %v1274_v21 = vadd.f32 %v1273_v20, %v1260_v19 }
  0xb9   : > { %v1286_v22 = vpop.f32.mrf.mxu2  ;;  %v1262_v25 = vpop.f32.mrf.mxu0 }
  0xba   : > { %v1287_v23 = vadd.f32 %v1286_v22, %v1274_v21  ;;  %v1299_v24 = vpop.f32.mrf.mxu3  ;;  %v1275_v27 = vpop.f32.mrf.mxu1 }
  0xbc   : > { %v1300_v26 = vadd.f32 %v1299_v24, %v1287_v23 }
  0xc1   : > { %v1288_v28 = vpop.f32.mrf.mxu2 }
  0xc2   : > { %v1301_v29 = vpop.f32.mrf.mxu3 }
  0xd1   : > { %v1312_v30 = vpop.f32.mrf.mxu0 }
  0xd2   : > { %v1325_v31 = vpop.f32.mrf.mxu1  ;;  %v1313_v40 = vadd.f32 %v1312_v30, %v1300_v26 }
  0xd4   : > { %v1326_v44 = vadd.f32 %v1325_v31, %v1313_v40 }
  0xd9   : > { %v1338_v32 = vpop.f32.mrf.mxu2  ;;  %v1314_v34 = vpop.f32.mrf.mxu0 }
  0xda   : > { %v1351_v33 = vpop.f32.mrf.mxu3  ;;  %v1327_v35 = vpop.f32.mrf.mxu1  ;;  %v1339_v46 = vadd.f32 %v1338_v32, %v1326_v44 }
  0xdc   : > { %v1352_v49 = vadd.f32 %v1351_v33, %v1339_v46 }
  0xe1   : > { %v1340_v36 = vpop.f32.mrf.mxu2 }
  0xe2   : > { %v1353_v37 = vpop.f32.mrf.mxu3 }
  0xf1   : > { %v1364_v38 = vpop.f32.mrf.mxu0 }
  0xf2   : > { %v1377_v39 = vpop.f32.mrf.mxu1  ;;  %v1365_v50 = vadd.f32 %v1364_v38, %v1352_v49 }
  0xf4   : > { %v1378_v51 = vadd.f32 %v1377_v39, %v1365_v50 }
  0xf9   : > { %v1390_v41 = vpop.f32.mrf.mxu2  ;;  %v1366_v43 = vpop.f32.mrf.mxu0 }
  0xfa   : > { %v1403_v42 = vpop.f32.mrf.mxu3  ;;  %v1379_v45 = vpop.f32.mrf.mxu1  ;;  %v1391_v52 = vadd.f32 %v1390_v41, %v1378_v51 }
  0xfc   : > { %v1404_v53 = vadd.f32 %v1403_v42, %v1391_v52 }
 0x101   : > { %v1392_v47 = vpop.f32.mrf.mxu2 }
 0x102   : > { %v1405_v48 = vpop.f32.mrf.mxu3 }
 0x111   : > { %v1416_v54 = vpop.f32.mrf.mxu0 }
 0x112   : > { %v1429_v55 = vpop.f32.mrf.mxu1  ;;  %v1417_v56 = vadd.f32 %v1416_v54, %v1404_v53 }
 0x114   : > { %v1430_v57 = vadd.f32 %v1429_v55, %v1417_v56 }
 0x119   : > { %v1442_v58 = vpop.f32.mrf.mxu2  ;;  %v1418_v61 = vpop.f32.mrf.mxu0 }
 0x11a   : > { %v1455_v59 = vpop.f32.mrf.mxu3  ;;  %v1443_v60 = vadd.f32 %v1442_v58, %v1430_v57  ;;  %v1431_v62 = vpop.f32.mrf.mxu1 }
 0x11c   : > { %v1456_v0 = vadd.f32 %v1455_v59, %v1443_v60 }
 0x11e   : > { %v1459_v1 = vadd.f32 %v1456_v0, %v188_v63 }
 0x120   : > { %1461 = vst.msk [vmem:[#allocation2] sm:$0x3] %vm1460_vm1, %v1459_v1 }
 0x121   : > { %v1444_v2 = vpop.f32.mrf.mxu2  ;;  %2172 = dma.vmem_to_hbm [thread:$0]  (%p2175_p6), %s1469_s26, 32, %s1471_s29, [#allocation3]  }
 0x122   : > { %v1457_v3 = vpop.f32.mrf.mxu3 }
 0x123   : > { %2220 = dma.done.wait (%p2175_p6), [#allocation3], 32  }
 0x124   : > { %2222 = vsyncadd (%p2175_p6), [#allocation3], 4294967264 }
 0x125 PF: > { %s14_s12 = sadd.s32 1, %s2225_s12  }
 0x126   : > { %p11_p7 = scmp.ge.s32.totalorder %s14_s12, 10  }
 0x128   :  { %13 = sbr.rel (!%p11_p7) target bundleno = 1 (0x1), region = 66 }
 0x12d   :  { %1484 = vsyncpa [#allocation3], 1 }
 0x12e   :  { %1486 = vsyncpa [#allocation3 + $0x1], 1 }

</bundles_post_ra>
